<compile_context>
chip_gen: v5e
topology: v5e:2x2
jax: 0.10.0
libtpu: 0.0.40
codegen_flags: <defaults>
</compile_context>

<pallas_src>
import jax
import jax.numpy as jnp
from jax import lax
from jax.experimental import pallas as pl
from jax.experimental.pallas import tpu as pltpu


# -------------------------- hardware / tiling helpers ------------------------
def _vmem_limit_bytes():
    cap = 64 * 1024 * 1024            # conservative fallback (v7x physical VMEM)
    try:
        info = pltpu.get_tpu_info()
        for attr in ("vmem_capacity_bytes", "vmem_size_bytes", "vmem_bytes"):
            v = getattr(info, attr, None)
            if v:
                cap = int(v)
                break
    except Exception:
        pass
    return min((cap * 3) // 4, 100 * 1024 * 1024)


def _k1_vmem_estimate(th, W, Cin, Cout):
    rows = (2 * th + 2) * (W + 2) * Cin * 4          # f32 interleaved-rows scratch
    horiz = 4 * (2 * th + 2) * W * Cin * (4 + 2)     # ev/od f32 + bf16 tap copies
    lhs = 2 * (2 * th * W) * (3 * Cin) * 2           # two live bf16 lhs tiles
    accs = 2 * (2 * th * W) * Cout * 4               # f32 accumulators
    inblk = 2 * (th + 2) * (W + 2) * Cin * 4         # double-buffered f32 input
    outblk = 2 * (2 * th) * W * (2 * Cout) * 2       # double-buffered bf16 output
    wts = 9 * Cin * Cout * 2
    return rows + horiz + lhs + accs + inblk + outblk + wts


def _pick_th(H, W, Cin, Cout, budget):
    # Largest H-tile (pre-upsample rows) dividing H that fits the VMEM budget.
    divs = [d for d in range(H, 0, -1) if H % d == 0]
    cands = [d for d in divs if d <= max(H // 2, 1)] or divs
    cands = [d for d in cands if d <= 64] or [min(cands)]
    for th in cands:
        if _k1_vmem_estimate(th, W, Cin, Cout) <= budget:
            return th
    return cands[-1]


def _pick_tr(Hu, Wu, Cout, budget):
    # Row tile for the BN+ReLU kernel: TR | Hu and TR*Wu lane-aligned (128).
    divs = [d for d in range(Hu, 0, -1) if Hu % d == 0 and (d * Wu) % 128 == 0]
    cands = [d for d in divs if d <= max(Hu // 2, 1)] or divs
    for tr in cands:
        est = tr * Wu * Cout * (2 * 2 + 2 * 4 + 12)   # dbl-buf in/out + f32 temps
        if est <= budget:
            return tr
    return cands[-1] if cands else Hu


# ---------------------------------------------------------------------------
# Kernel 1: fused [2x bilinear upsample + zero-pad + 3x3 conv] on an H-tile,
#           plus per-sample sum / sum-of-squares accumulation for BatchNorm.
#
# grid = (N, n_t)
#   x_ref : (TH+2, W+2, Cin)  replicate-padded input rows for this tile (f32)
#   w_ref : (3, 3*Cin, Cout)  conv weights, K-folded over (kx, cin), bf16
#   y_ref : (2*TH, W, 2*Cout) conv output (bf16), column-phase packed:
#                             [.., s, p*Cout+c] == NHWC element (.., 2*s+p, c)
#                             (byte-identical to NHWC (2*TH, 2*W, Cout))
#   sum_ref / sumsq_ref : (1, Cout) per-sample stats (accumulated over t)
#   rows_ref : VMEM scratch (2*TH+2, W+2, Cin) f32 (vertically upsampled rows)
# ---------------------------------------------------------------------------
def _upconv_kernel(x_ref, w_ref, y_ref, sum_ref, sumsq_ref, rows_ref):
    t = pl.program_id(1)
    n_t = pl.num_programs(1)

    THp2, Wp2, Cin = x_ref.shape
    TH = THp2 - 2
    W = Wp2 - 2
    Cout = sum_ref.shape[-1]
    Hu_t = 2 * TH                      # output rows produced by this tile
    M = Hu_t * W                       # matmul M per column phase

    xv = x_ref[...]                    # (TH+2, W+2, Cin), f32

    # ---- vertical (H) 2x bilinear upsample, align_corners=False -------------
    # local up-row j corresponds to global upsampled row 2*t*TH - 1 + j
    a = xv[:-1]                        # padded rows m
    b = xv[1:]                         # padded rows m+1
    r_even = 0.75 * a + 0.25 * b       # local rows 2m   (odd global rows)
    r_odd = 0.25 * a + 0.75 * b        # local rows 2m+1 (even global rows)
    rows_ref[...] = jnp.stack([r_even, r_odd], axis=1).reshape(Hu_t + 2, Wp2, Cin)

    # conv zero-padding rows at the global top / bottom image border, gated so
    # interior tiles pay nothing.
    @pl.when(t == 0)
    def _():
        rows_ref[0] = jnp.zeros((Wp2, Cin), jnp.float32)

    @pl.when(t == n_t - 1)
    def _():
        rows_ref[Hu_t + 1] = jnp.zeros((Wp2, Cin), jnp.float32)

    rows = rows_ref[...]

    # ---- horizontal (W) 2x bilinear upsample, kept column-phase separated ---
    ca = rows[:, 0:W, :]
    cb = rows[:, 1:W + 1, :]
    cc = rows[:, 2:W + 2, :]
    ev = (0.25 * ca + 0.75 * cb).astype(jnp.bfloat16)   # upsampled col 2s
    od = (0.75 * cb + 0.25 * cc).astype(jnp.bfloat16)   # upsampled col 2s+1

    zc = jnp.zeros((Hu_t + 2, 1, Cin), jnp.bfloat16)
    od_prev = jnp.concatenate([zc, od[:, :W - 1, :]], axis=1)  # col 2s-1 (0 @ s=0)
    ev_next = jnp.concatenate([ev[:, 1:, :], zc], axis=1)      # col 2s+2 (0 @ s=W-1)

    # ---- 3x3 conv as K-folded bf16 MXU matmuls (K = 3*Cin per row tap) -------
    acc0 = jnp.zeros((M, Cout), jnp.float32)   # outputs at even columns (w=2s)
    acc1 = jnp.zeros((M, Cout), jnp.float32)   # outputs at odd  columns (w=2s+1)
    for dy in range(3):
        sl = slice(dy, dy + Hu_t)
        wk = w_ref[dy]                                   # (3*Cin, Cout) bf16
        lhs0 = jnp.concatenate([od_prev[sl], ev[sl], od[sl]], axis=-1)
        lhs1 = jnp.concatenate([ev[sl], od[sl], ev_next[sl]], axis=-1)
        acc0 += jnp.dot(lhs0.reshape(M, 3 * Cin), wk,
                        preferred_element_type=jnp.float32)
        acc1 += jnp.dot(lhs1.reshape(M, 3 * Cin), wk,
                        preferred_element_type=jnp.float32)

    # ---- per-sample BatchNorm statistics (f32, sequential over tile axis) ----
    @pl.when(t == 0)
    def _():
        sum_ref[...] = jnp.zeros_like(sum_ref)
        sumsq_ref[...] = jnp.zeros_like(sumsq_ref)

    sum_ref[...] += (acc0.sum(axis=0, keepdims=True)
                     + acc1.sum(axis=0, keepdims=True))
    sumsq_ref[...] += ((acc0 * acc0).sum(axis=0, keepdims=True)
                       + (acc1 * acc1).sum(axis=0, keepdims=True))

    # ---- store conv output (bf16, column-phase packed == NHWC bytes) --------
    y_ref[...] = jnp.concatenate(
        [acc0.astype(jnp.bfloat16).reshape(Hu_t, W, Cout),
         acc1.astype(jnp.bfloat16).reshape(Hu_t, W, Cout)], axis=-1)


# ---------------------------------------------------------------------------
# Kernel 2: fused per-channel affine (folded BatchNorm) + ReLU, writing the
# result directly in NCHW layout (2-D in-kernel transpose; no XLA transpose).
#   y_ref : (TR, Wu, Cout) bf16 (NHWC view of the conv output)
#   scale_ref / bias_ref : (1, Cout) f32
#   o_ref : (Cout, TR*Wu)  f32  (block of the flattened NCHW output)
# ---------------------------------------------------------------------------
def _bn_relu_nchw_kernel(y_ref, scale_ref, bias_ref, o_ref):
    TR, Wu, Cout = y_ref.shape
    y = y_ref[...].astype(jnp.float32)
    z = jnp.maximum(y * scale_ref[...] + bias_ref[...], 0.0)   # (TR, Wu, Cout)
    o_ref[...] = z.reshape(TR * Wu, Cout).T                    # (Cout, TR*Wu)


# ---------------------------------------------------------------------------
# Wrapper: full `up` forward (concat=True, final=False, norm='batch').
# x1, x2: NCHW float32.  weight: (Cout, Cin, 3, 3) (PyTorch layout).
# ---------------------------------------------------------------------------
@jax.jit
def up_forward(x1, x2, weight, gamma, beta, eps=1e-5):
    # torch.cat((x2, x1), dim=1), moved to NHWC so channels sit on the lane axis
    x = jnp.concatenate(
        [jnp.transpose(x2, (0, 2, 3, 1)), jnp.transpose(x1, (0, 2, 3, 1))],
        axis=-1).astype(jnp.float32)                       # (N, H, W, Cin)
    N, H, W, Cin = x.shape
    Cout = weight.shape[0]
    Hu, Wu = 2 * H, 2 * W

    vmem_limit = _vmem_limit_bytes()
    tile_budget = (vmem_limit * 6) // 10

    # Replicate-pad by 1: implements the Upsample edge clamp so the in-kernel
    # upsample formula is uniform (no boundary special-casing for the clamp).
    # TODO(synk): replace pad + halo-stack with in-kernel overlapping-window
    # DMA (memory_space=pl.ANY + make_async_copy) to drop these extra passes.
    xp = jnp.pad(x, ((0, 0), (1, 1), (1, 1), (0, 0)), mode="edge")

    TH = _pick_th(H, W, Cin, Cout, tile_budget)
    n_t = H // TH
    xt = jnp.stack([xp[:, t * TH: t * TH + TH + 2] for t in range(n_t)],
                   axis=1)                                 # (N, n_t, TH+2, W+2, Cin)

    # weights: (Cout, Cin, ky, kx) -> (ky, kx, Cin, Cout) -> K-folded, bf16
    w2 = jnp.transpose(weight, (2, 3, 1, 0)).astype(jnp.bfloat16)
    w2 = w2.reshape(3, 3 * Cin, Cout)

    conv_out, csum, csumsq = pl.pallas_call(
        _upconv_kernel,
        out_shape=(
            jax.ShapeDtypeStruct((N, Hu, W, 2 * Cout), jnp.bfloat16),
            jax.ShapeDtypeStruct((N, 1, Cout), jnp.float32),
            jax.ShapeDtypeStruct((N, 1, Cout), jnp.float32),
        ),
        grid_spec=pltpu.PrefetchScalarGridSpec(
            num_scalar_prefetch=0,
            grid=(N, n_t),
            in_specs=[
                pl.BlockSpec((None, None, TH + 2, W + 2, Cin),
                             lambda n, t: (n, t, 0, 0, 0)),
                pl.BlockSpec((3, 3 * Cin, Cout), lambda n, t: (0, 0, 0)),
            ],
            out_specs=[
                pl.BlockSpec((None, 2 * TH, W, 2 * Cout),
                             lambda n, t: (n, t, 0, 0)),
                pl.BlockSpec((None, 1, Cout), lambda n, t: (n, 0, 0)),
                pl.BlockSpec((None, 1, Cout), lambda n, t: (n, 0, 0)),
            ],
            scratch_shapes=[pltpu.VMEM((2 * TH + 2, W + 2, Cin), jnp.float32)],
        ),
        compiler_params=pltpu.CompilerParams(
            # batch axis parallel; tile axis sequential (BN stats accumulate).
            dimension_semantics=("parallel", "arbitrary"),
            vmem_limit_bytes=vmem_limit,
        ),
    )(xt, w2)

    # BatchNorm (training-mode batch statistics, biased variance) folded into a
    # per-channel affine; stats come from the f32 accumulators.
    count = jnp.float32(N * Hu * Wu)
    tot = jnp.sum(csum, axis=(0, 1))
    totsq = jnp.sum(csumsq, axis=(0, 1))
    mean = tot / count
    var = totsq / count - mean * mean
    inv_std = lax.rsqrt(var + eps)
    scale1 = gamma.astype(jnp.float32) * inv_std
    bias1 = beta.astype(jnp.float32) - mean * scale1
    scale_row = scale1.reshape(1, Cout)
    bias_row = bias1.reshape(1, Cout)

    # The packed (N, Hu, W, 2*Cout) conv output is byte-identical to NHWC
    # (N, Hu, Wu, Cout): free reshape, no copy.
    y_nhwc = conv_out.reshape(N, Hu, Wu, Cout)

    TR = _pick_tr(Hu, Wu, Cout, tile_budget)
    out_flat = pl.pallas_call(
        _bn_relu_nchw_kernel,
        out_shape=jax.ShapeDtypeStruct((N, Cout, Hu * Wu), jnp.float32),
        grid_spec=pltpu.PrefetchScalarGridSpec(
            num_scalar_prefetch=0,
            grid=(N, Hu // TR),
            in_specs=[
                pl.BlockSpec((None, TR, Wu, Cout), lambda n, r: (n, r, 0, 0)),
                pl.BlockSpec((1, Cout), lambda n, r: (0, 0)),
                pl.BlockSpec((1, Cout), lambda n, r: (0, 0)),
            ],
            out_specs=pl.BlockSpec((None, Cout, TR * Wu),
                                   lambda n, r: (n, 0, r)),
        ),
        compiler_params=pltpu.CompilerParams(
            dimension_semantics=("parallel", "parallel"),
            vmem_limit_bytes=vmem_limit,
        ),
    )(y_nhwc, scale_row, bias_row)

    # Free metadata reshape: (N, Cout, Hu*Wu) -> NCHW (module contract).
    return out_flat.reshape(N, Cout, Hu, Wu)
    # TODO(synk): `final=True` variant (Tanh head, no norm) and norm='instance'
    # are not wired up; default path (concat / batch-norm / ReLU) only.
    # TODO(synk): BatchNorm running-statistics update (eval mode) not emulated.


# ---------------------------------------------------------------------------
# Pure-JAX reference for verification (matches PyTorch bilinear, align_corners=False).
# ---------------------------------------------------------------------------
def _up1d(v, axis):
    lo = jnp.concatenate(
        [lax.slice_in_dim(v, 0, 1, axis=axis),
         lax.slice_in_dim(v, 0, v.shape[axis] - 1, axis=axis)], axis=axis)
    hi = jnp.concatenate(
        [lax.slice_in_dim(v, 1, v.shape[axis], axis=axis),
         lax.slice_in_dim(v, v.shape[axis] - 1, v.shape[axis], axis=axis)],
        axis=axis)
    even = 0.25 * lo + 0.75 * v
    odd = 0.75 * v + 0.25 * hi
    out = jnp.stack([even, odd], axis=axis + 1)
    new_shape = list(v.shape)
    new_shape[axis] *= 2
    return out.reshape(new_shape)


def bilinear_up2x_nhwc(x):
    x = _up1d(x, axis=1)
    x = _up1d(x, axis=2)
    return x


def up_forward_ref(x1, x2, weight, gamma, beta, eps=1e-5):
    x = jnp.concatenate([x2, x1], axis=1)
    x = jnp.transpose(x, (0, 2, 3, 1)).astype(jnp.float32)
    x = bilinear_up2x_nhwc(x)
    w_hwio = jnp.transpose(weight, (2, 3, 1, 0)).astype(jnp.float32)
    y = lax.conv_general_dilated(
        x, w_hwio, window_strides=(1, 1), padding="SAME",
        dimension_numbers=("NHWC", "HWIO", "NHWC"))
    mean = y.mean(axis=(0, 1, 2))
    var = ((y - mean) ** 2).mean(axis=(0, 1, 2))
    y = gamma * (y - mean) * lax.rsqrt(var + eps) + beta
    y = jnp.maximum(y, 0.0)
    return jnp.transpose(y, (0, 3, 1, 2))


if __name__ == "__main__":
    key = jax.random.PRNGKey(0)
    k1, k2, kw = jax.random.split(key, 3)

    N, C, H, W = 2, 4, 16, 16          # x1 and x2 each have 4 channels
    in_ch, out_ch = 2 * C, 8           # concat -> 8 in channels, 8 out

    x1 = jax.random.normal(k1, (N, C, H, W), dtype=jnp.float32)
    x2 = jax.random.normal(k2, (N, C, H, W), dtype=jnp.float32)

    # Deterministic synthetic parameters (no checkpoint loading).
    weight = 0.1 * jax.random.normal(kw, (out_ch, in_ch, 3, 3),
                                     dtype=jnp.float32)
    gamma = jnp.ones((out_ch,), jnp.float32)   # BatchNorm2d default weight
    beta = jnp.zeros((out_ch,), jnp.float32)   # BatchNorm2d default bias

    out = up_forward(x1, x2, weight, gamma, beta)
    out = jax.block_until_ready(out)

    ref = up_forward_ref(x1, x2, weight, gamma, beta)
    assert out.shape == (N, out_ch, 2 * H, 2 * W), out.shape
    # bf16 conv-output storage + bf16 MXU inputs (f32 accumulate): tolerance
    # relaxed vs the all-f32 path.
    if not jnp.allclose(out, ref, atol=4e-2, rtol=4e-2):
        raise AssertionError("Pallas result does not match JAX reference")

    print("KERNEL_OK")
</pallas_src>

<mosaic_0001>
module attributes {stable_mosaic.version = 11 : i64} {
  func.func @_upconv_kernel(%arg0: i32, %arg1: i32, %arg2: memref<1x1x10x18x8xf32, #tpu.memory_space<vmem>>, %arg3: memref<3x24x8xbf16, #tpu.memory_space<vmem>>, %arg4: memref<1x16x16x16xbf16, #tpu.memory_space<vmem>>, %arg5: memref<1x1x8xf32, #tpu.memory_space<vmem>>, %arg6: memref<1x1x8xf32, #tpu.memory_space<vmem>>, %arg7: memref<18x18x8xf32, #tpu.memory_space<vmem>>) attributes {dimension_semantics = [#tpu.dimension_semantics<parallel>, #tpu.dimension_semantics<arbitrary>], iteration_bounds = array<i64: 2, 2>, scalar_prefetch = 0 : i64, scratch_operands = 1 : i64, tpu.core_type = #tpu.core_type<tc>, window_params = [{transform_indices = @transform_0, window_bounds = array<i64: 1, 1, 10, 18, 8>}, {pipeline_mode = #tpu.pipeline_mode<synchronous>, transform_indices = @transform_1, window_bounds = array<i64: 3, 24, 8>}, {transform_indices = @transform_2, window_bounds = array<i64: 1, 16, 16, 16>}, {transform_indices = @transform_3, window_bounds = array<i64: 1, 1, 8>}, {transform_indices = @transform_4, window_bounds = array<i64: 1, 1, 8>}]} {
    %c0 = arith.constant 0 : index
    %c0_0 = arith.constant 0 : index
    %c0_1 = arith.constant 0 : index
    %c0_2 = arith.constant 0 : index
    %c0_3 = arith.constant 0 : index
    %0 = vector.load %arg2[%c0, %c0_0, %c0_1, %c0_2, %c0_3] : memref<1x1x10x18x8xf32, #tpu.memory_space<vmem>>, vector<1x1x10x18x8xf32>
    %1 = vector.shape_cast %0 : vector<1x1x10x18x8xf32> to vector<10x18x8xf32>
    %2 = vector.extract_strided_slice %1 {offsets = [0, 0, 0], sizes = [9, 18, 8], strides = [1, 1, 1]} : vector<10x18x8xf32> to vector<9x18x8xf32>
    %3 = vector.extract_strided_slice %1 {offsets = [1, 0, 0], sizes = [9, 18, 8], strides = [1, 1, 1]} : vector<10x18x8xf32> to vector<9x18x8xf32>
    %cst = arith.constant 7.500000e-01 : f32
    %4 = vector.broadcast %cst : f32 to vector<9x18x8xf32>
    %5 = arith.mulf %4, %2 : vector<9x18x8xf32>
    %cst_4 = arith.constant 2.500000e-01 : f32
    %6 = vector.broadcast %cst_4 : f32 to vector<9x18x8xf32>
    %7 = arith.mulf %6, %3 : vector<9x18x8xf32>
    %8 = arith.addf %5, %7 : vector<9x18x8xf32>
    %cst_5 = arith.constant 2.500000e-01 : f32
    %9 = vector.broadcast %cst_5 : f32 to vector<9x18x8xf32>
    %10 = arith.mulf %9, %2 : vector<9x18x8xf32>
    %cst_6 = arith.constant 7.500000e-01 : f32
    %11 = vector.broadcast %cst_6 : f32 to vector<9x18x8xf32>
    %12 = arith.mulf %11, %3 : vector<9x18x8xf32>
    %13 = arith.addf %10, %12 : vector<9x18x8xf32>
    %14 = vector.shape_cast %8 : vector<9x18x8xf32> to vector<9x1x18x8xf32>
    %15 = vector.shape_cast %13 : vector<9x18x8xf32> to vector<9x1x18x8xf32>
    %16 = tpu.concatenate %14, %15 in 1 : vector<9x1x18x8xf32>, vector<9x1x18x8xf32> -> vector<9x2x18x8xf32>
    %17 = vector.shape_cast %16 : vector<9x2x18x8xf32> to vector<18x18x8xf32>
    %c0_7 = arith.constant 0 : index
    %c0_8 = arith.constant 0 : index
    %c0_9 = arith.constant 0 : index
    %18 = vector.load %arg7[%c0_7, %c0_8, %c0_9] : memref<18x18x8xf32, #tpu.memory_space<vmem>>, vector<18x18x8xf32>
    tpu.vector_store %arg7[%c0_7, %c0_8, %c0_9], %17 {strides = array<i32>} : memref<18x18x8xf32, #tpu.memory_space<vmem>>, vector<18x18x8xf32>,
    %c0_i32 = arith.constant 0 : i32
    %19 = arith.cmpi eq, %arg1, %c0_i32 : i32
    %20 = arith.extui %19 : i1 to i32
    %c0_i32_10 = arith.constant 0 : i32
    %21 = arith.cmpi ne, %20, %c0_i32_10 : i32
    scf.if %21 {
      %cst_57 = arith.constant 0.000000e+00 : f32
      %131 = vector.broadcast %cst_57 : f32 to vector<18x8xf32>
      %c0_58 = arith.constant 0 : index
      %c0_59 = arith.constant 0 : index
      %c0_60 = arith.constant 0 : index
      %132 = vector.load %arg7[%c0_58, %c0_59, %c0_60] : memref<18x18x8xf32, #tpu.memory_space<vmem>>, vector<1x18x8xf32>
      %133 = vector.shape_cast %132 : vector<1x18x8xf32> to vector<18x8xf32>
      %134 = vector.shape_cast %131 : vector<18x8xf32> to vector<1x18x8xf32>
      tpu.vector_store %arg7[%c0_58, %c0_59, %c0_60], %134 {strides = array<i32>} : memref<18x18x8xf32, #tpu.memory_space<vmem>>, vector<1x18x8xf32>,
    } else {
    }
    %c1_i32 = arith.constant 1 : i32
    %22 = arith.cmpi eq, %arg1, %c1_i32 : i32
    %23 = arith.extui %22 : i1 to i32
    %c0_i32_11 = arith.constant 0 : i32
    %24 = arith.cmpi ne, %23, %c0_i32_11 : i32
    scf.if %24 {
      %cst_57 = arith.constant 0.000000e+00 : f32
      %131 = vector.broadcast %cst_57 : f32 to vector<18x8xf32>
      %c17 = arith.constant 17 : index
      %c0_58 = arith.constant 0 : index
      %c0_59 = arith.constant 0 : index
      %132 = vector.load %arg7[%c17, %c0_58, %c0_59] : memref<18x18x8xf32, #tpu.memory_space<vmem>>, vector<1x18x8xf32>
      %133 = vector.shape_cast %132 : vector<1x18x8xf32> to vector<18x8xf32>
      %134 = vector.shape_cast %131 : vector<18x8xf32> to vector<1x18x8xf32>
      tpu.vector_store %arg7[%c17, %c0_58, %c0_59], %134 {strides = array<i32>} : memref<18x18x8xf32, #tpu.memory_space<vmem>>, vector<1x18x8xf32>,
    } else {
    }
    %c0_12 = arith.constant 0 : index
    %c0_13 = arith.constant 0 : index
    %c0_14 = arith.constant 0 : index
    %25 = vector.load %arg7[%c0_12, %c0_13, %c0_14] : memref<18x18x8xf32, #tpu.memory_space<vmem>>, vector<18x18x8xf32>
    %26 = vector.extract_strided_slice %25 {offsets = [0, 0, 0], sizes = [18, 16, 8], strides = [1, 1, 1]} : vector<18x18x8xf32> to vector<18x16x8xf32>
    %27 = vector.extract_strided_slice %25 {offsets = [0, 1, 0], sizes = [18, 16, 8], strides = [1, 1, 1]} : vector<18x18x8xf32> to vector<18x16x8xf32>
    %28 = vector.extract_strided_slice %25 {offsets = [0, 2, 0], sizes = [18, 16, 8], strides = [1, 1, 1]} : vector<18x18x8xf32> to vector<18x16x8xf32>
    %cst_15 = arith.constant 2.500000e-01 : f32
    %29 = vector.broadcast %cst_15 : f32 to vector<18x16x8xf32>
    %30 = arith.mulf %29, %26 : vector<18x16x8xf32>
    %cst_16 = arith.constant 7.500000e-01 : f32
    %31 = vector.broadcast %cst_16 : f32 to vector<18x16x8xf32>
    %32 = arith.mulf %31, %27 : vector<18x16x8xf32>
    %33 = arith.addf %30, %32 : vector<18x16x8xf32>
    %34 = arith.truncf %33 : vector<18x16x8xf32> to vector<18x16x8xbf16>
    %cst_17 = arith.constant 7.500000e-01 : f32
    %35 = vector.broadcast %cst_17 : f32 to vector<18x16x8xf32>
    %36 = arith.mulf %35, %27 : vector<18x16x8xf32>
    %cst_18 = arith.constant 2.500000e-01 : f32
    %37 = vector.broadcast %cst_18 : f32 to vector<18x16x8xf32>
    %38 = arith.mulf %37, %28 : vector<18x16x8xf32>
    %39 = arith.addf %36, %38 : vector<18x16x8xf32>
    %40 = arith.truncf %39 : vector<18x16x8xf32> to vector<18x16x8xbf16>
    %cst_19 = arith.constant 0.000000e+00 : bf16
    %41 = vector.broadcast %cst_19 : bf16 to vector<18x1x8xbf16>
    %42 = vector.extract_strided_slice %40 {offsets = [0, 0, 0], sizes = [18, 15, 8], strides = [1, 1, 1]} : vector<18x16x8xbf16> to vector<18x15x8xbf16>
    %43 = tpu.concatenate %41, %42 in 1 : vector<18x1x8xbf16>, vector<18x15x8xbf16> -> vector<18x16x8xbf16>
    %44 = vector.extract_strided_slice %34 {offsets = [0, 1, 0], sizes = [18, 15, 8], strides = [1, 1, 1]} : vector<18x16x8xbf16> to vector<18x15x8xbf16>
    %45 = tpu.concatenate %44, %41 in 1 : vector<18x15x8xbf16>, vector<18x1x8xbf16> -> vector<18x16x8xbf16>
    %cst_20 = arith.constant 0.000000e+00 : f32
    %46 = vector.broadcast %cst_20 : f32 to vector<256x8xf32>
    %cst_21 = arith.constant 0.000000e+00 : f32
    %47 = vector.broadcast %cst_21 : f32 to vector<256x8xf32>
    %c0_22 = arith.constant 0 : index
    %c0_23 = arith.constant 0 : index
    %c0_24 = arith.constant 0 : index
    %48 = vector.load %arg3[%c0_22, %c0_23, %c0_24] : memref<3x24x8xbf16, #tpu.memory_space<vmem>>, vector<1x24x8xbf16>
    %49 = vector.shape_cast %48 : vector<1x24x8xbf16> to vector<24x8xbf16>
    %50 = vector.extract_strided_slice %43 {offsets = [0, 0, 0], sizes = [16, 16, 8], strides = [1, 1, 1]} : vector<18x16x8xbf16> to vector<16x16x8xbf16>
    %51 = vector.extract_strided_slice %34 {offsets = [0, 0, 0], sizes = [16, 16, 8], strides = [1, 1, 1]} : vector<18x16x8xbf16> to vector<16x16x8xbf16>
    %52 = vector.extract_strided_slice %40 {offsets = [0, 0, 0], sizes = [16, 16, 8], strides = [1, 1, 1]} : vector<18x16x8xbf16> to vector<16x16x8xbf16>
    %53 = tpu.concatenate %50, %51, %52 in 2 : vector<16x16x8xbf16>, vector<16x16x8xbf16>, vector<16x16x8xbf16> -> vector<16x16x24xbf16>
    %54 = vector.extract_strided_slice %34 {offsets = [0, 0, 0], sizes = [16, 16, 8], strides = [1, 1, 1]} : vector<18x16x8xbf16> to vector<16x16x8xbf16>
    %55 = vector.extract_strided_slice %40 {offsets = [0, 0, 0], sizes = [16, 16, 8], strides = [1, 1, 1]} : vector<18x16x8xbf16> to vector<16x16x8xbf16>
    %56 = vector.extract_strided_slice %45 {offsets = [0, 0, 0], sizes = [16, 16, 8], strides = [1, 1, 1]} : vector<18x16x8xbf16> to vector<16x16x8xbf16>
    %57 = tpu.concatenate %54, %55, %56 in 2 : vector<16x16x8xbf16>, vector<16x16x8xbf16>, vector<16x16x8xbf16> -> vector<16x16x24xbf16>
    %58 = vector.shape_cast %53 : vector<16x16x24xbf16> to vector<256x24xbf16>
    %cst_25 = arith.constant dense<0.000000e+00> : vector<256x8xf32>
    %59 = tpu.matmul %58, %49, %cst_25 {dimension_numbers = #tpu.dot_dimension_numbers<[1], [0], [0], [1], [0, 0, 1, 1], [], []>} : vector<256x24xbf16>, vector<24x8xbf16>, vector<256x8xf32> -> vector<256x8xf32>
    %60 = arith.addf %46, %59 : vector<256x8xf32>
    %61 = vector.shape_cast %57 : vector<16x16x24xbf16> to vector<256x24xbf16>
    %cst_26 = arith.constant dense<0.000000e+00> : vector<256x8xf32>
    %62 = tpu.matmul %61, %49, %cst_26 {dimension_numbers = #tpu.dot_dimension_numbers<[1], [0], [0], [1], [0, 0, 1, 1], [], []>} : vector<256x24xbf16>, vector<24x8xbf16>, vector<256x8xf32> -> vector<256x8xf32>
    %63 = arith.addf %47, %62 : vector<256x8xf32>
    %c1 = arith.constant 1 : index
    %c0_27 = arith.constant 0 : index
    %c0_28 = arith.constant 0 : index
    %64 = vector.load %arg3[%c1, %c0_27, %c0_28] : memref<3x24x8xbf16, #tpu.memory_space<vmem>>, vector<1x24x8xbf16>
    %65 = vector.shape_cast %64 : vector<1x24x8xbf16> to vector<24x8xbf16>
    %66 = vector.extract_strided_slice %43 {offsets = [1, 0, 0], sizes = [16, 16, 8], strides = [1, 1, 1]} : vector<18x16x8xbf16> to vector<16x16x8xbf16>
    %67 = vector.extract_strided_slice %34 {offsets = [1, 0, 0], sizes = [16, 16, 8], strides = [1, 1, 1]} : vector<18x16x8xbf16> to vector<16x16x8xbf16>
    %68 = vector.extract_strided_slice %40 {offsets = [1, 0, 0], sizes = [16, 16, 8], strides = [1, 1, 1]} : vector<18x16x8xbf16> to vector<16x16x8xbf16>
    %69 = tpu.concatenate %66, %67, %68 in 2 : vector<16x16x8xbf16>, vector<16x16x8xbf16>, vector<16x16x8xbf16> -> vector<16x16x24xbf16>
    %70 = vector.extract_strided_slice %34 {offsets = [1, 0, 0], sizes = [16, 16, 8], strides = [1, 1, 1]} : vector<18x16x8xbf16> to vector<16x16x8xbf16>
    %71 = vector.extract_strided_slice %40 {offsets = [1, 0, 0], sizes = [16, 16, 8], strides = [1, 1, 1]} : vector<18x16x8xbf16> to vector<16x16x8xbf16>
    %72 = vector.extract_strided_slice %45 {offsets = [1, 0, 0], sizes = [16, 16, 8], strides = [1, 1, 1]} : vector<18x16x8xbf16> to vector<16x16x8xbf16>
    %73 = tpu.concatenate %70, %71, %72 in 2 : vector<16x16x8xbf16>, vector<16x16x8xbf16>, vector<16x16x8xbf16> -> vector<16x16x24xbf16>
    %74 = vector.shape_cast %69 : vector<16x16x24xbf16> to vector<256x24xbf16>
    %cst_29 = arith.constant dense<0.000000e+00> : vector<256x8xf32>
    %75 = tpu.matmul %74, %65, %cst_29 {dimension_numbers = #tpu.dot_dimension_numbers<[1], [0], [0], [1], [0, 0, 1, 1], [], []>} : vector<256x24xbf16>, vector<24x8xbf16>, vector<256x8xf32> -> vector<256x8xf32>
    %76 = arith.addf %60, %75 : vector<256x8xf32>
    %77 = vector.shape_cast %73 : vector<16x16x24xbf16> to vector<256x24xbf16>
    %cst_30 = arith.constant dense<0.000000e+00> : vector<256x8xf32>
    %78 = tpu.matmul %77, %65, %cst_30 {dimension_numbers = #tpu.dot_dimension_numbers<[1], [0], [0], [1], [0, 0, 1, 1], [], []>} : vector<256x24xbf16>, vector<24x8xbf16>, vector<256x8xf32> -> vector<256x8xf32>
    %79 = arith.addf %63, %78 : vector<256x8xf32>
    %c2 = arith.constant 2 : index
    %c0_31 = arith.constant 0 : index
    %c0_32 = arith.constant 0 : index
    %80 = vector.load %arg3[%c2, %c0_31, %c0_32] : memref<3x24x8xbf16, #tpu.memory_space<vmem>>, vector<1x24x8xbf16>
    %81 = vector.shape_cast %80 : vector<1x24x8xbf16> to vector<24x8xbf16>
    %82 = vector.extract_strided_slice %43 {offsets = [2, 0, 0], sizes = [16, 16, 8], strides = [1, 1, 1]} : vector<18x16x8xbf16> to vector<16x16x8xbf16>
    %83 = vector.extract_strided_slice %34 {offsets = [2, 0, 0], sizes = [16, 16, 8], strides = [1, 1, 1]} : vector<18x16x8xbf16> to vector<16x16x8xbf16>
    %84 = vector.extract_strided_slice %40 {offsets = [2, 0, 0], sizes = [16, 16, 8], strides = [1, 1, 1]} : vector<18x16x8xbf16> to vector<16x16x8xbf16>
    %85 = tpu.concatenate %82, %83, %84 in 2 : vector<16x16x8xbf16>, vector<16x16x8xbf16>, vector<16x16x8xbf16> -> vector<16x16x24xbf16>
    %86 = vector.extract_strided_slice %34 {offsets = [2, 0, 0], sizes = [16, 16, 8], strides = [1, 1, 1]} : vector<18x16x8xbf16> to vector<16x16x8xbf16>
    %87 = vector.extract_strided_slice %40 {offsets = [2, 0, 0], sizes = [16, 16, 8], strides = [1, 1, 1]} : vector<18x16x8xbf16> to vector<16x16x8xbf16>
    %88 = vector.extract_strided_slice %45 {offsets = [2, 0, 0], sizes = [16, 16, 8], strides = [1, 1, 1]} : vector<18x16x8xbf16> to vector<16x16x8xbf16>
    %89 = tpu.concatenate %86, %87, %88 in 2 : vector<16x16x8xbf16>, vector<16x16x8xbf16>, vector<16x16x8xbf16> -> vector<16x16x24xbf16>
    %90 = vector.shape_cast %85 : vector<16x16x24xbf16> to vector<256x24xbf16>
    %cst_33 = arith.constant dense<0.000000e+00> : vector<256x8xf32>
    %91 = tpu.matmul %90, %81, %cst_33 {dimension_numbers = #tpu.dot_dimension_numbers<[1], [0], [0], [1], [0, 0, 1, 1], [], []>} : vector<256x24xbf16>, vector<24x8xbf16>, vector<256x8xf32> -> vector<256x8xf32>
    %92 = arith.addf %76, %91 : vector<256x8xf32>
    %93 = vector.shape_cast %89 : vector<16x16x24xbf16> to vector<256x24xbf16>
    %cst_34 = arith.constant dense<0.000000e+00> : vector<256x8xf32>
    %94 = tpu.matmul %93, %81, %cst_34 {dimension_numbers = #tpu.dot_dimension_numbers<[1], [0], [0], [1], [0, 0, 1, 1], [], []>} : vector<256x24xbf16>, vector<24x8xbf16>, vector<256x8xf32> -> vector<256x8xf32>
    %95 = arith.addf %79, %94 : vector<256x8xf32>
    %c0_i32_35 = arith.constant 0 : i32
    %96 = arith.cmpi eq, %arg1, %c0_i32_35 : i32
    %97 = arith.extui %96 : i1 to i32
    %c0_i32_36 = arith.constant 0 : i32
    %98 = arith.cmpi ne, %97, %c0_i32_36 : i32
    scf.if %98 {
      %cst_57 = arith.constant 0.000000e+00 : f32
      %131 = vector.broadcast %cst_57 : f32 to vector<1x8xf32>
      %c0_58 = arith.constant 0 : index
      %c0_59 = arith.constant 0 : index
      %c0_60 = arith.constant 0 : index
      %132 = vector.load %arg5[%c0_58, %c0_59, %c0_60] : memref<1x1x8xf32, #tpu.memory_space<vmem>>, vector<1x1x8xf32>
      %133 = vector.shape_cast %132 : vector<1x1x8xf32> to vector<1x8xf32>
      %134 = vector.shape_cast %131 : vector<1x8xf32> to vector<1x1x8xf32>
      tpu.vector_store %arg5[%c0_58, %c0_59, %c0_60], %134 {strides = array<i32>} : memref<1x1x8xf32, #tpu.memory_space<vmem>>, vector<1x1x8xf32>,
      %cst_61 = arith.constant 0.000000e+00 : f32
      %135 = vector.broadcast %cst_61 : f32 to vector<1x8xf32>
      %c0_62 = arith.constant 0 : index
      %c0_63 = arith.constant 0 : index
      %c0_64 = arith.constant 0 : index
      %136 = vector.load %arg6[%c0_62, %c0_63, %c0_64] : memref<1x1x8xf32, #tpu.memory_space<vmem>>, vector<1x1x8xf32>
      %137 = vector.shape_cast %136 : vector<1x1x8xf32> to vector<1x8xf32>
      %138 = vector.shape_cast %135 : vector<1x8xf32> to vector<1x1x8xf32>
      tpu.vector_store %arg6[%c0_62, %c0_63, %c0_64], %138 {strides = array<i32>} : memref<1x1x8xf32, #tpu.memory_space<vmem>>, vector<1x1x8xf32>,
    } else {
    }
    %c0_37 = arith.constant 0 : index
    %c0_38 = arith.constant 0 : index
    %c0_39 = arith.constant 0 : index
    %99 = vector.load %arg5[%c0_37, %c0_38, %c0_39] : memref<1x1x8xf32, #tpu.memory_space<vmem>>, vector<1x1x8xf32>
    %100 = vector.shape_cast %99 : vector<1x1x8xf32> to vector<1x8xf32>
    %cst_40 = arith.constant dense<0.000000e+00> : vector<8xf32>
    %101 = vector.multi_reduction <add>, %92, %cst_40 [0] : vector<256x8xf32> to vector<8xf32>
    %102 = vector.shape_cast %101 : vector<8xf32> to vector<1x8xf32>
    %cst_41 = arith.constant dense<0.000000e+00> : vector<8xf32>
    %103 = vector.multi_reduction <add>, %95, %cst_41 [0] : vector<256x8xf32> to vector<8xf32>
    %104 = vector.shape_cast %103 : vector<8xf32> to vector<1x8xf32>
    %105 = arith.addf %102, %104 : vector<1x8xf32>
    %106 = arith.addf %100, %105 : vector<1x8xf32>
    %c0_42 = arith.constant 0 : index
    %c0_43 = arith.constant 0 : index
    %c0_44 = arith.constant 0 : index
    %107 = vector.load %arg5[%c0_42, %c0_43, %c0_44] : memref<1x1x8xf32, #tpu.memory_space<vmem>>, vector<1x1x8xf32>
    %108 = vector.shape_cast %107 : vector<1x1x8xf32> to vector<1x8xf32>
    %109 = vector.shape_cast %106 : vector<1x8xf32> to vector<1x1x8xf32>
    tpu.vector_store %arg5[%c0_42, %c0_43, %c0_44], %109 {strides = array<i32>} : memref<1x1x8xf32, #tpu.memory_space<vmem>>, vector<1x1x8xf32>,
    %c0_45 = arith.constant 0 : index
    %c0_46 = arith.constant 0 : index
    %c0_47 = arith.constant 0 : index
    %110 = vector.load %arg6[%c0_45, %c0_46, %c0_47] : memref<1x1x8xf32, #tpu.memory_space<vmem>>, vector<1x1x8xf32>
    %111 = vector.shape_cast %110 : vector<1x1x8xf32> to vector<1x8xf32>
    %112 = arith.mulf %92, %92 : vector<256x8xf32>
    %cst_48 = arith.constant dense<0.000000e+00> : vector<8xf32>
    %113 = vector.multi_reduction <add>, %112, %cst_48 [0] : vector<256x8xf32> to vector<8xf32>
    %114 = vector.shape_cast %113 : vector<8xf32> to vector<1x8xf32>
    %115 = arith.mulf %95, %95 : vector<256x8xf32>
    %cst_49 = arith.constant dense<0.000000e+00> : vector<8xf32>
    %116 = vector.multi_reduction <add>, %115, %cst_49 [0] : vector<256x8xf32> to vector<8xf32>
    %117 = vector.shape_cast %116 : vector<8xf32> to vector<1x8xf32>
    %118 = arith.addf %114, %117 : vector<1x8xf32>
    %119 = arith.addf %111, %118 : vector<1x8xf32>
    %c0_50 = arith.constant 0 : index
    %c0_51 = arith.constant 0 : index
    %c0_52 = arith.constant 0 : index
    %120 = vector.load %arg6[%c0_50, %c0_51, %c0_52] : memref<1x1x8xf32, #tpu.memory_space<vmem>>, vector<1x1x8xf32>
    %121 = vector.shape_cast %120 : vector<1x1x8xf32> to vector<1x8xf32>
    %122 = vector.shape_cast %119 : vector<1x8xf32> to vector<1x1x8xf32>
    tpu.vector_store %arg6[%c0_50, %c0_51, %c0_52], %122 {strides = array<i32>} : memref<1x1x8xf32, #tpu.memory_space<vmem>>, vector<1x1x8xf32>,
    %123 = arith.truncf %92 : vector<256x8xf32> to vector<256x8xbf16>
    %124 = vector.shape_cast %123 : vector<256x8xbf16> to vector<16x16x8xbf16>
    %125 = arith.truncf %95 : vector<256x8xf32> to vector<256x8xbf16>
    %126 = vector.shape_cast %125 : vector<256x8xbf16> to vector<16x16x8xbf16>
    %127 = tpu.concatenate %124, %126 in 2 : vector<16x16x8xbf16>, vector<16x16x8xbf16> -> vector<16x16x16xbf16>
    %c0_53 = arith.constant 0 : index
    %c0_54 = arith.constant 0 : index
    %c0_55 = arith.constant 0 : index
    %c0_56 = arith.constant 0 : index
    %128 = vector.load %arg4[%c0_53, %c0_54, %c0_55, %c0_56] : memref<1x16x16x16xbf16, #tpu.memory_space<vmem>>, vector<1x16x16x16xbf16>
    %129 = vector.shape_cast %128 : vector<1x16x16x16xbf16> to vector<16x16x16xbf16>
    %130 = vector.shape_cast %127 : vector<16x16x16xbf16> to vector<1x16x16x16xbf16>
    tpu.vector_store %arg4[%c0_53, %c0_54, %c0_55, %c0_56], %130 {strides = array<i32>} : memref<1x16x16x16xbf16, #tpu.memory_space<vmem>>, vector<1x16x16x16xbf16>,
    return
  }
  func.func @transform_0(%arg0: i32, %arg1: i32) -> (i32, i32, i32, i32, i32) {
    %c0_i32 = arith.constant 0 : i32
    %c0_i32_0 = arith.constant 0 : i32
    %c0_i32_1 = arith.constant 0 : i32
    %c0_i32_2 = arith.constant 0 : i32
    return %arg0, %arg1, %c0_i32, %c0_i32_0, %c0_i32_1 : i32, i32, i32, i32, i32
  }
  func.func @transform_1(%arg0: i32, %arg1: i32) -> (i32, i32, i32) {
    %c0_i32 = arith.constant 0 : i32
    %c0_i32_0 = arith.constant 0 : i32
    %c0_i32_1 = arith.constant 0 : i32
    %c0_i32_2 = arith.constant 0 : i32
    return %c0_i32, %c0_i32_0, %c0_i32_1 : i32, i32, i32
  }
  func.func @transform_2(%arg0: i32, %arg1: i32) -> (i32, i32, i32, i32) {
    %c0_i32 = arith.constant 0 : i32
    %c0_i32_0 = arith.constant 0 : i32
    %c0_i32_1 = arith.constant 0 : i32
    return %arg0, %arg1, %c0_i32, %c0_i32_0 : i32, i32, i32, i32
  }
  func.func @transform_3(%arg0: i32, %arg1: i32) -> (i32, i32, i32) {
    %c0_i32 = arith.constant 0 : i32
    %c0_i32_0 = arith.constant 0 : i32
    %c0_i32_1 = arith.constant 0 : i32
    return %arg0, %c0_i32, %c0_i32_0 : i32, i32, i32
  }
  func.func @transform_4(%arg0: i32, %arg1: i32) -> (i32, i32, i32) {
    %c0_i32 = arith.constant 0 : i32
    %c0_i32_0 = arith.constant 0 : i32
    %c0_i32_1 = arith.constant 0 : i32
    return %arg0, %c0_i32, %c0_i32_0 : i32, i32, i32
  }
}

module attributes {stable_mosaic.version = 11 : i64} {
  func.func @_bn_relu_nchw_kernel(%arg0: i32, %arg1: i32, %arg2: memref<1x16x32x8xbf16, #tpu.memory_space<vmem>>, %arg3: memref<1x8xf32, #tpu.memory_space<vmem>>, %arg4: memref<1x8xf32, #tpu.memory_space<vmem>>, %arg5: memref<1x8x512xf32, #tpu.memory_space<vmem>>) attributes {dimension_semantics = [#tpu.dimension_semantics<parallel>, #tpu.dimension_semantics<parallel>], iteration_bounds = array<i64: 2, 2>, scalar_prefetch = 0 : i64, scratch_operands = 0 : i64, tpu.core_type = #tpu.core_type<tc>, window_params = [{transform_indices = @transform_0, window_bounds = array<i64: 1, 16, 32, 8>}, {pipeline_mode = #tpu.pipeline_mode<synchronous>, transform_indices = @transform_1, window_bounds = array<i64: 1, 8>}, {pipeline_mode = #tpu.pipeline_mode<synchronous>, transform_indices = @transform_2, window_bounds = array<i64: 1, 8>}, {transform_indices = @transform_3, window_bounds = array<i64: 1, 8, 512>}]} {
    %c0 = arith.constant 0 : index
    %c0_0 = arith.constant 0 : index
    %c0_1 = arith.constant 0 : index
    %c0_2 = arith.constant 0 : index
    %0 = vector.load %arg2[%c0, %c0_0, %c0_1, %c0_2] : memref<1x16x32x8xbf16, #tpu.memory_space<vmem>>, vector<1x16x32x8xbf16>
    %1 = vector.shape_cast %0 : vector<1x16x32x8xbf16> to vector<16x32x8xbf16>
    %2 = arith.extf %1 : vector<16x32x8xbf16> to vector<16x32x8xf32>
    %c0_3 = arith.constant 0 : index
    %c0_4 = arith.constant 0 : index
    %3 = vector.load %arg3[%c0_3, %c0_4] : memref<1x8xf32, #tpu.memory_space<vmem>>, vector<1x8xf32>
    %4 = vector.shape_cast %3 : vector<1x8xf32> to vector<1x1x8xf32>
    %5 = vector.broadcast %4 : vector<1x1x8xf32> to vector<16x32x8xf32>
    %6 = arith.mulf %2, %5 : vector<16x32x8xf32>
    %c0_5 = arith.constant 0 : index
    %c0_6 = arith.constant 0 : index
    %7 = vector.load %arg4[%c0_5, %c0_6] : memref<1x8xf32, #tpu.memory_space<vmem>>, vector<1x8xf32>
    %8 = vector.shape_cast %7 : vector<1x8xf32> to vector<1x1x8xf32>
    %9 = vector.broadcast %8 : vector<1x1x8xf32> to vector<16x32x8xf32>
    %10 = arith.addf %6, %9 : vector<16x32x8xf32>
    %cst = arith.constant 0.000000e+00 : f32
    %11 = vector.broadcast %cst : f32 to vector<16x32x8xf32>
    %12 = arith.maximumf %10, %11 : vector<16x32x8xf32>
    %13 = vector.shape_cast %12 : vector<16x32x8xf32> to vector<512x8xf32>
    %14 = tpu.transpose %13, [1, 0] : vector<512x8xf32> -> vector<8x512xf32>
    %c0_7 = arith.constant 0 : index
    %c0_8 = arith.constant 0 : index
    %c0_9 = arith.constant 0 : index
    %15 = vector.load %arg5[%c0_7, %c0_8, %c0_9] : memref<1x8x512xf32, #tpu.memory_space<vmem>>, vector<1x8x512xf32>
    %16 = vector.shape_cast %15 : vector<1x8x512xf32> to vector<8x512xf32>
    %17 = vector.shape_cast %14 : vector<8x512xf32> to vector<1x8x512xf32>
    tpu.vector_store %arg5[%c0_7, %c0_8, %c0_9], %17 {strides = array<i32>} : memref<1x8x512xf32, #tpu.memory_space<vmem>>, vector<1x8x512xf32>,
    return
  }
  func.func @transform_0(%arg0: i32, %arg1: i32) -> (i32, i32, i32, i32) {
    %c0_i32 = arith.constant 0 : i32
    %c0_i32_0 = arith.constant 0 : i32
    %c0_i32_1 = arith.constant 0 : i32
    return %arg0, %arg1, %c0_i32, %c0_i32_0 : i32, i32, i32, i32
  }
  func.func @transform_1(%arg0: i32, %arg1: i32) -> (i32, i32) {
    %c0_i32 = arith.constant 0 : i32
    %c0_i32_0 = arith.constant 0 : i32
    %c0_i32_1 = arith.constant 0 : i32
    return %c0_i32, %c0_i32_0 : i32, i32
  }
  func.func @transform_2(%arg0: i32, %arg1: i32) -> (i32, i32) {
    %c0_i32 = arith.constant 0 : i32
    %c0_i32_0 = arith.constant 0 : i32
    %c0_i32_1 = arith.constant 0 : i32
    return %c0_i32, %c0_i32_0 : i32, i32
  }
  func.func @transform_3(%arg0: i32, %arg1: i32) -> (i32, i32, i32) {
    %c0_i32 = arith.constant 0 : i32
    %c0_i32_0 = arith.constant 0 : i32
    return %arg0, %c0_i32, %arg1 : i32, i32, i32
  }
}

</mosaic_0001>

<bundles_post_ra>
// kernel: up_forward.3
= control target key start
LH: loop header
LB: loop body
LE: loop exit
PB: predicated region body
PF: predicated region fallthrough
CT: control target
= control target key end

     0   :  { %s1041_s12 = smov 0   ;;  %s1043_s13 = smov 0   ;;  %s1278_s0 = inlined_call_operand.vmem [shape: bf16[2,32,32,8], index: 0, kind: input, shape index: {}]   ;;  %s1279_s1 = inlined_call_operand.vmem [shape: f32[1,8], index: 1, kind: input, shape index: {}]   ;;  %s1280_s2 = inlined_call_operand.vmem [shape: f32[1,8], index: 2, kind: input, shape index: {}]   ;;  %s1281_s3 = inlined_call_operand.vmem [shape: f32[2,8,1024], index: 3, kind: output, shape index: {}]  }
   0x1   :  { %s1045_s14 = smov 0   ;;  %s1047_s15 = smov 0  }
   0x2   :  { %s1049_s16 = smov 0  }
   0x3 LB: > { %s22_s17 = sadd.s32 1, %s1011_s14  ;;  %s25_s18 = sadd.s32 1, %s1015_s15  ;;  %s1019_s16 = sphi %s1049_s16, %s13_s16   ;;  %s1015_s15 = sphi %s1047_s15, %s1285_s15   ;;  %s1011_s14 = sphi %s1045_s14, %s1284_s14   ;;  %s1007_s13 = sphi %s1043_s13, %s1283_s13   ;;  %s1003_s12 = sphi %s1041_s12, %s1282_s12  }
   0x4   : > { %p23_p0 = scmp.ge.s32.totalorder %s22_s17, 2  ;;  %p770_p1 = scmp.ge.s32.totalorder %s1019_s16, 1 }
   0x5   : > { %p159_p2 = scmp.lt.s32.totalorder %s1019_s16, 5 }
   0x6   : > { %s1287_s17 = smov (%p23_p0, %s22_s17), 0  ;;  %s1289_s18 = smov (!%p23_p0, %s25_s18), %s1015_s15 }
   0x7   : > { %p160_p3 = pnand %p770_p1, %p159_p2  ;;  %p27_p4 = scmp.ge.s32.totalorder %s1289_s18, 2 }
   0x8   : > { %s771_s19 = sshll.u32 (!%p160_p3), %s1003_s12, 4  ;;  %p193_p5 = scmp.lt.s32.totalorder (!%p160_p3), %s1007_s13, 1 }
   0x9   : > { %s1291_s18 = smov (%p27_p4, %s1289_s18), 0  ;;  %163 = sbr.rel (%p160_p3) target bundleno = 322 (0x142), region = 32 }
   0xa   : > { %p195_p6 = scmp.lt.s32.totalorder (!%p160_p3), %s771_s19, 31  ;;  %s775_s4 = sshll.u32 (!%p160_p3), %s1003_s12, 2 }
   0xb   : > { %p206_p7 = scmp.lt.s32.totalorder (!%p160_p3), %s775_s4, 7 }
   0xe   : > { %s1293_s13 = smov (!%p193_p5, %s1007_s13), 1  ;;  %s1295_s19 = smov (!%p195_p6, %s771_s19), 31  ;;  %v1085_v0 = vld [vmem:[%s1279_s1] ss:$0 sm:$0xff] }
   0xf   : > { %s773_s20 = sshll.u32 %s1293_s13, 7  ;;  %s772_s21 = sshll.u32 %s1295_s19, 2  ;;  %v1091_v3 = vld [vmem:[%s1280_s2] ss:$0 sm:$0xff] }
  0x10   : > { %s199_s22 = sadd.s32 %s773_s20, %s772_s21  ;;  %s1297_s4 = smov (!%p206_p7, %s775_s4), 7 }
  0x11   : > { %s774_s23 = sshll.u32 %s199_s22, 2  ;;  %s776_s5 = sshll.u32 %s1293_s13, 3 }
  0x12   : > { %s1080_s26 = scalar_lea.vmem %s1278_s0, %s774_s23  ;;  %s209_s6 = sadd.s32 %s776_s5, %s1297_s4 }
  0x13   : > { %v781_v1 = vld [vmem:[%s1080_s26] sm:$0xff]   ;;  %v908_v8 = vld [vmem:[%s1080_s26 + $0x8] sm:$0xff]   ;;  %v909_v18 = vld [vmem:[%s1080_s26 + $0x10] sm:$0xff]   ;;  %s777_s7 = sshll.u32 %s209_s6, 3 }
  0x14   : > { %v782_v2 = vunpack.c.l.bf16 %v781_v1  ;;  %v783_v4 = vunpack.c.h.bf16 %v781_v1  ;;  %v786_v11 = vunpack.c.l.bf16 %v908_v8  ;;  %v787_v15 = vunpack.c.h.bf16 %v908_v8  ;;  %v910_v27 = vld [vmem:[%s1080_s26 + $0x18] sm:$0xff]   ;;  %v911_v36 = vld [vmem:[%s1080_s26 + $0x20] sm:$0xff]   ;;  %v912_v45 = vld [vmem:[%s1080_s26 + $0x28] sm:$0xff]   ;;  %s1246_s10 = scalar_lea.vmem %s1281_s3, %s777_s7 }
  0x15   : > { %v790_v20 = vunpack.c.l.bf16 %v909_v18  ;;  %v791_v24 = vunpack.c.h.bf16 %v909_v18  ;;  %v794_v29 = vunpack.c.l.bf16 %v910_v27  ;;  %v795_v33 = vunpack.c.h.bf16 %v910_v27  ;;  %v913_v54 = vld [vmem:[%s1080_s26 + $0x30] sm:$0xff]   ;;  %v915_v59 = vld [vmem:[%s1080_s26 + $0x40] sm:$0xff]  }
  0x16   : > { %v345_v5 = vmul.f32 %v1085_v0, %v782_v2  ;;  %v346_v7 = vmul.f32 %v1085_v0, %v783_v4  ;;  %v347_v13 = vmul.f32 %v1085_v0, %v786_v11  ;;  %v348_v17 = vmul.f32 %v1085_v0, %v787_v15  ;;  %v923_v11 = vld [vmem:[%s1080_s26 + $0x80] sm:$0xff]  }
  0x17   : > { %v349_v22 = vmul.f32 %v1085_v0, %v790_v20  ;;  %v350_v26 = vmul.f32 %v1085_v0, %v791_v24  ;;  %v351_v31 = vmul.f32 %v1085_v0, %v794_v29  ;;  %v352_v35 = vmul.f32 %v1085_v0, %v795_v33  ;;  %v931_v29 = vld [vmem:[%s1080_s26 + $0xc0] sm:$0xff]  }
  0x18   : > { %v413_v6 = vadd.f32 %v1091_v3, %v345_v5  ;;  %v414_v10 = vadd.f32 %v1091_v3, %v346_v7  ;;  %v415_v14 = vadd.f32 %v1091_v3, %v347_v13  ;;  %v416_v19 = vadd.f32 %v1091_v3, %v348_v17  ;;  %v914_v5 = vld [vmem:[%s1080_s26 + $0x38] sm:$0xff]  }
  0x19   : > { %v417_v23 = vadd.f32 %v1091_v3, %v349_v22  ;;  %v418_v28 = vadd.f32 %v1091_v3, %v350_v26  ;;  %v419_v32 = vadd.f32 %v1091_v3, %v351_v31  ;;  %v420_v37 = vadd.f32 %v1091_v3, %v352_v35 }
  0x1a   : > { %v477_v9 = vmax.f32 %v413_v6, 0.0  ;;  %v478_v12 = vmax.f32 %v414_v10, 0.0  ;;  %v479_v16 = vmax.f32 %v415_v14, 0.0  ;;  %v480_v21 = vmax.f32 %v416_v19, 0.0  ;;  %v916_v19 = vld [vmem:[%s1080_s26 + $0x48] sm:$0xff]  }
  0x1b   : > { %v481_v25 = vmax.f32 %v417_v23, 0.0  ;;  %v482_v30 = vmax.f32 %v418_v28, 0.0  ;;  %v483_v34 = vmax.f32 %v419_v32, 0.0  ;;  %v798_v38 = vunpack.c.l.bf16 %v911_v36 }
  0x1c   : > { %541 = vxpose.xlu0.b32.start [1/16] (narrow) %v477_v9, 8  ;;  %v484_v39 = vmax.f32 %v420_v37, 0.0  ;;  %v799_v42 = vunpack.c.h.bf16 %v911_v36  ;;  %v802_v47 = vunpack.c.l.bf16 %v912_v45  ;;  %v803_v51 = vunpack.c.h.bf16 %v912_v45 }
  0x1d   : > { %v353_v40 = vmul.f32 %v1085_v0, %v798_v38  ;;  %v806_v56 = vunpack.c.l.bf16 %v913_v54  ;;  %v807_v61 = vunpack.c.h.bf16 %v913_v54  ;;  %v814_v62 = vunpack.c.l.bf16 %v915_v59  ;;  %v924_v38 = vld [vmem:[%s1080_s26 + $0x88] sm:$0xff]  }
  0x1e   : > { %v354_v44 = vmul.f32 %v1085_v0, %v799_v42  ;;  %v355_v49 = vmul.f32 %v1085_v0, %v802_v47  ;;  %v356_v53 = vmul.f32 %v1085_v0, %v803_v51  ;;  %v810_v8 = vunpack.c.l.bf16 %v914_v5 }
  0x1f   : > { %v421_v41 = vadd.f32 %v1091_v3, %v353_v40  ;;  %v357_v58 = vmul.f32 %v1085_v0, %v806_v56  ;;  %v361_v63 = vmul.f32 %v1085_v0, %v814_v62  ;;  %v358_v2 = vmul.f32 %v1085_v0, %v807_v61  ;;  %v932_v56 = vld [vmem:[%s1080_s26 + $0xc8] sm:$0xff]  }
  0x20   : > { %v422_v46 = vadd.f32 %v1091_v3, %v354_v44  ;;  %v423_v50 = vadd.f32 %v1091_v3, %v355_v49  ;;  %v424_v55 = vadd.f32 %v1091_v3, %v356_v53  ;;  %v815_v9 = vunpack.c.h.bf16 %v915_v59 }
  0x21   : > { %v485_v43 = vmax.f32 %v421_v41, 0.0  ;;  %v425_v60 = vadd.f32 %v1091_v3, %v357_v58  ;;  %v429_v4 = vadd.f32 %v1091_v3, %v361_v63  ;;  %v426_v7 = vadd.f32 %v1091_v3, %v358_v2  ;;  %v925_v2 = vld [vmem:[%s1080_s26 + $0x90] sm:$0xff]  }
  0x22   : > { %v486_v48 = vmax.f32 %v422_v46, 0.0  ;;  %v487_v52 = vmax.f32 %v423_v50, 0.0  ;;  %v488_v57 = vmax.f32 %v424_v55, 0.0  ;;  %v362_v10 = vmul.f32 %v1085_v0, %v815_v9  ;;  %v917_v46 = vld [vmem:[%s1080_s26 + $0x50] sm:$0xff]  }
  0x23   : > { %v489_v1 = vmax.f32 %v425_v60, 0.0  ;;  %v493_v6 = vmax.f32 %v429_v4, 0.0  ;;  %v490_v13 = vmax.f32 %v426_v7, 0.0  ;;  %v359_v14 = vmul.f32 %v1085_v0, %v810_v8 }
  0x24   : > { %542 = vxpose.xlu0.b32.cont [2/16] (narrow) %v478_v12, 8  ;;  %v846_v12 = vunpack.c.l.bf16 %v923_v11  ;;  %v430_v15 = vadd.f32 %v1091_v3, %v362_v10  ;;  %v818_v22 = vunpack.c.l.bf16 %v916_v19  ;;  %v819_v35 = vunpack.c.h.bf16 %v916_v19 }
  0x25   : > { %573 = vxpose.xlu1.b32.start [1/16] (narrow) %v493_v6, 8  ;;  %v427_v20 = vadd.f32 %v1091_v3, %v359_v14  ;;  %v879_v47 = vunpack.c.h.bf16 %v931_v29  ;;  %v822_v49 = vunpack.c.l.bf16 %v917_v46  ;;  %v882_v61 = vunpack.c.l.bf16 %v932_v56 }
  0x26   : > { %v494_v17 = vmax.f32 %v430_v15, 0.0  ;;  %v363_v24 = vmul.f32 %v1085_v0, %v818_v22  ;;  %v364_v37 = vmul.f32 %v1085_v0, %v819_v35  ;;  %v823_v62 = vunpack.c.h.bf16 %v917_v46 }
  0x27   : > { %v491_v26 = vmax.f32 %v427_v20, 0.0  ;;  %v365_v51 = vmul.f32 %v1085_v0, %v822_v49  ;;  %v394_v54 = vmul.f32 %v1085_v0, %v879_v47  ;;  %v854_v4 = vunpack.c.l.bf16 %v925_v2 }
  0x28   : > { %v431_v28 = vadd.f32 %v1091_v3, %v363_v24  ;;  %v432_v42 = vadd.f32 %v1091_v3, %v364_v37  ;;  %v395_v6 = vmul.f32 %v1085_v0, %v882_v61 }
  0x29   : > { %v433_v55 = vadd.f32 %v1091_v3, %v365_v51  ;;  %v462_v60 = vadd.f32 %v1091_v3, %v394_v54  ;;  %v381_v8 = vmul.f32 %v1085_v0, %v854_v4 }
  0x2a   : > { %v495_v31 = vmax.f32 %v431_v28, 0.0  ;;  %v496_v44 = vmax.f32 %v432_v42, 0.0 }
  0x2b   : > { %v497_v58 = vmax.f32 %v433_v55, 0.0  ;;  %v449_v10 = vadd.f32 %v1091_v3, %v381_v8 }
  0x2c   : > { %543 = vxpose.xlu0.b32.cont [3/16] (narrow) %v479_v16, 8  ;;  %v377_v16 = vmul.f32 %v1085_v0, %v846_v12  ;;  %v463_v12 = vadd.f32 %v1091_v3, %v395_v6 }
  0x2d   : > { %574 = vxpose.xlu1.b32.cont [2/16] (narrow) %v494_v17, 8  ;;  %v513_v15 = vmax.f32 %v449_v10, 0.0  ;;  %v855_v17 = vunpack.c.h.bf16 %v925_v2  ;;  %v920_v2 = vld [vmem:[%s1080_s26 + $0x68] sm:$0xff]  }
  0x2e   : > { %v445_v18 = vadd.f32 %v1091_v3, %v377_v16  ;;  %v834_v6 = vunpack.c.l.bf16 %v920_v2 }
  0x2f   : > { %v382_v22 = vmul.f32 %v1085_v0, %v855_v17 }
  0x30   : > { %v509_v23 = vmax.f32 %v445_v18, 0.0  ;;  %v527_v18 = vmax.f32 %v463_v12, 0.0  ;;  %v371_v8 = vmul.f32 %v1085_v0, %v834_v6 }
  0x31   : > { %v450_v24 = vadd.f32 %v1091_v3, %v382_v22  ;;  %v928_v22 = vld [vmem:[%s1080_s26 + $0xa8] sm:$0xff]  }
  0x32   : > { %605 = vxpose.xlu2.b32.start [1/16] (narrow) %v509_v23, 8  ;;  %v439_v12 = vadd.f32 %v1091_v3, %v371_v8 }
  0x33   : > { %v514_v28 = vmax.f32 %v450_v24, 0.0 }
  0x34   : > { %544 = vxpose.xlu0.b32.cont [4/16] (narrow) %v480_v21, 8  ;;  %v811_v21 = vunpack.c.h.bf16 %v914_v5  ;;  %v526_v5 = vmax.f32 %v462_v60, 0.0 }
  0x35   : > { %575 = vxpose.xlu1.b32.cont [3/16] (narrow) %v495_v31, 8 }
  0x36   : > { %v360_v27 = vmul.f32 %v1085_v0, %v811_v21  ;;  %v933_v21 = vld [vmem:[%s1080_s26 + $0xd0] sm:$0xff]  }
  0x38   : > { %v428_v33 = vadd.f32 %v1091_v3, %v360_v27 }
  0x3a   : > { %v492_v40 = vmax.f32 %v428_v33, 0.0 }
  0x3c   : > { %545 = vxpose.xlu0.b32.cont [5/16] (narrow) %v481_v25, 8  ;;  %v847_v25 = vunpack.c.h.bf16 %v923_v11  ;;  %v918_v11 = vld [vmem:[%s1080_s26 + $0x58] sm:$0xff]  }
  0x3d   : > { %576 = vxpose.xlu1.b32.cont [4/16] (narrow) %v496_v44, 8  ;;  %v826_v14 = vunpack.c.l.bf16 %v918_v11  ;;  %v827_v27 = vunpack.c.h.bf16 %v918_v11 }
  0x3f   : > { %v367_v16 = vmul.f32 %v1085_v0, %v826_v14 }
  0x41   : > { %v435_v20 = vadd.f32 %v1091_v3, %v367_v16 }
  0x43   : > { %v499_v23 = vmax.f32 %v435_v20, 0.0 }
  0x44   : > { %546 = vxpose.xlu0.b32.cont [6/16] (narrow) %v482_v30, 8  ;;  %v378_v30 = vmul.f32 %v1085_v0, %v847_v25 }
  0x45   : > { %577 = vxpose.xlu1.b32.cont [5/16] (narrow) %v497_v58, 8 }
  0x46   : > { %v446_v32 = vadd.f32 %v1091_v3, %v378_v30  ;;  %v926_v30 = vld [vmem:[%s1080_s26 + $0x98] sm:$0xff]  }
  0x47   : > { %v858_v31 = vunpack.c.l.bf16 %v926_v30  ;;  %v859_v44 = vunpack.c.h.bf16 %v926_v30  ;;  %v921_v30 = vld [vmem:[%s1080_s26 + $0x70] sm:$0xff]  }
  0x48   : > { %v510_v36 = vmax.f32 %v446_v32, 0.0 }
  0x49   : > { %v383_v35 = vmul.f32 %v1085_v0, %v858_v31  ;;  %v384_v49 = vmul.f32 %v1085_v0, %v859_v44 }
  0x4a   : > { %606 = vxpose.xlu2.b32.cont [2/16] (narrow) %v510_v36, 8 }
  0x4b   : > { %v451_v37 = vadd.f32 %v1091_v3, %v383_v35  ;;  %v452_v51 = vadd.f32 %v1091_v3, %v384_v49  ;;  %v929_v49 = vld [vmem:[%s1080_s26 + $0xb0] sm:$0xff]  }
  0x4c   : > { %547 = vxpose.xlu0.b32.cont [7/16] (narrow) %v483_v34, 8  ;;  %v878_v34 = vunpack.c.l.bf16 %v931_v29  ;;  %v368_v29 = vmul.f32 %v1085_v0, %v827_v27 }
  0x4d   : > { %v515_v42 = vmax.f32 %v451_v37, 0.0  ;;  %v516_v55 = vmax.f32 %v452_v51, 0.0 }
  0x4e   : > { %v393_v41 = vmul.f32 %v1085_v0, %v878_v34  ;;  %v436_v34 = vadd.f32 %v1091_v3, %v368_v29 }
  0x50   : > { %v500_v36 = vmax.f32 %v436_v34, 0.0 }
  0x54   : > { %548 = vxpose.xlu0.b32.cont [8/16] (narrow) %v484_v39, 8  ;;  %v850_v39 = vunpack.c.l.bf16 %v924_v38 }
  0x5c   : > { %549 = vxpose.xlu0.b32.cont [9/16] (narrow) %v485_v43, 8  ;;  %v379_v43 = vmul.f32 %v1085_v0, %v850_v39 }
  0x5e   : > { %v447_v45 = vadd.f32 %v1091_v3, %v379_v43 }
  0x60   : > { %v511_v50 = vmax.f32 %v447_v45, 0.0 }
  0x62   : > { %607 = vxpose.xlu2.b32.cont [3/16] (narrow) %v511_v50, 8 }
  0x64   : > { %550 = vxpose.xlu0.b32.cont [10/16] (narrow) %v486_v48, 8  ;;  %v461_v48 = vadd.f32 %v1091_v3, %v393_v41 }
  0x66   : > { %v525_v53 = vmax.f32 %v461_v48, 0.0  ;;  %v934_v48 = vld [vmem:[%s1080_s26 + $0xd8] sm:$0xff]  }
  0x6c   : > { %551 = vxpose.xlu0.b32.cont [11/16] (narrow) %v487_v52, 8  ;;  %v851_v52 = vunpack.c.h.bf16 %v924_v38  ;;  %v919_v38 = vld [vmem:[%s1080_s26 + $0x60] sm:$0xff]  }
  0x6d   : > { %v830_v41 = vunpack.c.l.bf16 %v919_v38  ;;  %v831_v54 = vunpack.c.h.bf16 %v919_v38 }
  0x6f   : > { %v369_v43 = vmul.f32 %v1085_v0, %v830_v41 }
  0x71   : > { %v437_v47 = vadd.f32 %v1091_v3, %v369_v43 }
  0x73   : > { %v501_v50 = vmax.f32 %v437_v47, 0.0 }
  0x74   : > { %552 = vxpose.xlu0.b32.cont [12/16] (narrow) %v488_v57, 8  ;;  %v380_v57 = vmul.f32 %v1085_v0, %v851_v52 }
  0x76   : > { %v448_v59 = vadd.f32 %v1091_v3, %v380_v57  ;;  %v927_v57 = vld [vmem:[%s1080_s26 + $0xa0] sm:$0xff]  }
  0x77   : > { %v862_v58 = vunpack.c.l.bf16 %v927_v57 }
  0x78   : > { %v512_v63 = vmax.f32 %v448_v59, 0.0 }
  0x7a   : > { %608 = vxpose.xlu2.b32.cont [4/16] (narrow) %v512_v63, 8 }
  0x7c   : > { %553 = vxpose.xlu0.b32.cont [13/16] (narrow) %v489_v1, 8  ;;  %v366_v1 = vmul.f32 %v1085_v0, %v823_v62  ;;  %v385_v62 = vmul.f32 %v1085_v0, %v862_v58 }
  0x7e   : > { %v434_v7 = vadd.f32 %v1091_v3, %v366_v1  ;;  %v453_v1 = vadd.f32 %v1091_v3, %v385_v62 }
  0x80   : > { %v498_v9 = vmax.f32 %v434_v7, 0.0  ;;  %v517_v7 = vmax.f32 %v453_v1, 0.0 }
  0x82   : > { %578 = vxpose.xlu1.b32.cont [6/16] (narrow) %v498_v9, 8  ;;  %609 = vxpose.xlu2.b32.cont [5/16] (narrow) %v513_v15, 8  ;;  %v863_v9 = vunpack.c.h.bf16 %v927_v57  ;;  %v503_v15 = vmax.f32 %v439_v12, 0.0  ;;  %v922_v57 = vld [vmem:[%s1080_s26 + $0x78] sm:$0xff]  }
  0x84   : > { %554 = vxpose.xlu0.b32.cont [14/16] (narrow) %v490_v13, 8  ;;  %v883_v13 = vunpack.c.h.bf16 %v932_v56  ;;  %v370_v56 = vmul.f32 %v1085_v0, %v831_v54  ;;  %v386_v14 = vmul.f32 %v1085_v0, %v863_v9 }
  0x86   : > { %v396_v19 = vmul.f32 %v1085_v0, %v883_v13  ;;  %v438_v61 = vadd.f32 %v1091_v3, %v370_v56  ;;  %v935_v13 = vld [vmem:[%s1080_s26 + $0xe0] sm:$0xff]   ;;  %v454_v16 = vadd.f32 %v1091_v3, %v386_v14  ;;  %v930_v14 = vld [vmem:[%s1080_s26 + $0xb8] sm:$0xff]  }
  0x88   : > { %v464_v25 = vadd.f32 %v1091_v3, %v396_v19  ;;  %v502_v63 = vmax.f32 %v438_v61, 0.0  ;;  %v835_v19 = vunpack.c.h.bf16 %v920_v2  ;;  %v518_v20 = vmax.f32 %v454_v16, 0.0 }
  0x8a   : > { %579 = vxpose.xlu1.b32.cont [7/16] (narrow) %v499_v23, 8  ;;  %610 = vxpose.xlu2.b32.cont [6/16] (narrow) %v514_v28, 8  ;;  %v528_v32 = vmax.f32 %v464_v25, 0.0  ;;  %v866_v23 = vunpack.c.l.bf16 %v928_v22 }
  0x8c   : > { %555 = vxpose.xlu0.b32.cont [15/16] (narrow) %v491_v26, 8  ;;  %v886_v26 = vunpack.c.l.bf16 %v933_v21  ;;  %v387_v27 = vmul.f32 %v1085_v0, %v866_v23 }
  0x8e   : > { %v397_v33 = vmul.f32 %v1085_v0, %v886_v26  ;;  %v455_v29 = vadd.f32 %v1091_v3, %v387_v27 }
  0x90   : > { %v465_v39 = vadd.f32 %v1091_v3, %v397_v33  ;;  %v838_v33 = vunpack.c.l.bf16 %v921_v30  ;;  %v519_v34 = vmax.f32 %v455_v29, 0.0 }
  0x92   : > { %580 = vxpose.xlu1.b32.cont [8/16] (narrow) %v500_v36, 8  ;;  %611 = vxpose.xlu2.b32.cont [7/16] (narrow) %v515_v42, 8  ;;  %v529_v45 = vmax.f32 %v465_v39, 0.0  ;;  %v373_v35 = vmul.f32 %v1085_v0, %v838_v33  ;;  %v867_v36 = vunpack.c.h.bf16 %v928_v22 }
  0x94   : > { %556 = vxpose.xlu0.b32.end [16/16] (narrow) %v492_v40, 8  ;;  %v887_v40 = vunpack.c.h.bf16 %v933_v21  ;;  %v372_v21 = vmul.f32 %v1085_v0, %v835_v19  ;;  %v441_v39 = vadd.f32 %v1091_v3, %v373_v35  ;;  %v388_v41 = vmul.f32 %v1085_v0, %v867_v36 }
  0x96   : > { %v398_v46 = vmul.f32 %v1085_v0, %v887_v40  ;;  %v440_v26 = vadd.f32 %v1091_v3, %v372_v21  ;;  %v936_v40 = vld [vmem:[%s1080_s26 + $0xe8] sm:$0xff]   ;;  %v505_v42 = vmax.f32 %v441_v39, 0.0  ;;  %v456_v43 = vadd.f32 %v1091_v3, %v388_v41 }
  0x98   : > { %v466_v52 = vadd.f32 %v1091_v3, %v398_v46  ;;  %v504_v28 = vmax.f32 %v440_v26, 0.0  ;;  %v839_v46 = vunpack.c.h.bf16 %v921_v30  ;;  %v520_v47 = vmax.f32 %v456_v43, 0.0 }
  0x9a   : > { %581 = vxpose.xlu1.b32.cont [9/16] (narrow) %v501_v50, 8  ;;  %612 = vxpose.xlu2.b32.cont [8/16] (narrow) %v516_v55, 8  ;;  %v530_v59 = vmax.f32 %v466_v52, 0.0  ;;  %v870_v50 = vunpack.c.l.bf16 %v929_v49 }
  0x9c   : > { %637 = vxpose.xlu0.b32.start [1/16] (narrow) %v525_v53, 8  ;;  %v890_v53 = vunpack.c.l.bf16 %v934_v48  ;;  %v389_v54 = vmul.f32 %v1085_v0, %v870_v50 }
  0x9e   : > { %v399_v60 = vmul.f32 %v1085_v0, %v890_v53  ;;  %v457_v56 = vadd.f32 %v1091_v3, %v389_v54 }
  0xa0   : > { %v467_v4 = vadd.f32 %v1091_v3, %v399_v60  ;;  %v842_v60 = vunpack.c.l.bf16 %v922_v57  ;;  %v521_v61 = vmax.f32 %v457_v56, 0.0 }
  0xa2   : > { %582 = vxpose.xlu1.b32.cont [10/16] (narrow) %v502_v63, 8  ;;  %613 = vxpose.xlu2.b32.cont [9/16] (narrow) %v517_v7, 8  ;;  %v531_v10 = vmax.f32 %v467_v4, 0.0  ;;  %v375_v62 = vmul.f32 %v1085_v0, %v842_v60  ;;  %v871_v63 = vunpack.c.h.bf16 %v929_v49 }
  0xa4   : > { %638 = vxpose.xlu0.b32.cont [2/16] (narrow) %v526_v5, 8  ;;  %v891_v5 = vunpack.c.h.bf16 %v934_v48  ;;  %v374_v48 = vmul.f32 %v1085_v0, %v839_v46  ;;  %v443_v4 = vadd.f32 %v1091_v3, %v375_v62  ;;  %v390_v6 = vmul.f32 %v1085_v0, %v871_v63 }
  0xa6   : > { %v400_v11 = vmul.f32 %v1085_v0, %v891_v5  ;;  %v442_v53 = vadd.f32 %v1091_v3, %v374_v48  ;;  %v937_v5 = vld [vmem:[%s1080_s26 + $0xf0] sm:$0xff]   ;;  %v507_v7 = vmax.f32 %v443_v4, 0.0  ;;  %v458_v8 = vadd.f32 %v1091_v3, %v390_v6 }
  0xa7   : > { %v903_v23 = vunpack.c.h.bf16 %v937_v5 }
  0xa8   : > { %v468_v17 = vadd.f32 %v1091_v3, %v400_v11  ;;  %v506_v55 = vmax.f32 %v442_v53, 0.0  ;;  %v843_v11 = vunpack.c.h.bf16 %v922_v57  ;;  %v522_v12 = vmax.f32 %v458_v8, 0.0 }
  0xa9   : > { %v406_v29 = vmul.f32 %v1085_v0, %v903_v23 }
  0xaa   : > { %583 = vxpose.xlu1.b32.cont [11/16] (narrow) %v503_v15, 8  ;;  %614 = vxpose.xlu2.b32.cont [10/16] (narrow) %v518_v20, 8  ;;  %v532_v24 = vmax.f32 %v468_v17, 0.0  ;;  %v874_v15 = vunpack.c.l.bf16 %v930_v14 }
  0xab   : > { %v474_v33 = vadd.f32 %v1091_v3, %v406_v29 }
  0xac   : > { %639 = vxpose.xlu0.b32.cont [3/16] (narrow) %v527_v18, 8  ;;  %v894_v18 = vunpack.c.l.bf16 %v935_v13  ;;  %v391_v19 = vmul.f32 %v1085_v0, %v874_v15 }
  0xad   : > { %v538_v35 = vmax.f32 %v474_v33, 0.0 }
  0xae   : > { %v401_v25 = vmul.f32 %v1085_v0, %v894_v18  ;;  %v459_v21 = vadd.f32 %v1091_v3, %v391_v19 }
  0xb0   : > { %v469_v31 = vadd.f32 %v1091_v3, %v401_v25  ;;  %v523_v26 = vmax.f32 %v459_v21, 0.0 }
  0xb2   : > { %584 = vxpose.xlu1.b32.cont [12/16] (narrow) %v504_v28, 8  ;;  %615 = vxpose.xlu2.b32.cont [11/16] (narrow) %v519_v34, 8  ;;  %v533_v37 = vmax.f32 %v469_v31, 0.0  ;;  %v938_v31 = vld [vmem:[%s1080_s26 + $0xf8] sm:$0xff]  }
  0xb3   : > { %v906_v34 = vunpack.c.l.bf16 %v938_v31 }
  0xb4   : > { %640 = vxpose.xlu0.b32.cont [4/16] (narrow) %v528_v32, 8  ;;  %v895_v32 = vunpack.c.h.bf16 %v935_v13  ;;  %v376_v13 = vmul.f32 %v1085_v0, %v843_v11 }
  0xb5   : > { %v407_v36 = vmul.f32 %v1085_v0, %v906_v34 }
  0xb6   : > { %v402_v38 = vmul.f32 %v1085_v0, %v895_v32  ;;  %v444_v18 = vadd.f32 %v1091_v3, %v376_v13 }
  0xb8   : > { %v470_v44 = vadd.f32 %v1091_v3, %v402_v38  ;;  %v508_v20 = vmax.f32 %v444_v18, 0.0  ;;  %v907_v38 = vunpack.c.h.bf16 %v938_v31 }
  0xba   : > { %585 = vxpose.xlu1.b32.cont [13/16] (narrow) %v505_v42, 8  ;;  %616 = vxpose.xlu2.b32.cont [12/16] (narrow) %v520_v47, 8  ;;  %v534_v51 = vmax.f32 %v470_v44, 0.0 }
  0xbc   : > { %641 = vxpose.xlu0.b32.cont [5/16] (narrow) %v529_v45, 8  ;;  %v898_v45 = vunpack.c.l.bf16 %v936_v40 }
  0xbe   : > { %v403_v52 = vmul.f32 %v1085_v0, %v898_v45 }
  0xc0   : > { %v471_v58 = vadd.f32 %v1091_v3, %v403_v52  ;;  %v557_v25 = vpop.trf.xlu0 }
  0xc1   : > { %669 = vst [vmem:[%s1246_s10] sm:$0xff] %v557_v25 }
  0xc2   : > { %586 = vxpose.xlu1.b32.cont [14/16] (narrow) %v506_v55, 8  ;;  %617 = vxpose.xlu2.b32.cont [13/16] (narrow) %v521_v61, 8  ;;  %v535_v1 = vmax.f32 %v471_v58, 0.0 }
  0xc4   : > { %642 = vxpose.xlu0.b32.cont [6/16] (narrow) %v530_v59, 8  ;;  %v899_v59 = vunpack.c.h.bf16 %v936_v40  ;;  %v408_v40 = vmul.f32 %v1085_v0, %v907_v38 }
  0xc6   : > { %v404_v2 = vmul.f32 %v1085_v0, %v899_v59  ;;  %v476_v41 = vadd.f32 %v1091_v3, %v408_v40 }
  0xc8   : > { %v472_v9 = vadd.f32 %v1091_v3, %v404_v2  ;;  %v540_v42 = vmax.f32 %v476_v41, 0.0 }
  0xca   : > { %587 = vxpose.xlu1.b32.cont [15/16] (narrow) %v507_v7, 8  ;;  %618 = vxpose.xlu2.b32.cont [14/16] (narrow) %v522_v12, 8  ;;  %v536_v16 = vmax.f32 %v472_v9, 0.0 }
  0xcc   : > { %643 = vxpose.xlu0.b32.cont [7/16] (narrow) %v531_v10, 8  ;;  %v902_v10 = vunpack.c.l.bf16 %v937_v5 }
  0xce   : > { %v405_v17 = vmul.f32 %v1085_v0, %v902_v10 }
  0xd0   : > { %v473_v22 = vadd.f32 %v1091_v3, %v405_v17 }
  0xd2   : > { %588 = vxpose.xlu1.b32.end [16/16] (narrow) %v508_v20, 8  ;;  %619 = vxpose.xlu2.b32.cont [15/16] (narrow) %v523_v26, 8  ;;  %v537_v28 = vmax.f32 %v473_v22, 0.0 }
  0xd4   : > { %644 = vxpose.xlu0.b32.cont [8/16] (narrow) %v532_v24, 8  ;;  %v875_v24 = vunpack.c.h.bf16 %v930_v14 }
  0xd6   : > { %v392_v27 = vmul.f32 %v1085_v0, %v875_v24 }
  0xd8   : > { %v460_v30 = vadd.f32 %v1091_v3, %v392_v27 }
  0xda   : > { %v524_v32 = vmax.f32 %v460_v30, 0.0 }
  0xdc   : > { %645 = vxpose.xlu0.b32.cont [9/16] (narrow) %v533_v37, 8  ;;  %620 = vxpose.xlu2.b32.end [16/16] (narrow) %v524_v32, 8  ;;  %v475_v37 = vadd.f32 %v1091_v3, %v407_v36 }
  0xde   : > { %v539_v39 = vmax.f32 %v475_v37, 0.0 }
  0xe4   : > { %646 = vxpose.xlu0.b32.cont [10/16] (narrow) %v534_v51, 8 }
  0xec   : > { %647 = vxpose.xlu0.b32.cont [11/16] (narrow) %v535_v1, 8 }
  0xf4   : > { %648 = vxpose.xlu0.b32.cont [12/16] (narrow) %v536_v16, 8 }
  0xfc   : > { %649 = vxpose.xlu0.b32.cont [13/16] (narrow) %v537_v28, 8 }
  0xfd   : > { %v621_v43 = vpop.trf.xlu2 }
  0xfe   : > { %v589_v44 = vpop.trf.xlu1  ;;  %671 = vst [vmem:[%s1246_s10 + $0x10] sm:$0xff] %v621_v43 }
  0xff   : > { %670 = vst [vmem:[%s1246_s10 + $0x8] sm:$0xff] %v589_v44 }
 0x104   : > { %650 = vxpose.xlu0.b32.cont [14/16] (narrow) %v538_v35, 8 }
 0x10c   : > { %651 = vxpose.xlu0.b32.cont [15/16] (narrow) %v539_v39, 8 }
 0x114   : > { %652 = vxpose.xlu0.b32.end [16/16] (narrow) %v540_v42, 8 }
 0x140   : > { %v653_v45 = vpop.trf.xlu0 }
 0x141   : > { %672 = vst [vmem:[%s1246_s10 + $0x18] sm:$0xff] %v653_v45 }
 0x142 PF: > { %s13_s16 = sadd.s32 1, %s1019_s16   ;;  %s1282_s12 = smov %s1011_s14 }
 0x143   : > { %p10_p8 = scmp.ge.s32.totalorder %s13_s16, 6   ;;  %s1283_s13 = smov %s1015_s15 }
 0x144   : > { %s1284_s14 = smov %s1287_s17  ;;  %s1285_s15 = smov %s1291_s18 }
 0x145   :  { %12 = sbr.rel (!%p10_p8) target bundleno = 3 (0x3), region = 62 }

// kernel: up_forward.2
= control target key start
LH: loop header
LB: loop body
LE: loop exit
PB: predicated region body
PF: predicated region fallthrough
CT: control target
= control target key end

     0   :  { %s4095_s15 = smov 0   ;;  %s4097_s16 = smov 0   ;;  %s6171_s0 = inlined_call_operand.vmem [shape: f32[2,2,10,18,8], index: 0, kind: input, shape index: {}]   ;;  %s6172_s1 = inlined_call_operand.vmem [shape: bf16[3,24,8], index: 1, kind: input, shape index: {}]   ;;  %s6173_s2 = inlined_call_operand.vmem [shape: bf16[2,32,16,16], index: 2, kind: output, shape index: {0}]   ;;  %s6174_s3 = inlined_call_operand.vmem [shape: f32[2,1,8], index: 3, kind: output, shape index: {1}]   ;;  %s6175_s4 = inlined_call_operand.vmem [shape: f32[2,1,8], index: 4, kind: output, shape index: {2}]  }
   0x1   :  { %s4099_s17 = smov 0   ;;  %s4101_s18 = smov 0  }
   0x2   :  { %s4103_s19 = smov 0  }
   0x3 LB: > { %s24_s20 = sadd.s32 1, %s4055_s17  ;;  %s27_s21 = sadd.s32 1, %s4059_s18  ;;  %s4063_s19 = sphi %s4103_s19, %s15_s19   ;;  %s4059_s18 = sphi %s4101_s18, %s6403_s18   ;;  %s4055_s17 = sphi %s4099_s17, %s6402_s17   ;;  %s4051_s16 = sphi %s4097_s16, %s6401_s16   ;;  %s4047_s15 = sphi %s4095_s15, %s6400_s15  }
   0x4   : > { %p25_p0 = scmp.ge.s32.totalorder %s24_s20, 2  ;;  %p3846_p1 = scmp.ge.s32.totalorder %s4063_s19, 1 }
   0x5   : > { %p187_p2 = scmp.lt.s32.totalorder %s4063_s19, 5 }
   0x6   : > { %s6405_s20 = smov (%p25_p0, %s24_s20), 0  ;;  %s6407_s21 = smov (!%p25_p0, %s27_s21), %s4059_s18 }
   0x7   : > { %p188_p3 = pnand %p3846_p1, %p187_p2  ;;  %p29_p4 = scmp.ge.s32.totalorder %s6407_s21, 2 }
   0x9   : > { %s6409_s21 = smov (%p29_p4, %s6407_s21), 0  ;;  %191 = sbr.rel (%p188_p3) target bundleno = 1036 (0x40c), region = 28 }
   0xe   : > { %p228_p5 = scmp.lt.s32.totalorder %s4051_s16, 1  ;;  %p230_p6 = scmp.lt.s32.totalorder %s4047_s15, 1  ;;  %vm399_vm0 = vcmask 64512   ;;  %vm402_vm1 = vcmask 58368  }
   0xf   : > { %s3848_s22 = sshll.u32 %s4047_s15, 4  ;;  %p3852_p8 = scmp.ne.s32.totalorder %s4047_s15, 0 }
  0x10   : > { %s6411_s16 = smov (!%p228_p5, %s4051_s16), 1  ;;  %p240_p7 = scmp.lt.s32.totalorder %s3848_s22, 31 }
  0x11   : > { %s231_s23 = scalar_select %p230_p6, %s4047_s15, 1 }
  0x12   : > { %s3979_s24 = smul.u32 60, %s6411_s16  ;;  %s3850_s26 = sshll.u32 %s6411_s16, 6 }
  0x13   : > { %s3978_s25 = smul.u32 30, %s231_s23  ;;  %s6413_s22 = smov (!%p240_p7, %s3848_s22), 31 }
  0x14   : > { %s4133_s30 = scalar_lea.vmem %s6174_s3, %s6411_s16  ;;  %s3849_s6 = sshll.u32 %s6413_s22, 1 }
  0x15   : > { %s234_s27 = sadd.s32 %s3979_s24, %s3978_s25  ;;  %s244_s10 = sadd.s32 %s3850_s26, %s3849_s6 }
  0x16   : > { %s3847_s5 = sshll.u32 %s234_s27, 3  ;;  %s3851_s11 = sshll.u32 %s244_s10, 2 }
  0x17   : > { %s4138_s9 = scalar_lea.vmem %s6171_s0, %s3847_s5  ;;  %s4143_s14 = scalar_lea.vmem %s6175_s4, %s6411_s16 }
  0x18   : > { %v255_v0 = vld [vmem:[%s4138_s9] sm:$0xff]  ;;  %v258_v1 = vld [vmem:[%s4138_s9 + $0x18] sm:$0xff]  ;;  %v256_v2 = vld [vmem:[%s4138_s9 + $0x8] sm:$0xff]  ;;  %s4151_s24 = scalar_lea.vmem %s6173_s2, %s3851_s11 }
  0x19   : > { %v285_v3 = vmul.f32 0.75, %v255_v0  ;;  %v312_v4 = vmul.f32 0.25, %v258_v1  ;;  %v259_v5 = vld [vmem:[%s4138_s9 + $0x20] sm:$0xff]  ;;  %v286_v6 = vmul.f32 0.75, %v256_v2  ;;  %v257_v7 = vld [vmem:[%s4138_s9 + $0x10] sm:$0x3] }
  0x1a   : > { %v313_v8 = vmul.f32 0.25, %v259_v5  ;;  %v260_v9 = vld [vmem:[%s4138_s9 + $0x28] sm:$0x3]  ;;  %v287_v10 = vmul.f32 0.75, %v257_v7  ;;  %v288_v11 = vmul.f32 0.75, %v258_v1  ;;  %v366_v12 = vmul.f32 0.25, %v255_v0 }
  0x1b   : > { %v339_v13 = vadd.f32 %v312_v4, %v285_v3  ;;  %v314_v14 = vmul.f32 0.25, %v260_v9  ;;  %v289_v15 = vmul.f32 0.75, %v259_v5  ;;  %v367_v16 = vmul.f32 0.25, %v256_v2  ;;  %v261_v17 = vld [vmem:[%s4138_s9 + $0x30] sm:$0xff]  ;;  %v262_v18 = vld [vmem:[%s4138_s9 + $0x38] sm:$0xff]  ;;  %v264_v31 = vld [vmem:[%s4138_s9 + $0x48] sm:$0xff] }
  0x1c   : > { %v340_v19 = vadd.f32 %v313_v8, %v286_v6  ;;  %v372_v20 = vadd.f32 %v366_v12, %v288_v11  ;;  %v290_v21 = vmul.f32 0.75, %v260_v9  ;;  %v368_v22 = vmul.f32 0.25, %v257_v7  ;;  %v263_v23 = vld [vmem:[%s4138_s9 + $0x40] sm:$0x3]  ;;  %v265_v34 = vld [vmem:[%s4138_s9 + $0x50] sm:$0xff]  ;;  %v268_v49 = vld [vmem:[%s4138_s9 + $0x68] sm:$0xff] }
  0x1d   : > { %400 = vst.msk [vmem:[#allocation2] sm:$0xff] %vm399_vm0, %v339_v13  ;;  %v341_v24 = vadd.f32 %v314_v14, %v287_v10  ;;  %v373_v25 = vadd.f32 %v367_v16, %v289_v15  ;;  %v315_v26 = vmul.f32 0.25, %v261_v17  ;;  %v316_v27 = vmul.f32 0.25, %v262_v18  ;;  %v266_v37 = vld [vmem:[%s4138_s9 + $0x58] sm:$0x3]  ;;  %v267_v46 = vld [vmem:[%s4138_s9 + $0x60] sm:$0xff] }
  0x1e   : > { %401 = vst.msk [vmem:[#allocation2 + $0x8] sm:$0xff] %vm399_vm0, %v340_v19  ;;  %v374_v28 = vadd.f32 %v368_v22, %v290_v21  ;;  %v317_v29 = vmul.f32 0.25, %v263_v23  ;;  %v291_v30 = vmul.f32 0.75, %v261_v17  ;;  %v292_v33 = vmul.f32 0.75, %v262_v18  ;;  %v269_v52 = vld [vmem:[%s4138_s9 + $0x70] sm:$0x3] }
  0x1f   : > { %403 = vst.msk [vmem:[#allocation2 + $0x10] sm:$0x3] %vm402_vm1, %v341_v24  ;;  %v342_v32 = vadd.f32 %v315_v26, %v288_v11  ;;  %v343_v35 = vadd.f32 %v316_v27, %v289_v15  ;;  %v293_v36 = vmul.f32 0.75, %v263_v23  ;;  %v318_v39 = vmul.f32 0.25, %v264_v31  ;;  %v270_v61 = vld [vmem:[%s4138_s9 + $0x78] sm:$0xff]  ;;  %v271_v0 = vld [vmem:[%s4138_s9 + $0x80] sm:$0xff] }
  0x20   : > { %404 = vst.msk [vmem:[#allocation2 + $0x18] sm:$0xff] %vm399_vm0, %v372_v20  ;;  %v344_v38 = vadd.f32 %v317_v29, %v290_v21  ;;  %v375_v40 = vadd.f32 %v312_v4, %v291_v30  ;;  %v319_v41 = vmul.f32 0.25, %v265_v34  ;;  %v376_v42 = vadd.f32 %v313_v8, %v292_v33  ;;  %v272_v3 = vld [vmem:[%s4138_s9 + $0x88] sm:$0x3]  ;;  %v273_v12 = vld [vmem:[%s4138_s9 + $0x90] sm:$0xff]  ;;  %v274_v15 = vld [vmem:[%s4138_s9 + $0x98] sm:$0xff] }
  0x21   : > { %405 = vst.msk [vmem:[#allocation2 + $0x20] sm:$0xff] %vm399_vm0, %v373_v25  ;;  %v320_v43 = vmul.f32 0.25, %v266_v37  ;;  %v377_v44 = vadd.f32 %v314_v14, %v293_v36  ;;  %v294_v45 = vmul.f32 0.75, %v264_v31  ;;  %v345_v47 = vadd.f32 %v318_v39, %v291_v30  ;;  %v275_v18 = vld [vmem:[%s4138_s9 + $0xa0] sm:$0x3]  ;;  %v277_v30 = vld [vmem:[%s4138_s9 + $0xb0] sm:$0xff] }
  0x22   : > { %406 = vst.msk [vmem:[#allocation2 + $0x28] sm:$0x3] %vm402_vm1, %v374_v28  ;;  %v295_v48 = vmul.f32 0.75, %v265_v34  ;;  %v346_v50 = vadd.f32 %v319_v41, %v292_v33  ;;  %v296_v51 = vmul.f32 0.75, %v266_v37  ;;  %v321_v54 = vmul.f32 0.25, %v267_v46 }
  0x23   : > { %407 = vst.msk [vmem:[#allocation2 + $0x30] sm:$0xff] %vm399_vm0, %v342_v32  ;;  %v347_v53 = vadd.f32 %v320_v43, %v293_v36  ;;  %v378_v55 = vadd.f32 %v315_v26, %v294_v45  ;;  %v322_v56 = vmul.f32 0.25, %v268_v49  ;;  %v323_v58 = vmul.f32 0.25, %v269_v52  ;;  %v278_v33 = vld [vmem:[%s4138_s9 + $0xb8] sm:$0x3] }
  0x24   : > { %408 = vst.msk [vmem:[#allocation2 + $0x38] sm:$0xff] %vm399_vm0, %v343_v35  ;;  %v379_v57 = vadd.f32 %v316_v27, %v295_v48  ;;  %v380_v59 = vadd.f32 %v317_v29, %v296_v51  ;;  %v297_v60 = vmul.f32 0.75, %v267_v46  ;;  %v348_v62 = vadd.f32 %v321_v54, %v294_v45  ;;  %v276_v27 = vld [vmem:[%s4138_s9 + $0xa8] sm:$0xff] }
  0x25   : > { %409 = vst.msk [vmem:[#allocation2 + $0x40] sm:$0x3] %vm402_vm1, %v344_v38  ;;  %v298_v63 = vmul.f32 0.75, %v268_v49  ;;  %v349_v1 = vadd.f32 %v322_v56, %v295_v48  ;;  %v299_v2 = vmul.f32 0.75, %v269_v52  ;;  %v350_v4 = vadd.f32 %v323_v58, %v296_v51  ;;  %v280_v45 = vld [vmem:[%s4138_s9 + $0xc8] sm:$0xff] }
  0x26   : > { %410 = vst.msk [vmem:[#allocation2 + $0x48] sm:$0xff] %vm399_vm0, %v375_v40  ;;  %v324_v5 = vmul.f32 0.25, %v270_v61  ;;  %v381_v6 = vadd.f32 %v318_v39, %v297_v60  ;;  %v325_v7 = vmul.f32 0.25, %v271_v0  ;;  %v326_v9 = vmul.f32 0.25, %v272_v3  ;;  %v281_v48 = vld [vmem:[%s4138_s9 + $0xd0] sm:$0x3] }
  0x27   : > { %411 = vst.msk [vmem:[#allocation2 + $0x50] sm:$0xff] %vm399_vm0, %v376_v42  ;;  %v382_v8 = vadd.f32 %v319_v41, %v298_v63  ;;  %v383_v10 = vadd.f32 %v320_v43, %v299_v2  ;;  %v300_v11 = vmul.f32 0.75, %v270_v61  ;;  %v301_v14 = vmul.f32 0.75, %v271_v0  ;;  %v279_v42 = vld [vmem:[%s4138_s9 + $0xc0] sm:$0xff] }
  0x28   : > { %412 = vst.msk [vmem:[#allocation2 + $0x58] sm:$0x3] %vm402_vm1, %v377_v44  ;;  %v351_v13 = vadd.f32 %v324_v5, %v297_v60  ;;  %v352_v16 = vadd.f32 %v325_v7, %v298_v63  ;;  %v302_v17 = vmul.f32 0.75, %v272_v3  ;;  %v353_v19 = vadd.f32 %v326_v9, %v299_v2  ;;  %v283_v60 = vld [vmem:[%s4138_s9 + $0xe0] sm:$0xff]  ;;  %v284_v63 = vld [vmem:[%s4138_s9 + $0xe8] sm:$0x3] }
  0x29   : > { %413 = vst.msk [vmem:[#allocation2 + $0x60] sm:$0xff] %vm399_vm0, %v345_v47  ;;  %v327_v20 = vmul.f32 0.25, %v273_v12  ;;  %v384_v21 = vadd.f32 %v321_v54, %v300_v11  ;;  %v328_v22 = vmul.f32 0.25, %v274_v15  ;;  %v385_v23 = vadd.f32 %v322_v56, %v301_v14 }
  0x2a   : > { %414 = vst.msk [vmem:[#allocation2 + $0x68] sm:$0xff] %vm399_vm0, %v346_v50  ;;  %v329_v24 = vmul.f32 0.25, %v275_v18  ;;  %v386_v25 = vadd.f32 %v323_v58, %v302_v17  ;;  %v303_v26 = vmul.f32 0.75, %v273_v12  ;;  %v304_v29 = vmul.f32 0.75, %v274_v15 }
  0x2b   : > { %415 = vst.msk [vmem:[#allocation2 + $0x70] sm:$0x3] %vm402_vm1, %v347_v53  ;;  %v354_v28 = vadd.f32 %v327_v20, %v300_v11  ;;  %v355_v31 = vadd.f32 %v328_v22, %v301_v14  ;;  %v305_v32 = vmul.f32 0.75, %v275_v18  ;;  %v330_v35 = vmul.f32 0.25, %v276_v27 }
  0x2c   : > { %416 = vst.msk [vmem:[#allocation2 + $0x78] sm:$0xff] %vm399_vm0, %v378_v55  ;;  %v356_v34 = vadd.f32 %v329_v24, %v302_v17  ;;  %v387_v36 = vadd.f32 %v324_v5, %v303_v26  ;;  %v331_v37 = vmul.f32 0.25, %v277_v30  ;;  %v388_v38 = vadd.f32 %v325_v7, %v304_v29 }
  0x2d   : > { %417 = vst.msk [vmem:[#allocation2 + $0x80] sm:$0xff] %vm399_vm0, %v379_v57  ;;  %v332_v39 = vmul.f32 0.25, %v278_v33  ;;  %v389_v40 = vadd.f32 %v326_v9, %v305_v32  ;;  %v306_v41 = vmul.f32 0.75, %v276_v27  ;;  %v357_v43 = vadd.f32 %v330_v35, %v303_v26  ;;  %v282_v57 = vld [vmem:[%s4138_s9 + $0xd8] sm:$0xff] }
  0x2e   : > { %418 = vst.msk [vmem:[#allocation2 + $0x88] sm:$0x3] %vm402_vm1, %v380_v59  ;;  %v307_v44 = vmul.f32 0.75, %v277_v30  ;;  %v358_v46 = vadd.f32 %v331_v37, %v304_v29  ;;  %v308_v47 = vmul.f32 0.75, %v278_v33  ;;  %v333_v50 = vmul.f32 0.25, %v279_v42 }
  0x2f   : > { %419 = vst.msk [vmem:[#allocation2 + $0x90] sm:$0xff] %vm399_vm0, %v348_v62  ;;  %v359_v49 = vadd.f32 %v332_v39, %v305_v32  ;;  %v390_v51 = vadd.f32 %v327_v20, %v306_v41  ;;  %v334_v52 = vmul.f32 0.25, %v280_v45  ;;  %v335_v54 = vmul.f32 0.25, %v281_v48 }
  0x30   : > { %420 = vst.msk [vmem:[#allocation2 + $0x98] sm:$0xff] %vm399_vm0, %v349_v1  ;;  %v391_v53 = vadd.f32 %v328_v22, %v307_v44  ;;  %v392_v55 = vadd.f32 %v329_v24, %v308_v47  ;;  %v309_v56 = vmul.f32 0.75, %v279_v42  ;;  %v360_v58 = vadd.f32 %v333_v50, %v306_v41 }
  0x31   : > { %421 = vst.msk [vmem:[#allocation2 + $0xa0] sm:$0x3] %vm402_vm1, %v350_v4  ;;  %v310_v59 = vmul.f32 0.75, %v280_v45  ;;  %v361_v61 = vadd.f32 %v334_v52, %v307_v44  ;;  %v311_v62 = vmul.f32 0.75, %v281_v48  ;;  %v362_v0 = vadd.f32 %v335_v54, %v308_v47 }
  0x32   : > { %422 = vst.msk [vmem:[#allocation2 + $0xa8] sm:$0xff] %vm399_vm0, %v381_v6  ;;  %v336_v1 = vmul.f32 0.25, %v282_v57  ;;  %v393_v2 = vadd.f32 %v330_v35, %v309_v56  ;;  %v337_v3 = vmul.f32 0.25, %v283_v60  ;;  %v338_v5 = vmul.f32 0.25, %v284_v63 }
  0x33   : > { %423 = vst.msk [vmem:[#allocation2 + $0xb0] sm:$0xff] %vm399_vm0, %v382_v8  ;;  %v394_v4 = vadd.f32 %v331_v37, %v310_v59  ;;  %v395_v6 = vadd.f32 %v332_v39, %v311_v62  ;;  %v369_v7 = vmul.f32 0.75, %v282_v57  ;;  %v370_v9 = vmul.f32 0.75, %v283_v60 }
  0x34   : > { %424 = vst.msk [vmem:[#allocation2 + $0xb8] sm:$0x3] %vm402_vm1, %v383_v10  ;;  %v363_v8 = vadd.f32 %v336_v1, %v309_v56  ;;  %v364_v10 = vadd.f32 %v337_v3, %v310_v59  ;;  %v371_v11 = vmul.f32 0.75, %v284_v63  ;;  %v365_v12 = vadd.f32 %v338_v5, %v311_v62 }
  0x35   : > { %425 = vst.msk [vmem:[#allocation2 + $0xc0] sm:$0xff] %vm399_vm0, %v351_v13  ;;  %v396_v13 = vadd.f32 %v369_v7, %v333_v50  ;;  %v397_v14 = vadd.f32 %v370_v9, %v334_v52 }
  0x36   : > { %426 = vst.msk [vmem:[#allocation2 + $0xc8] sm:$0xff] %vm399_vm0, %v352_v16  ;;  %v398_v15 = vadd.f32 %v371_v11, %v335_v54 }
  0x37   : > { %427 = vst.msk [vmem:[#allocation2 + $0xd0] sm:$0x3] %vm402_vm1, %v353_v19 }
  0x38   : > { %428 = vst.msk [vmem:[#allocation2 + $0xd8] sm:$0xff] %vm399_vm0, %v384_v21 }
  0x39   : > { %429 = vst.msk [vmem:[#allocation2 + $0xe0] sm:$0xff] %vm399_vm0, %v385_v23 }
  0x3a   : > { %430 = vst.msk [vmem:[#allocation2 + $0xe8] sm:$0x3] %vm402_vm1, %v386_v25 }
  0x3b   : > { %431 = vst.msk [vmem:[#allocation2 + $0xf0] sm:$0xff] %vm399_vm0, %v354_v28 }
  0x3c   : > { %432 = vst.msk [vmem:[#allocation2 + $0xf8] sm:$0xff] %vm399_vm0, %v355_v31 }
  0x3d   : > { %433 = vst.msk [vmem:[#allocation2 + $0x100] sm:$0x3] %vm402_vm1, %v356_v34 }
  0x3e   : > { %434 = vst.msk [vmem:[#allocation2 + $0x108] sm:$0xff] %vm399_vm0, %v387_v36 }
  0x3f   : > { %435 = vst.msk [vmem:[#allocation2 + $0x110] sm:$0xff] %vm399_vm0, %v388_v38 }
  0x40   : > { %436 = vst.msk [vmem:[#allocation2 + $0x118] sm:$0x3] %vm402_vm1, %v389_v40 }
  0x41   : > { %437 = vst.msk [vmem:[#allocation2 + $0x120] sm:$0xff] %vm399_vm0, %v357_v43 }
  0x42   : > { %438 = vst.msk [vmem:[#allocation2 + $0x128] sm:$0xff] %vm399_vm0, %v358_v46 }
  0x43   : > { %439 = vst.msk [vmem:[#allocation2 + $0x130] sm:$0x3] %vm402_vm1, %v359_v49 }
  0x44   : > { %440 = vst.msk [vmem:[#allocation2 + $0x138] sm:$0xff] %vm399_vm0, %v390_v51 }
  0x45   : > { %441 = vst.msk [vmem:[#allocation2 + $0x140] sm:$0xff] %vm399_vm0, %v391_v53 }
  0x46   : > { %442 = vst.msk [vmem:[#allocation2 + $0x148] sm:$0x3] %vm402_vm1, %v392_v55 }
  0x47   : > { %443 = vst.msk [vmem:[#allocation2 + $0x150] sm:$0xff] %vm399_vm0, %v360_v58 }
  0x48   : > { %444 = vst.msk [vmem:[#allocation2 + $0x158] sm:$0xff] %vm399_vm0, %v361_v61 }
  0x49   : > { %445 = vst.msk [vmem:[#allocation2 + $0x160] sm:$0x3] %vm402_vm1, %v362_v0 }
  0x4a   : > { %446 = vst.msk [vmem:[#allocation2 + $0x168] sm:$0xff] %vm399_vm0, %v393_v2 }
  0x4b   : > { %447 = vst.msk [vmem:[#allocation2 + $0x170] sm:$0xff] %vm399_vm0, %v394_v4 }
  0x4c   : > { %448 = vst.msk [vmem:[#allocation2 + $0x178] sm:$0x3] %vm402_vm1, %v395_v6 }
  0x4d   : > { %449 = vst.msk [vmem:[#allocation2 + $0x180] sm:$0xff] %vm399_vm0, %v363_v8 }
  0x4e   : > { %450 = vst.msk [vmem:[#allocation2 + $0x188] sm:$0xff] %vm399_vm0, %v364_v10  ;;  %458 = sbr.rel (%p3852_p8) target bundleno = 87 (0x57), region = 32 }
  0x4f   : > { %451 = vst.msk [vmem:[#allocation2 + $0x190] sm:$0x3] %vm402_vm1, %v365_v12 }
  0x50   : > { %452 = vst.msk [vmem:[#allocation2 + $0x198] sm:$0xff] %vm399_vm0, %v396_v13 }
  0x51   : > { %453 = vst.msk [vmem:[#allocation2 + $0x1a0] sm:$0xff] %vm399_vm0, %v397_v14 }
  0x52   : > { %454 = vst.msk [vmem:[#allocation2 + $0x1a8] sm:$0x3] %vm402_vm1, %v398_v15 }
  0x53   : > { %v4065_v16 = vmov 0.0  }
  0x54   : > { %459 = vst.msk [vmem:[#allocation2] sm:$0xff] %vm399_vm0, %v4065_v16 }
  0x55   : > { %460 = vst.msk [vmem:[#allocation2 + $0x8] sm:$0xff] %vm399_vm0, %v4065_v16 }
  0x56   : > { %461 = vst.msk [vmem:[#allocation2 + $0x10] sm:$0x3] %vm402_vm1, %v4065_v16 }
  0x57 PF: > { %p3853_p9 = scmp.ne.s32.totalorder %s4047_s15, 1 }
  0x59   : > { %465 = sbr.rel (%p3853_p9) target bundleno = 98 (0x62), region = 36 }
  0x5e   : > { %v4066_v17 = vmov 0.0  }
  0x5f   : > { %467 = vst.msk [vmem:[#allocation2 + $0x198] sm:$0xff] %vm399_vm0, %v4066_v17 }
  0x60   : > { %468 = vst.msk [vmem:[#allocation2 + $0x1a0] sm:$0xff] %vm399_vm0, %v4066_v17 }
  0x61   : > { %469 = vst.msk [vmem:[#allocation2 + $0x1a8] sm:$0x3] %vm402_vm1, %v4066_v17 }
  0x62 PF: > { %v494_v18 = vld [vmem:[#allocation2 + $0xc0] sm:$0xff]  ;;  %v495_v19 = vld [vmem:[#allocation2 + $0xc8] sm:$0xff]  ;;  %v496_v20 = vld [vmem:[#allocation2 + $0xd0] sm:$0x3]  ;;  %vm668_vm2 = vcmask 1046528   ;;  %s4067_s16 = smov 8  }
  0x63   : > { %v540_v21 = vmul.f32 0.25, %v494_v18  ;;  %v541_v22 = vmul.f32 0.25, %v495_v19  ;;  %v584_v23 = vmul.f32 0.75, %v494_v18  ;;  %v585_v24 = vmul.f32 0.75, %v495_v19  ;;  %v497_v25 = vld [vmem:[#allocation2 + $0xd8] sm:$0xff]  ;;  %v498_v28 = vld [vmem:[#allocation2 + $0xe0] sm:$0xff] }
  0x64   : > { %v586_v26 = vmul.f32 0.75, %v496_v20  ;;  %v875_v27 = vmul.f32 0.25, %v496_v20  ;;  %v542_v29 = vmul.f32 0.25, %v497_v25  ;;  %v499_v34 = vld [vmem:[#allocation2 + $0xe8] sm:$0x3]  ;;  %v543_v37 = vmul.f32 0.25, %v498_v28 }
  0x65   : > { %v709_v30 = vrot.slane %v584_v23, 1  ;;  %v710_v31 = vrot.slane %v585_v24, 1  ;;  %v979_v32 = vrot.slane %v540_v21, 1  ;;  %v980_v33 = vrot.slane %v541_v22, 1  ;;  %v470_v59 = vld [vmem:[#allocation2] sm:$0xff]  ;;  %v471_v4 = vld [vmem:[#allocation2 + $0x8] sm:$0xff] }
  0x66   : > { %v712_v35 = vrot.slane %v586_v26, 1  ;;  %v982_v36 = vrot.slane %v875_v27, 1  ;;  %v587_v38 = vmul.f32 0.75, %v497_v25  ;;  %v588_v41 = vmul.f32 0.75, %v498_v28  ;;  %v472_v25 = vld [vmem:[#allocation2 + $0x10] sm:$0x3] }
  0x67   : > { %v711_v39 = vsel %vm668_vm2, %v709_v30, %v710_v31  ;;  %v981_v40 = vsel %vm668_vm2, %v979_v32, %v980_v33  ;;  %v589_v42 = vmul.f32 0.75, %v499_v34  ;;  %v984_v58 = vrot.slane %v542_v29, 1  ;;  %s4068_s25 = smov 16  }
  0x68   : > { %v713_v43 = vsel %vm668_vm2, %v710_v31, %v712_v35  ;;  %v811_v44 = vadd.f32 %v711_v39, %v540_v21  ;;  %v983_v45 = vsel %vm668_vm2, %v980_v33, %v982_v36  ;;  %v1107_v46 = vadd.f32 %v981_v40, %v584_v23  ;;  %v473_v39 = vld [vmem:[#allocation2 + $0x18] sm:$0xff] }
  0x69   : > { %v812_v47 = vadd.f32 %v713_v43, %v541_v22  ;;  %v1108_v48 = vadd.f32 %v983_v45, %v585_v24  ;;  %v1109_v49 = vadd.f32 %v982_v36, %v586_v26  ;;  %v714_v50 = vrot.slane %v587_v38, 1 }
  0x6a   : > { %v847_v51 = vpack.c.bf16 %v811_v44, %v811_v44  ;;  %v1161_v52 = vpack.c.bf16 %v1107_v46, %v1107_v46  ;;  %v715_v53 = vrot.slane %v588_v41, 1  ;;  %v717_v54 = vrot.slane %v589_v42, 1 }
  0x6b   : > { %v848_v55 = vpack.c.bf16 %v812_v47, %v812_v47  ;;  %v1162_v56 = vpack.c.bf16 %v1108_v48, %v1108_v48  ;;  %v1163_v57 = vpack.c.bf16 %v1109_v49, %v1109_v49  ;;  %vm1555_vm3 = vsmask.f32 7424 }
  0x6c   : > { %v1372_v60 = vunpack.c.l.b16 %v847_v51  ;;  %v1243_v61 = vunpack.c.l.b16 %v1161_v52  ;;  %v716_v62 = vsel %vm668_vm2, %v714_v50, %v715_v53  ;;  %v718_v63 = vsel %vm668_vm2, %v715_v53, %v717_v54 }
  0x6d   : > { %v1373_v0 = vunpack.c.l.b16 %v848_v55  ;;  %v1244_v1 = vunpack.c.l.b16 %v1162_v56  ;;  %v1634_v2 = vunpack.c.l.b16 %v1163_v57  ;;  %v813_v3 = vadd.f32 %v716_v62, %v542_v29  ;;  %v475_v55 = vld [vmem:[#allocation2 + $0x28] sm:$0x3] }
  0x6e   : > { %v814_v5 = vadd.f32 %v718_v63, %v543_v37  ;;  %v985_v6 = vrot.slane %v543_v37, 1  ;;  %v876_v7 = vmul.f32 0.25, %v499_v34  ;;  %v4250_v8 = vmul.f32 0.25, %v470_v59 }
  0x6f   : > { %v4252_v9 = vpack.c.b16 %v1373_v0, %v1372_v60  ;;  %v4254_v10 = vpack.c.b16 %v1244_v1, %v1243_v61  ;;  %v1650_v11 = vpack.c.b16 %v1634_v2, %v1634_v2  ;;  %v849_v12 = vpack.c.bf16 %v813_v3, %v813_v3 }
  0x70   : > { %v850_v13 = vpack.c.bf16 %v814_v5, %v814_v5  ;;  %v986_v14 = vsel %vm668_vm2, %v984_v58, %v985_v6  ;;  %v987_v15 = vrot.slane %v876_v7, 1  ;;  %v4257_v16 = vmul.f32 0.25, %v471_v4  ;;  %v501_v5 = vld [vmem:[#allocation2 + $0xf8] sm:$0xff] }
  0x71   : > { %6241 = vst [vmem:[#allocation3_spill] sm:$0xff] %v4252_v9  ;;  %1594 = vrot.lane.b32.xlu0 %v4252_v9, %s4067_s16  ;;  %v1755_v17 = vshrl.u32 %v4254_v10, 16  ;;  %v1757_v18 = vshll.u32 %v4254_v10, 16  ;;  %v1762_v19 = vshll.u32 %v1650_v11, 16  ;;  %v1374_v20 = vunpack.c.l.b16 %v849_v12 }
  0x72   : > { %v1375_v21 = vunpack.c.l.b16 %v850_v13  ;;  %v988_v22 = vsel %vm668_vm2, %v985_v6, %v987_v15  ;;  %v1110_v23 = vadd.f32 %v986_v14, %v587_v38  ;;  %v1112_v24 = vadd.f32 %v987_v15, %v589_v42  ;;  %v474_v38 = vld [vmem:[#allocation2 + $0x20] sm:$0xff] }
  0x73   : > { %v1759_v26 = vrot.slane %v1757_v18, 1  ;;  %v1764_v27 = vrot.slane %v1762_v19, 1  ;;  %v1111_v28 = vadd.f32 %v988_v22, %v588_v41  ;;  %v4264_v29 = vmul.f32 0.75, %v470_v59 }
  0x74   : > { %v4266_v30 = vpack.c.b16 %v1375_v21, %v1374_v20  ;;  %v1164_v31 = vpack.c.bf16 %v1110_v23, %v1110_v23  ;;  %v1166_v32 = vpack.c.bf16 %v1112_v24, %v1112_v24  ;;  %v4268_v33 = vmul.f32 0.75, %v471_v4  ;;  %v500_v4 = vld [vmem:[#allocation2 + $0xf0] sm:$0xff] }
  0x75   : > { %v1760_v34 = vor.u32 %v1759_v26, %v1755_v17  ;;  %v1165_v35 = vpack.c.bf16 %v1111_v28, %v1111_v28  ;;  %v4270_v36 = vmul.f32 0.75, %v472_v25  ;;  %v867_v37 = vmul.f32 0.25, %v472_v25 }
  0x76   : > { %6242 = vst [vmem:[#allocation4_spill] sm:$0xff] %v4266_v30  ;;  %v1245_v40 = vunpack.c.l.b16 %v1164_v31  ;;  %v1635_v42 = vunpack.c.l.b16 %v1166_v32  ;;  %v939_v43 = vrot.slane %v4250_v8, 1  ;;  %v940_v41 = vrot.slane %v4257_v16, 1  ;;  %v502_v32 = vld [vmem:[#allocation2 + $0x100] sm:$0x3] }
  0x77   : > { %v4275_v44 = vsel %vm1555_vm3, %v1760_v34, %v1764_v27  ;;  %v1246_v45 = vunpack.c.l.b16 %v1165_v35  ;;  %v942_v46 = vrot.slane %v867_v37, 1  ;;  %v4280_v49 = vmul.f32 0.25, %v473_v39 }
  0x78   : > { %6243 = vst [vmem:[#allocation5_spill] sm:$0xff] %v4275_v44  ;;  %1866 = vrot.lane.b32.xlu1 %v4275_v44, %s4068_s25  ;;  %v1651_v47 = vpack.c.b16 %v1635_v42, %v1635_v42  ;;  %v941_v48 = vsel %vm668_vm2, %v939_v43, %v940_v41  ;;  %v4282_v50 = vmul.f32 0.25, %v474_v38  ;;  %v4292_v58 = vmul.f32 0.75, %v473_v39 }
  0x79   : > { %1596 = vrot.lane.b32.xlu0 %v4266_v30, %s4067_s16  ;;  %v4286_v51 = vpack.c.b16 %v1246_v45, %v1245_v40  ;;  %v943_v52 = vsel %vm668_vm2, %v940_v41, %v942_v46  ;;  %v1083_v53 = vadd.f32 %v941_v48, %v4264_v29  ;;  %v1085_v54 = vadd.f32 %v942_v46, %v4270_v36 }
  0x7a   : > { %v1774_v56 = vshll.u32 %v1651_v47, 16  ;;  %v1084_v57 = vadd.f32 %v943_v52, %v4268_v33  ;;  %v4294_v59 = vmul.f32 0.75, %v474_v38  ;;  %v4298_v2 = vmul.f32 0.75, %v475_v55 }
  0x7b   : > { %v1767_v60 = vshrl.u32 %v4286_v51, 16  ;;  %v1769_v61 = vshll.u32 %v4286_v51, 16  ;;  %v1137_v62 = vpack.c.bf16 %v1083_v53, %v1083_v53  ;;  %v1139_v63 = vpack.c.bf16 %v1085_v54, %v1085_v54 }
  0x7c   : > { %v1776_v0 = vrot.slane %v1774_v56, 1  ;;  %v1138_v1 = vpack.c.bf16 %v1084_v57, %v1084_v57  ;;  %v868_v3 = vmul.f32 0.25, %v475_v55  ;;  %v944_v12 = vrot.slane %v4280_v49, 1 }
  0x7d   : > { %v1771_v6 = vrot.slane %v1769_v61, 1  ;;  %v1227_v7 = vunpack.c.l.b16 %v1137_v62  ;;  %v1626_v11 = vunpack.c.l.b16 %v1139_v63  ;;  %v672_v13 = vrot.slane %v4270_v36, 1  ;;  %v476_v61 = vld [vmem:[#allocation2 + $0x30] sm:$0xff] }
  0x7e   : > { %v1228_v14 = vunpack.c.l.b16 %v1138_v1  ;;  %v945_v15 = vrot.slane %v4282_v50, 1  ;;  %v947_v17 = vrot.slane %v868_v3, 1  ;;  %v4303_v20 = vmul.f32 0.25, %v500_v4  ;;  %v477_v1 = vld [vmem:[#allocation2 + $0x38] sm:$0xff] }
  0x7f   : > { %v1772_v18 = vor.u32 %v1771_v6, %v1767_v60  ;;  %v1642_v19 = vpack.c.b16 %v1626_v11, %v1626_v11  ;;  %v4305_v21 = vmul.f32 0.25, %v501_v5  ;;  %v4321_v39 = vmul.f32 0.75, %v500_v4  ;;  %v4341_v11 = vld [vmem:[#allocation2 + $0x40] sm:$0x3] }
  0x80   : > { %v4307_v22 = vpack.c.b16 %v1228_v14, %v1227_v7  ;;  %v946_v23 = vsel %vm668_vm2, %v944_v12, %v945_v15  ;;  %v948_v24 = vsel %vm668_vm2, %v945_v15, %v947_v17  ;;  %v1088_v25 = vadd.f32 %v947_v17, %v4298_v2 }
  0x81   : > { %v4313_v26 = vsel %vm1555_vm3, %v1772_v18, %v1776_v0  ;;  %v1666_v27 = vshll.u32 %v1642_v19, 16  ;;  %v1086_v28 = vadd.f32 %v946_v23, %v4292_v58  ;;  %v1087_v31 = vadd.f32 %v948_v24, %v4294_v59 }
  0x82   : > { %6244 = vst [vmem:[#allocation6_spill] sm:$0xff] %v4313_v26  ;;  %1868 = vrot.lane.b32.xlu1 %v4313_v26, %s4068_s25  ;;  %v1659_v34 = vshrl.u32 %v4307_v22, 16  ;;  %v1661_v35 = vshll.u32 %v4307_v22, 16  ;;  %v1142_v37 = vpack.c.bf16 %v1088_v25, %v1088_v25  ;;  %v4323_v43 = vmul.f32 0.75, %v501_v5 }
  0x83   : > { %v1668_v38 = vrot.slane %v1666_v27, 1  ;;  %v1140_v40 = vpack.c.bf16 %v1086_v28, %v1086_v28  ;;  %v1141_v42 = vpack.c.bf16 %v1087_v31, %v1087_v31  ;;  %v4325_v46 = vmul.f32 0.75, %v502_v32 }
  0x84   : > { %v1663_v41 = vrot.slane %v1661_v35, 1  ;;  %v1627_v45 = vunpack.c.l.b16 %v1142_v37  ;;  %v877_v47 = vmul.f32 0.25, %v502_v32  ;;  %v989_v53 = vrot.slane %v4303_v20, 1 }
  0x85   : > { %v1229_v48 = vunpack.c.l.b16 %v1140_v40  ;;  %v1230_v52 = vunpack.c.l.b16 %v1141_v42  ;;  %v990_v54 = vrot.slane %v4305_v21, 1  ;;  %v677_v56 = vrot.slane %v4298_v2, 1 }
  0x86   : > { %v1664_v55 = vor.u32 %v1663_v41, %v1659_v34  ;;  %v1643_v57 = vpack.c.b16 %v1627_v45, %v1627_v45  ;;  %v992_v60 = vrot.slane %v877_v47, 1  ;;  %v722_v63 = vrot.slane %v4325_v46, 1 }
  0x87   : > { %v4330_v62 = vpack.c.b16 %v1230_v52, %v1229_v48  ;;  %v991_v0 = vsel %vm668_vm2, %v989_v53, %v990_v54  ;;  %v4334_v3 = vmul.f32 0.25, %v476_v61  ;;  %v4349_v23 = vmul.f32 0.75, %v476_v61 }
  0x88   : > { %v4337_v4 = vsel %vm1555_vm3, %v1664_v55, %v1668_v38  ;;  %v1678_v5 = vshll.u32 %v1643_v57, 16  ;;  %v993_v6 = vsel %vm668_vm2, %v990_v54, %v992_v60  ;;  %v1113_v7 = vadd.f32 %v991_v0, %v4321_v39 }
  0x89   : > { %1850 = vrot.lane.b32.xlu0 %v4337_v4, %s4068_s25  ;;  %v1671_v12 = vshrl.u32 %v4330_v62, 16  ;;  %v1673_v14 = vshll.u32 %v4330_v62, 16  ;;  %v1114_v15 = vadd.f32 %v993_v6, %v4323_v43  ;;  %v1115_v17 = vadd.f32 %v992_v60, %v4325_v46  ;;  %v503_v60 = vld [vmem:[#allocation2 + $0x108] sm:$0xff] }
  0x8a   : > { %v1680_v18 = vrot.slane %v1678_v5, 1  ;;  %v1167_v19 = vpack.c.bf16 %v1113_v7, %v1113_v7  ;;  %v4351_v24 = vmul.f32 0.75, %v477_v1  ;;  %v4354_v31 = vmul.f32 0.75, %v4341_v11 }
  0x8b   : > { %v1675_v25 = vrot.slane %v1673_v14, 1  ;;  %v1168_v27 = vpack.c.bf16 %v1114_v15, %v1114_v15  ;;  %v1169_v28 = vpack.c.bf16 %v1115_v17, %v1115_v17  ;;  %v4356_v34 = vmul.f32 0.25, %v477_v1  ;;  %v504_v1 = vld [vmem:[#allocation2 + $0x110] sm:$0xff] }
  0x8c   : > { %v1247_v32 = vunpack.c.l.b16 %v1167_v19  ;;  %v679_v35 = vrot.slane %v4349_v23, 1  ;;  %v680_v37 = vrot.slane %v4351_v24, 1  ;;  %v682_v41 = vrot.slane %v4354_v31, 1 }
  0x8d   : > { %v1676_v38 = vor.u32 %v1675_v25, %v1671_v12  ;;  %v1248_v40 = vunpack.c.l.b16 %v1168_v27  ;;  %v1636_v42 = vunpack.c.l.b16 %v1169_v28  ;;  %v949_v47 = vrot.slane %v4334_v3, 1 }
  0x8e   : > { %v681_v45 = vsel %vm668_vm2, %v679_v35, %v680_v37  ;;  %v669_v48 = vrot.slane %v4264_v29, 1  ;;  %v670_v52 = vrot.slane %v4268_v33, 1  ;;  %v683_v57 = vsel %vm668_vm2, %v680_v37, %v682_v41  ;;  %v505_v35 = vld [vmem:[#allocation2 + $0x118] sm:$0x3] }
  0x8f   : > { %v4366_v53 = vsel %vm1555_vm3, %v1676_v38, %v1680_v18  ;;  %v4368_v54 = vpack.c.b16 %v1248_v40, %v1247_v32  ;;  %v1652_v55 = vpack.c.b16 %v1636_v42, %v1636_v42  ;;  %v799_v61 = vadd.f32 %v681_v45, %v4334_v3 }
  0x90   : > { %1852 = vrot.lane.b32.xlu1 %v4366_v53, %s4068_s25  ;;  %v800_v0 = vadd.f32 %v683_v57, %v4356_v34  ;;  %v671_v29 = vsel %vm668_vm2, %v669_v48, %v670_v52  ;;  %v673_v33 = vsel %vm668_vm2, %v670_v52, %v672_v13  ;;  %v546_v18 = vmul.f32 0.25, %v503_v60 }
  0x91   : > { %v1779_v5 = vshrl.u32 %v4368_v54, 16  ;;  %v1781_v6 = vshll.u32 %v4368_v54, 16  ;;  %v1786_v7 = vshll.u32 %v1652_v55, 16  ;;  %v795_v12 = vadd.f32 %v671_v29, %v4250_v8 }
  0x92   : > { %v835_v14 = vpack.c.bf16 %v799_v61, %v799_v61  ;;  %v836_v15 = vpack.c.bf16 %v800_v0, %v800_v0  ;;  %v796_v17 = vadd.f32 %v673_v33, %v4257_v16  ;;  %v547_v28 = vmul.f32 0.25, %v504_v1 }
  0x93   : > { %v1783_v19 = vrot.slane %v1781_v6, 1  ;;  %v1788_v25 = vrot.slane %v1786_v7, 1  ;;  %v831_v27 = vpack.c.bf16 %v795_v12, %v795_v12  ;;  %v593_v37 = vmul.f32 0.75, %v503_v60  ;;  %v479_v12 = vld [vmem:[#allocation2 + $0x48] sm:$0xff] }
  0x94   : > { %v1360_v36 = vunpack.c.l.b16 %v835_v14  ;;  %v1361_v32 = vunpack.c.l.b16 %v836_v15  ;;  %v832_v13 = vpack.c.bf16 %v796_v17, %v796_v17  ;;  %v594_v42 = vmul.f32 0.75, %v504_v1 }
  0x95   : > { %v1784_v38 = vor.u32 %v1783_v19, %v1779_v5  ;;  %v1356_v40 = vunpack.c.l.b16 %v831_v27  ;;  %v595_v41 = vmul.f32 0.75, %v505_v35  ;;  %v724_v48 = vrot.slane %v593_v37, 1 }
  0x96   : > { %v4383_v45 = vpack.c.b16 %v1361_v32, %v1360_v36  ;;  %v1357_v8 = vunpack.c.l.b16 %v832_v13  ;;  %v994_v52 = vrot.slane %v546_v18, 1  ;;  %v725_v55 = vrot.slane %v594_v42, 1 }
  0x97   : > { %v4386_v16 = vsel %vm1555_vm3, %v1784_v38, %v1788_v25  ;;  %v727_v57 = vrot.slane %v595_v41, 1  ;;  %v995_v61 = vrot.slane %v547_v28, 1  ;;  %v674_v0 = vrot.slane %v4292_v58, 1 }
  0x98   : > { %6245 = vst [vmem:[#allocation7_spill] sm:$0xff] %v4386_v16  ;;  %1870 = vrot.lane.b32.xlu0 %v4386_v16, %s4068_s25  ;;  %1582 = vrot.lane.b32.xlu1 %v4383_v45, %s4067_s16  ;;  %v4392_v60 = vpack.c.b16 %v1357_v8, %v1356_v40  ;;  %v675_v29 = vrot.slane %v4294_v59, 1  ;;  %v878_v33 = vmul.f32 0.25, %v505_v35  ;;  %v726_v1 = vsel %vm668_vm2, %v724_v48, %v725_v55 }
  0x99   : > { %v728_v5 = vsel %vm668_vm2, %v725_v55, %v727_v57  ;;  %v996_v6 = vsel %vm668_vm2, %v994_v52, %v995_v61  ;;  %v719_v7 = vrot.slane %v4321_v39, 1  ;;  %v817_v14 = vadd.f32 %v726_v1, %v546_v18  ;;  %v480_v52 = vld [vmem:[#allocation2 + $0x50] sm:$0xff] }
  0x9a   : > { %1578 = vrot.lane.b32.xlu2 %v4392_v60, %s4067_s16  ;;  %v818_v15 = vadd.f32 %v728_v5, %v547_v28  ;;  %v676_v17 = vsel %vm668_vm2, %v674_v0, %v675_v29  ;;  %v678_v58 = vsel %vm668_vm2, %v675_v29, %v677_v56  ;;  %v997_v25 = vrot.slane %v878_v33, 1  ;;  %v481_v33 = vld [vmem:[#allocation2 + $0x58] sm:$0x3] }
  0x9b   : > { %v797_v59 = vadd.f32 %v676_v17, %v4280_v49  ;;  %v798_v19 = vadd.f32 %v678_v58, %v4282_v50  ;;  %v1116_v27 = vadd.f32 %v996_v6, %v593_v37  ;;  %v853_v36 = vpack.c.bf16 %v817_v14, %v817_v14 }
  0x9c   : > { %v854_v39 = vpack.c.bf16 %v818_v15, %v818_v15  ;;  %v720_v32 = vrot.slane %v4323_v43, 1  ;;  %v4409_v13 = vmul.f32 0.25, %v479_v12  ;;  %v998_v35 = vsel %vm668_vm2, %v995_v61, %v997_v25 }
  0x9d   : > { %v833_v18 = vpack.c.bf16 %v797_v59, %v797_v59  ;;  %v834_v28 = vpack.c.bf16 %v798_v19, %v798_v19  ;;  %v1118_v38 = vadd.f32 %v997_v25, %v595_v41  ;;  %v1378_v2 = vunpack.c.l.b16 %v853_v36 }
  0x9e   : > { %v1379_v40 = vunpack.c.l.b16 %v854_v39  ;;  %v1117_v56 = vadd.f32 %v998_v35, %v594_v42  ;;  %v1170_v8 = vpack.c.bf16 %v1116_v27, %v1116_v27  ;;  %v721_v37 = vsel %vm668_vm2, %v719_v7, %v720_v32 }
  0x9f   : > { %v1358_v49 = vunpack.c.l.b16 %v833_v18  ;;  %v1359_v48 = vunpack.c.l.b16 %v834_v28  ;;  %v1172_v50 = vpack.c.bf16 %v1118_v38, %v1118_v38  ;;  %v723_v0 = vsel %vm668_vm2, %v720_v32, %v722_v63  ;;  %v506_v18 = vld [vmem:[#allocation2 + $0x120] sm:$0xff]  ;;  %v507_v28 = vld [vmem:[#allocation2 + $0x128] sm:$0xff] }
  0xa0   : > { %v4413_v55 = vpack.c.b16 %v1379_v40, %v1378_v2  ;;  %v1171_v43 = vpack.c.bf16 %v1117_v56, %v1117_v56  ;;  %v1249_v57 = vunpack.c.l.b16 %v1170_v8  ;;  %v815_v42 = vadd.f32 %v721_v37, %v4303_v20  ;;  %v4446_v56 = vld [vmem:[#allocation2 + $0x130] sm:$0x3] }
  0xa1   : > { %v4418_v61 = vpack.c.b16 %v1359_v48, %v1358_v49  ;;  %v1637_v41 = vunpack.c.l.b16 %v1172_v50  ;;  %v816_v29 = vadd.f32 %v723_v0, %v4305_v21  ;;  %v950_v1 = vrot.slane %v4356_v34, 1 }
  0xa2   : > { %6246 = vst [vmem:[#allocation8_spill] sm:$0xff] %v4413_v55  ;;  %1600 = vrot.lane.b32.xlu0 %v4413_v55, %s4067_s16  ;;  %v1250_v5 = vunpack.c.l.b16 %v1171_v43  ;;  %v4425_v6 = vmul.f32 0.25, %v480_v52  ;;  %v4427_v7 = vmul.f32 0.75, %v479_v12  ;;  %v851_v63 = vpack.c.bf16 %v815_v42, %v815_v42 }
  0xa3   : > { %1580 = vrot.lane.b32.xlu2 %v4418_v61, %s4067_s16  ;;  %v1653_v46 = vpack.c.b16 %v1637_v41, %v1637_v41  ;;  %v852_v14 = vpack.c.bf16 %v816_v29, %v816_v29  ;;  %v4431_v20 = vmul.f32 0.75, %v481_v33  ;;  %v870_v15 = vmul.f32 0.25, %v481_v33 }
  0xa4   : > { %v4433_v21 = vpack.c.b16 %v1250_v5, %v1249_v57  ;;  %v954_v17 = vrot.slane %v4409_v13, 1  ;;  %v955_v58 = vrot.slane %v4425_v6, 1  ;;  %v1376_v19 = vunpack.c.l.b16 %v851_v63 }
  0xa5   : > { %v1798_v59 = vshll.u32 %v1653_v46, 16  ;;  %v1377_v25 = vunpack.c.l.b16 %v852_v14  ;;  %v4437_v12 = vmul.f32 0.75, %v480_v52  ;;  %v957_v32 = vrot.slane %v870_v15, 1 }
  0xa6   : > { %v1791_v27 = vshrl.u32 %v4433_v21, 16  ;;  %v1793_v36 = vshll.u32 %v4433_v21, 16  ;;  %v956_v39 = vsel %vm668_vm2, %v954_v17, %v955_v58  ;;  %v687_v2 = vrot.slane %v4431_v20, 1 }
  0xa7   : > { %v1800_v35 = vrot.slane %v1798_v59, 1  ;;  %v4442_v38 = vpack.c.b16 %v1377_v25, %v1376_v19  ;;  %v1092_v40 = vadd.f32 %v956_v39, %v4427_v7  ;;  %v958_v49 = vsel %vm668_vm2, %v955_v58, %v957_v32  ;;  %v482_v59 = vld [vmem:[#allocation2 + $0x60] sm:$0xff]  ;;  %v483_v39 = vld [vmem:[#allocation2 + $0x68] sm:$0xff] }
  0xa8   : > { %v1795_v8 = vrot.slane %v1793_v36, 1  ;;  %v1094_v48 = vadd.f32 %v957_v32, %v4431_v20  ;;  %v4450_v50 = vmul.f32 0.25, %v506_v18  ;;  %v1093_v37 = vadd.f32 %v958_v49, %v4437_v12 }
  0xa9   : > { %6247 = vst [vmem:[#allocation9_spill] sm:$0xff] %v4442_v38  ;;  %v1146_v52 = vpack.c.bf16 %v1092_v40, %v1092_v40  ;;  %v4453_v43 = vmul.f32 0.75, %v506_v18  ;;  %v4455_v57 = vmul.f32 0.75, %v507_v28  ;;  %v4457_v42 = vmul.f32 0.25, %v507_v28 }
  0xaa   : > { %v1796_v0 = vor.u32 %v1795_v8, %v1791_v27  ;;  %v1148_v41 = vpack.c.bf16 %v1094_v48, %v1094_v48  ;;  %v4460_v29 = vmul.f32 0.75, %v4446_v56  ;;  %v1147_v33 = vpack.c.bf16 %v1093_v37, %v1093_v37 }
  0xab   : > { %1598 = vrot.lane.b32.xlu2 %v4442_v38, %s4067_s16  ;;  %v1233_v5 = vunpack.c.l.b16 %v1146_v52  ;;  %v729_v46 = vrot.slane %v4453_v43, 1  ;;  %v730_v63 = vrot.slane %v4455_v57, 1  ;;  %v869_v27 = vmul.f32 0.25, %v4341_v11 }
  0xac   : > { %v4467_v14 = vsel %vm1555_vm3, %v1796_v0, %v1800_v35  ;;  %v1629_v15 = vunpack.c.l.b16 %v1148_v41  ;;  %v732_v17 = vrot.slane %v4460_v29, 1  ;;  %v1234_v19 = vunpack.c.l.b16 %v1147_v33 }
  0xad   : > { %6248 = vst [vmem:[#allocation10_spill] sm:$0xff] %v4467_v14  ;;  %1872 = vrot.lane.b32.xlu1 %v4467_v14, %s4068_s25  ;;  %v731_v25 = vsel %vm668_vm2, %v729_v46, %v730_v63  ;;  %v951_v36 = vsel %vm668_vm2, %v949_v47, %v950_v1  ;;  %v952_v49 = vrot.slane %v869_v27, 1  ;;  %v532_v11 = vmul.f32 0.25, %v482_v59 }
  0xae   : > { %v1645_v32 = vpack.c.b16 %v1629_v15, %v1629_v15  ;;  %v733_v18 = vsel %vm668_vm2, %v730_v63, %v732_v17  ;;  %v819_v28 = vadd.f32 %v731_v25, %v4450_v50  ;;  %v1089_v35 = vadd.f32 %v951_v36, %v4349_v23  ;;  %v484_v25 = vld [vmem:[#allocation2 + $0x70] sm:$0x3] }
  0xaf   : > { %v4483_v40 = vpack.c.b16 %v1234_v19, %v1233_v5  ;;  %v820_v8 = vadd.f32 %v733_v18, %v4457_v42  ;;  %v533_v3 = vmul.f32 0.25, %v483_v39  ;;  %v953_v33 = vsel %vm668_vm2, %v950_v1, %v952_v49 }
  0xb0   : > { %v1702_v48 = vshll.u32 %v1645_v32, 16  ;;  %v855_v37 = vpack.c.bf16 %v819_v28, %v819_v28  ;;  %v1143_v52 = vpack.c.bf16 %v1089_v35, %v1089_v35  ;;  %v1090_v46 = vadd.f32 %v953_v33, %v4351_v24 }
  0xb1   : > { %v1695_v47 = vshrl.u32 %v4483_v40, 16  ;;  %v1697_v0 = vshll.u32 %v4483_v40, 16  ;;  %v856_v41 = vpack.c.bf16 %v820_v8, %v820_v8  ;;  %v1091_v63 = vadd.f32 %v952_v49, %v4354_v31 }
  0xb2   : > { %v1704_v23 = vrot.slane %v1702_v48, 1  ;;  %v1380_v5 = vunpack.c.l.b16 %v855_v37  ;;  %v1231_v19 = vunpack.c.l.b16 %v1143_v52  ;;  %v572_v27 = vmul.f32 0.75, %v482_v59 }
  0xb3   : > { %v1699_v15 = vrot.slane %v1697_v0, 1  ;;  %v1381_v17 = vunpack.c.l.b16 %v856_v41  ;;  %v1144_v36 = vpack.c.bf16 %v1090_v46, %v1090_v46  ;;  %v1145_v32 = vpack.c.bf16 %v1091_v63, %v1091_v63 }
  0xb4   : > { %v573_v18 = vmul.f32 0.75, %v483_v39  ;;  %v574_v28 = vmul.f32 0.75, %v484_v25  ;;  %v689_v34 = vrot.slane %v572_v27, 1  ;;  %v959_v1 = vrot.slane %v532_v11, 1 }
  0xb5   : > { %v1700_v35 = vor.u32 %v1699_v15, %v1695_v47  ;;  %v4493_v8 = vpack.c.b16 %v1381_v17, %v1380_v5  ;;  %v1232_v48 = vunpack.c.l.b16 %v1144_v36  ;;  %v1628_v37 = vunpack.c.l.b16 %v1145_v32 }
  0xb6   : > { %v690_v58 = vrot.slane %v573_v18, 1  ;;  %v692_v24 = vrot.slane %v574_v28, 1  ;;  %v960_v59 = vrot.slane %v533_v3, 1  ;;  %v871_v49 = vmul.f32 0.25, %v484_v25 }
  0xb7   : > { %6249 = vst [vmem:[#allocation11_spill] sm:$0xff] %v4493_v8  ;;  %v4496_v31 = vsel %vm1555_vm3, %v1700_v35, %v1704_v23  ;;  %1602 = vrot.lane.b32.xlu1 %v4493_v8, %s4067_s16  ;;  %v684_v39 = vrot.slane %v4427_v7, 1  ;;  %v4503_v52 = vpack.c.b16 %v1232_v48, %v1231_v19  ;;  %v1644_v47 = vpack.c.b16 %v1628_v37, %v1628_v37  ;;  %v509_v35 = vld [vmem:[#allocation2 + $0x138] sm:$0xff] }
  0xb8   : > { %1856 = vrot.lane.b32.xlu0 %v4496_v31, %s4068_s25  ;;  %v691_v0 = vsel %vm668_vm2, %v689_v34, %v690_v58  ;;  %v693_v41 = vsel %vm668_vm2, %v690_v58, %v692_v24  ;;  %v961_v5 = vsel %vm668_vm2, %v959_v1, %v960_v59  ;;  %v962_v46 = vrot.slane %v871_v49, 1 }
  0xb9   : > { %v803_v33 = vadd.f32 %v691_v0, %v532_v11  ;;  %v804_v23 = vadd.f32 %v693_v41, %v533_v3  ;;  %v1683_v63 = vshrl.u32 %v4503_v52, 16  ;;  %v1685_v15 = vshll.u32 %v4503_v52, 16 }
  0xba   : > { %v1690_v7 = vshll.u32 %v1644_v47, 16  ;;  %v1095_v17 = vadd.f32 %v961_v5, %v572_v27  ;;  %v963_v19 = vsel %vm668_vm2, %v960_v59, %v962_v46  ;;  %v1097_v32 = vadd.f32 %v962_v46, %v574_v28  ;;  %v510_v47 = vld [vmem:[#allocation2 + $0x140] sm:$0xff] }
  0xbb   : > { %v839_v25 = vpack.c.bf16 %v803_v33, %v803_v33  ;;  %v840_v36 = vpack.c.bf16 %v804_v23, %v804_v23  ;;  %v1687_v34 = vrot.slane %v1685_v15, 1  ;;  %v1096_v58 = vadd.f32 %v963_v19, %v573_v18 }
  0xbc   : > { %v1692_v48 = vrot.slane %v1690_v7, 1  ;;  %v1149_v11 = vpack.c.bf16 %v1095_v17, %v1095_v17  ;;  %v1151_v1 = vpack.c.bf16 %v1097_v32, %v1097_v32  ;;  %v685_v24 = vrot.slane %v4437_v12, 1 }
  0xbd   : > { %v1364_v3 = vunpack.c.l.b16 %v839_v25  ;;  %v1365_v37 = vunpack.c.l.b16 %v840_v36  ;;  %v1688_v49 = vor.u32 %v1687_v34, %v1683_v63  ;;  %v1150_v0 = vpack.c.bf16 %v1096_v58, %v1096_v58  ;;  %v511_v63 = vld [vmem:[#allocation2 + $0x148] sm:$0x3] }
  0xbe   : > { %v1235_v41 = vunpack.c.l.b16 %v1149_v11  ;;  %v4512_v27 = vmul.f32 0.25, %v509_v35  ;;  %v1630_v59 = vunpack.c.l.b16 %v1151_v1  ;;  %v686_v28 = vsel %vm668_vm2, %v684_v39, %v685_v24  ;;  %v485_v11 = vld [vmem:[#allocation2 + $0x78] sm:$0xff] }
  0xbf   : > { %v4514_v33 = vpack.c.b16 %v1365_v37, %v1364_v3  ;;  %v688_v18 = vsel %vm668_vm2, %v685_v24, %v687_v2  ;;  %v4521_v23 = vsel %vm1555_vm3, %v1688_v49, %v1692_v48  ;;  %v1236_v5 = vunpack.c.l.b16 %v1150_v0  ;;  %v486_v49 = vld [vmem:[#allocation2 + $0x80] sm:$0xff] }
  0xc0   : > { %v801_v12 = vadd.f32 %v686_v28, %v4409_v13  ;;  %v802_v46 = vadd.f32 %v688_v18, %v4425_v6  ;;  %1854 = vrot.lane.b32.xlu2 %v4521_v23, %s4068_s25  ;;  %v1646_v39 = vpack.c.b16 %v1630_v59, %v1630_v59  ;;  %v4529_v15 = vmul.f32 0.25, %v510_v47  ;;  %v4549_v28 = vld [vmem:[#allocation2 + $0x88] sm:$0x3] }
  0xc1   : > { %1586 = vrot.lane.b32.xlu0 %v4514_v33, %s4067_s16  ;;  %v4531_v20 = vmul.f32 0.75, %v509_v35  ;;  %v4533_v2 = vmul.f32 0.75, %v510_v47  ;;  %v4535_v7 = vpack.c.b16 %v1236_v5, %v1235_v41  ;;  %v4537_v25 = vmul.f32 0.75, %v511_v63 }
  0xc2   : > { %v837_v17 = vpack.c.bf16 %v801_v12, %v801_v12  ;;  %v838_v13 = vpack.c.bf16 %v802_v46, %v802_v46  ;;  %v1714_v6 = vshll.u32 %v1646_v39, 16  ;;  %v880_v36 = vmul.f32 0.25, %v511_v63 }
  0xc3   : > { %v1004_v19 = vrot.slane %v4512_v27, 1  ;;  %v1005_v32 = vrot.slane %v4529_v15, 1  ;;  %v1707_v34 = vshrl.u32 %v4535_v7, 16  ;;  %v1709_v48 = vshll.u32 %v4535_v7, 16 }
  0xc4   : > { %v1362_v35 = vunpack.c.l.b16 %v837_v17  ;;  %v1363_v58 = vunpack.c.l.b16 %v838_v13  ;;  %v1000_v3 = vrot.slane %v4457_v42, 1  ;;  %v1716_v37 = vrot.slane %v1714_v6, 1 }
  0xc5   : > { %v1006_v1 = vsel %vm668_vm2, %v1004_v19, %v1005_v32  ;;  %v1007_v24 = vrot.slane %v880_v36, 1  ;;  %v1711_v0 = vrot.slane %v1709_v48, 1  ;;  %v4553_v12 = vmul.f32 0.25, %v485_v11 }
  0xc6   : > { %v4545_v41 = vpack.c.b16 %v1363_v58, %v1362_v35  ;;  %v1122_v59 = vadd.f32 %v1006_v1, %v4531_v20  ;;  %v4555_v42 = vmul.f32 0.75, %v485_v11  ;;  %v4558_v17 = vmul.f32 0.75, %v486_v49 }
  0xc7   : > { %v1008_v18 = vsel %vm668_vm2, %v1005_v32, %v1007_v24  ;;  %v1124_v5 = vadd.f32 %v1007_v24, %v4537_v25  ;;  %v1712_v46 = vor.u32 %v1711_v0, %v1707_v34  ;;  %v4562_v6 = vmul.f32 0.25, %v486_v49  ;;  %v512_v32 = vld [vmem:[#allocation2 + $0x150] sm:$0xff]  ;;  %v513_v0 = vld [vmem:[#allocation2 + $0x158] sm:$0xff] }
  0xc8   : > { %v1123_v63 = vadd.f32 %v1008_v18, %v4533_v2  ;;  %v1176_v39 = vpack.c.bf16 %v1122_v59, %v1122_v59  ;;  %1584 = vrot.lane.b32.xlu2 %v4545_v41, %s4067_s16  ;;  %v4565_v36 = vmul.f32 0.75, %v4549_v28  ;;  %v694_v19 = vrot.slane %v4555_v42, 1 }
  0xc9   : > { %v1178_v13 = vpack.c.bf16 %v1124_v5, %v1124_v5  ;;  %v4569_v48 = vsel %vm1555_vm3, %v1712_v46, %v1716_v37  ;;  %v695_v58 = vrot.slane %v4558_v17, 1  ;;  %v879_v49 = vmul.f32 0.25, %v4446_v56 }
  0xca   : > { %v1177_v34 = vpack.c.bf16 %v1123_v63, %v1123_v63  ;;  %v1253_v35 = vunpack.c.l.b16 %v1176_v39  ;;  %1858 = vrot.lane.b32.xlu1 %v4569_v48, %s4068_s25  ;;  %v697_v1 = vrot.slane %v4565_v36, 1  ;;  %v6250_v37 = vrot.slane %v4450_v50, 1 }
  0xcb   : > { %v1639_v11 = vunpack.c.l.b16 %v1178_v13  ;;  %v696_v18 = vsel %vm668_vm2, %v694_v19, %v695_v58  ;;  %v552_v46 = vmul.f32 0.25, %v512_v32  ;;  %v1002_v47 = vrot.slane %v879_v49, 1 }
  0xcc   : > { %v1254_v59 = vunpack.c.l.b16 %v1177_v34  ;;  %v1001_v5 = vsel %vm668_vm2, %v6250_v37, %v1000_v3  ;;  %v698_v39 = vsel %vm668_vm2, %v695_v58, %v697_v1  ;;  %v805_v13 = vadd.f32 %v696_v18, %v4553_v12 }
  0xcd   : > { %v1655_v63 = vpack.c.b16 %v1639_v11, %v1639_v11  ;;  %v806_v24 = vadd.f32 %v698_v39, %v4562_v6  ;;  %v1119_v56 = vadd.f32 %v1001_v5, %v4453_v43  ;;  %v553_v34 = vmul.f32 0.25, %v513_v0 }
  0xce   : > { %v4583_v8 = vpack.c.b16 %v1254_v59, %v1253_v35  ;;  %v841_v19 = vpack.c.bf16 %v805_v13, %v805_v13  ;;  %v1003_v50 = vsel %vm668_vm2, %v1000_v3, %v1002_v47  ;;  %v1121_v37 = vadd.f32 %v1002_v47, %v4460_v29 }
  0xcf   : > { %v1822_v14 = vshll.u32 %v1655_v63, 16  ;;  %v842_v1 = vpack.c.bf16 %v806_v24, %v806_v24  ;;  %v1120_v49 = vadd.f32 %v1003_v50, %v4455_v57  ;;  %v1173_v18 = vpack.c.bf16 %v1119_v56, %v1119_v56  ;;  %v514_v63 = vld [vmem:[#allocation2 + $0x160] sm:$0x3] }
  0xd0   : > { %v1815_v11 = vshrl.u32 %v4583_v8, 16  ;;  %v1817_v58 = vshll.u32 %v4583_v8, 16  ;;  %v1366_v59 = vunpack.c.l.b16 %v841_v19  ;;  %v1175_v39 = vpack.c.bf16 %v1121_v37, %v1121_v37 }
  0xd1   : > { %v1824_v35 = vrot.slane %v1822_v14, 1  ;;  %v1367_v43 = vunpack.c.l.b16 %v842_v1  ;;  %v1174_v5 = vpack.c.bf16 %v1120_v49, %v1120_v49  ;;  %v602_v13 = vmul.f32 0.75, %v512_v32 }
  0xd2   : > { %v1819_v55 = vrot.slane %v1817_v58, 1  ;;  %v1251_v30 = vunpack.c.l.b16 %v1173_v18  ;;  %v1638_v3 = vunpack.c.l.b16 %v1175_v39  ;;  %v603_v38 = vmul.f32 0.75, %v513_v0 }
  0xd3   : > { %v604_v29 = vmul.f32 0.75, %v514_v63  ;;  %v4592_v16 = vpack.c.b16 %v1367_v43, %v1366_v59  ;;  %v1252_v44 = vunpack.c.l.b16 %v1174_v5  ;;  %v739_v24 = vrot.slane %v602_v13, 1 }
  0xd4   : > { %v1820_v47 = vor.u32 %v1819_v55, %v1815_v11  ;;  %v1654_v9 = vpack.c.b16 %v1638_v3, %v1638_v3  ;;  %v740_v57 = vrot.slane %v603_v38, 1  ;;  %v1009_v19 = vrot.slane %v552_v46, 1 }
  0xd5   : > { %v742_v14 = vrot.slane %v604_v29, 1  ;;  %1588 = vrot.lane.b32.xlu1 %v4592_v16, %s4067_s16  ;;  %v4599_v32 = vpack.c.b16 %v1252_v44, %v1251_v30  ;;  %v1010_v50 = vrot.slane %v553_v34, 1  ;;  %v881_v0 = vmul.f32 0.25, %v514_v63 }
  0xd6   : > { %v4595_v56 = vsel %vm1555_vm3, %v1820_v47, %v1824_v35  ;;  %v1810_v55 = vshll.u32 %v1654_v9, 16  ;;  %v741_v37 = vsel %vm668_vm2, %v739_v24, %v740_v57  ;;  %v734_v58 = vrot.slane %v4531_v20, 1 }
  0xd7   : > { %6251 = vst [vmem:[#allocation12_spill] sm:$0xff] %v4595_v56  ;;  %1876 = vrot.lane.b32.xlu0 %v4595_v56, %s4068_s25  ;;  %v743_v11 = vsel %vm668_vm2, %v740_v57, %v742_v14  ;;  %v1803_v1 = vshrl.u32 %v4599_v32, 16  ;;  %v1805_v49 = vshll.u32 %v4599_v32, 16  ;;  %v823_v35 = vadd.f32 %v741_v37, %v552_v46 }
  0xd8   : > { %v824_v59 = vadd.f32 %v743_v11, %v553_v34  ;;  %v1812_v30 = vrot.slane %v1810_v55, 1  ;;  %v1011_v44 = vsel %vm668_vm2, %v1009_v19, %v1010_v50  ;;  %v1012_v18 = vrot.slane %v881_v0, 1  ;;  %v488_v34 = vld [vmem:[#allocation2 + $0x90] sm:$0xff]  ;;  %v489_v11 = vld [vmem:[#allocation2 + $0x98] sm:$0xff] }
  0xd9   : > { %v735_v39 = vrot.slane %v4533_v2, 1  ;;  %v1807_v43 = vrot.slane %v1805_v49, 1  ;;  %v859_v9 = vpack.c.bf16 %v823_v35, %v823_v35  ;;  %v1125_v63 = vadd.f32 %v1011_v44, %v602_v13 }
  0xda   : > { %v860_v5 = vpack.c.bf16 %v824_v59, %v824_v59  ;;  %v1013_v3 = vsel %vm668_vm2, %v1010_v50, %v1012_v18  ;;  %v1127_v47 = vadd.f32 %v1012_v18, %v604_v29  ;;  %v6252_v24 = vrot.slane %v4537_v25, 1  ;;  %v490_v59 = vld [vmem:[#allocation2 + $0xa0] sm:$0x3] }
  0xdb   : > { %v736_v20 = vsel %vm668_vm2, %v734_v58, %v735_v39  ;;  %v1808_v57 = vor.u32 %v1807_v43, %v1803_v1  ;;  %v1384_v14 = vunpack.c.l.b16 %v859_v9  ;;  %v1126_v0 = vadd.f32 %v1013_v3, %v603_v38 }
  0xdc   : > { %v738_v46 = vsel %vm668_vm2, %v735_v39, %v6252_v24  ;;  %v1385_v19 = vunpack.c.l.b16 %v860_v5  ;;  %v1179_v55 = vpack.c.bf16 %v1125_v63, %v1125_v63  ;;  %v1181_v2 = vpack.c.bf16 %v1127_v47, %v1127_v47 }
  0xdd   : > { %v821_v37 = vadd.f32 %v736_v20, %v4512_v27  ;;  %v822_v13 = vadd.f32 %v738_v46, %v4529_v15  ;;  %v4618_v29 = vsel %vm1555_vm3, %v1808_v57, %v1812_v30  ;;  %v1180_v25 = vpack.c.bf16 %v1126_v0, %v1126_v0  ;;  %v515_v20 = vld [vmem:[#allocation2 + $0x168] sm:$0xff] }
  0xde   : > { %6253 = vst [vmem:[#allocation13_spill] sm:$0xff] %v4618_v29  ;;  %v4620_v50 = vpack.c.b16 %v1385_v19, %v1384_v14  ;;  %v4622_v58 = vmul.f32 0.25, %v488_v34  ;;  %1874 = vrot.lane.b32.xlu2 %v4618_v29, %s4068_s25  ;;  %v1255_v1 = vunpack.c.l.b16 %v1179_v55  ;;  %v1640_v38 = vunpack.c.l.b16 %v1181_v2  ;;  %v516_v14 = vld [vmem:[#allocation2 + $0x170] sm:$0xff] }
  0xdf   : > { %v857_v49 = vpack.c.bf16 %v821_v37, %v821_v37  ;;  %v858_v35 = vpack.c.bf16 %v822_v13, %v822_v13  ;;  %v1256_v15 = vunpack.c.l.b16 %v1180_v25  ;;  %v4629_v30 = vmul.f32 0.25, %v489_v11  ;;  %v4647_v37 = vld [vmem:[#allocation2 + $0x178] sm:$0x3] }
  0xe0   : > { %6254 = vst [vmem:[#allocation14_spill] sm:$0xff] %v4620_v50  ;;  %1606 = vrot.lane.b32.xlu0 %v4620_v50, %s4067_s16  ;;  %v4631_v44 = vmul.f32 0.75, %v488_v34  ;;  %v1656_v18 = vpack.c.b16 %v1640_v38, %v1640_v38  ;;  %v4633_v9 = vmul.f32 0.75, %v490_v59  ;;  %v873_v63 = vmul.f32 0.25, %v490_v59 }
  0xe1   : > { %v1382_v39 = vunpack.c.l.b16 %v857_v49  ;;  %v1383_v43 = vunpack.c.l.b16 %v858_v35  ;;  %v4635_v5 = vpack.c.b16 %v1256_v15, %v1255_v1  ;;  %v969_v3 = vrot.slane %v4622_v58, 1 }
  0xe2   : > { %v970_v47 = vrot.slane %v4629_v30, 1  ;;  %v1834_v24 = vshll.u32 %v1656_v18, 16  ;;  %v4641_v57 = vmul.f32 0.75, %v489_v11  ;;  %v972_v2 = vrot.slane %v873_v63, 1 }
  0xe3   : > { %6255 = vst [vmem:[#allocation15_spill] sm:$0xff] %v4635_v5  ;;  %v4639_v46 = vpack.c.b16 %v1383_v43, %v1382_v39  ;;  %v1827_v19 = vshrl.u32 %v4635_v5, 16  ;;  %v1829_v0 = vshll.u32 %v4635_v5, 16  ;;  %v4650_v1 = vmul.f32 0.25, %v515_v20 }
  0xe4   : > { %v971_v55 = vsel %vm668_vm2, %v969_v3, %v970_v47  ;;  %v1836_v13 = vrot.slane %v1834_v24, 1  ;;  %v4652_v38 = vmul.f32 0.75, %v515_v20  ;;  %v973_v49 = vsel %vm668_vm2, %v970_v47, %v972_v2 }
  0xe5   : > { %6256 = vst [vmem:[#allocation16_spill] sm:$0xff] %v4639_v46  ;;  %v1101_v25 = vadd.f32 %v971_v55, %v4631_v44  ;;  %v1831_v11 = vrot.slane %v1829_v0, 1  ;;  %v1103_v35 = vadd.f32 %v972_v2, %v4633_v9  ;;  %v4656_v59 = vmul.f32 0.75, %v516_v14 }
  0xe6   : > { %1604 = vrot.lane.b32.xlu2 %v4639_v46, %s4067_s16  ;;  %v1102_v15 = vadd.f32 %v973_v49, %v4641_v57  ;;  %v4662_v39 = vmul.f32 0.75, %v4647_v37  ;;  %v744_v43 = vrot.slane %v4652_v38, 1  ;;  %v4665_v20 = vmul.f32 0.25, %v516_v14 }
  0xe7   : > { %v1155_v18 = vpack.c.bf16 %v1101_v25, %v1101_v25  ;;  %v1832_v63 = vor.u32 %v1831_v11, %v1827_v19  ;;  %v1157_v3 = vpack.c.bf16 %v1103_v35, %v1103_v35  ;;  %v745_v47 = vrot.slane %v4656_v59, 1 }
  0xe8   : > { %v1156_v24 = vpack.c.bf16 %v1102_v15, %v1102_v15  ;;  %v747_v55 = vrot.slane %v4662_v39, 1  ;;  %v872_v27 = vmul.f32 0.25, %v4549_v28  ;;  %v6258_v35 = vrot.slane %v4562_v6, 1 }
  0xe9   : > { %v1239_v0 = vunpack.c.l.b16 %v1155_v18  ;;  %v4671_v49 = vsel %vm1555_vm3, %v1832_v63, %v1836_v13  ;;  %v1632_v25 = vunpack.c.l.b16 %v1157_v3  ;;  %v746_v34 = vsel %vm668_vm2, %v744_v43, %v745_v47 }
  0xea   : > { %6257 = vst [vmem:[#allocation17_spill] sm:$0xff] %v4671_v49  ;;  %1878 = vrot.lane.b32.xlu1 %v4671_v49, %s4068_s25  ;;  %v1240_v14 = vunpack.c.l.b16 %v1156_v24  ;;  %v748_v19 = vsel %vm668_vm2, %v745_v47, %v747_v55  ;;  %v825_v11 = vadd.f32 %v746_v34, %v4650_v1  ;;  %v6259_v15 = vrot.slane %v4553_v12, 1 }
  0xeb   : > { %v1648_v18 = vpack.c.b16 %v1632_v25, %v1632_v25  ;;  %v826_v63 = vadd.f32 %v748_v19, %v4665_v20  ;;  %v967_v43 = vrot.slane %v872_v27, 1  ;;  %vm1299_vm4 = vcmask 1040384  }
  0xec   : > { %v966_v13 = vsel %vm668_vm2, %v6259_v15, %v6258_v35  ;;  %v4686_v3 = vpack.c.b16 %v1240_v14, %v1239_v0  ;;  %v861_v2 = vpack.c.bf16 %v825_v11, %v825_v11  ;;  %vm1300_vm5 = vsmask.f32 256  ;;  %v491_v15 = vld [vmem:[#allocation2 + $0xa8] sm:$0xff] }
  0xed   : > { %v1098_v28 = vadd.f32 %v966_v13, %v4555_v42  ;;  %v1738_v47 = vshll.u32 %v1648_v18, 16  ;;  %v862_v24 = vpack.c.bf16 %v826_v63, %v826_v63  ;;  %v6261_v34 = vmov %v6258_v35  ;;  %vm4692_vm6 = vmand %vm1299_vm4, %vm1300_vm5 }
  0xee   : > { %6260 = vst [vmem:[#allocation18_spill] sm:$0xff] %v4686_v3  ;;  %v968_v55 = vsel %vm668_vm2, %v6261_v34, %v967_v43  ;;  %v1100_v12 = vadd.f32 %v967_v43, %v4565_v36  ;;  %v1731_v27 = vshrl.u32 %v4686_v3, 16  ;;  %v1733_v42 = vshll.u32 %v4686_v3, 16  ;;  %v1577_v36 = vld [vmem:[%s6172_s1 + $0x8] sm:$0xf]  ;;  %v1867_v3 = vpop.permute.xlu1 %1866 }
  0xef   : > { %v1386_v0 = vunpack.c.l.b16 %v861_v2  ;;  %v1099_v14 = vadd.f32 %v968_v55, %v4558_v17  ;;  %v1387_v11 = vunpack.c.l.b16 %v862_v24  ;;  %v1152_v35 = vpack.c.bf16 %v1098_v28, %v1098_v28  ;;  %v492_v2 = vld [vmem:[#allocation2 + $0xb0] sm:$0xff] }
  0xf0   : > { %v1154_v6 = vpack.c.bf16 %v1100_v12, %v1100_v12  ;;  %v1735_v13 = vrot.slane %v1733_v42, 1  ;;  %v1740_v18 = vrot.slane %v1738_v47, 1  ;;  %v1310_v43 = vsel %vm4692_vm6, 0, %v4254_v10  ;;  %v1595_v12 = vpop.permute.xlu0 %1594  ;;  %v493_v42 = vld [vmem:[#allocation2 + $0xb8] sm:$0x3] }
  0xf1   : > { %v1153_v63 = vpack.c.bf16 %v1099_v14, %v1099_v14  ;;  %v4706_v34 = vpack.c.b16 %v1387_v11, %v1386_v0  ;;  %v1237_v17 = vunpack.c.l.b16 %v1152_v35  ;;  %vm2186_vm7 = vcmask 1043456  }
  0xf2   : > { %v1631_v55 = vunpack.c.l.b16 %v1154_v6  ;;  %v1736_v28 = vor.u32 %v1735_v13, %v1731_v27  ;;  %v2284_v19 = vunpack.c.l.b16 %v1577_v36  ;;  %v538_v49 = vmul.f32 0.25, %v491_v15 }
  0xf3   : > { %6264 = vst [vmem:[#allocation19_spill] sm:$0xff] %v4706_v34  ;;  %v1238_v24 = vunpack.c.l.b16 %v1153_v63  ;;  %1608 = vrot.lane.b32.xlu1 %v4706_v34, %s4067_s16  ;;  %v539_v14 = vmul.f32 0.25, %v492_v2  ;;  %v581_v50 = vmul.f32 0.75, %v491_v15  ;;  %v582_v46 = vmul.f32 0.75, %v492_v2 }
  0xf4   : > { %v1647_v47 = vpack.c.b16 %v1631_v55, %v1631_v55  ;;  %v4711_v10 = vsel %vm1555_vm3, %v1736_v28, %v1740_v18  ;;  %v2286_v11 = vpack.c.b16 %v2284_v19, %v2284_v19  ;;  %v583_v35 = vmul.f32 0.75, %v493_v42 }
  0xf5   : > { %v4713_v0 = vpack.c.b16 %v1238_v24, %v1237_v17  ;;  %1862 = vrot.lane.b32.xlu0 %v4711_v10, %s4068_s25  ;;  %v704_v6 = vrot.slane %v581_v50, 1  ;;  %v705_v36 = vrot.slane %v582_v46, 1  ;;  %v974_v13 = vrot.slane %v538_v49, 1  ;;  %v3971_v24 = vld [vmem:[%s6172_s1] sm:$0xff] }
  0xf6   : > { %v1726_v27 = vshll.u32 %v1647_v47, 16  ;;  %v2291_v15 = vsel %vm2186_vm7, %v2286_v11, 0  ;;  %v707_v2 = vrot.slane %v583_v35, 1  ;;  %v1908_v18 = vsel %vm399_vm0, %v1310_v43, %v1595_v12 }
  0xf7   : > { %v1719_v63 = vshrl.u32 %v4713_v0, 16  ;;  %v1721_v55 = vshll.u32 %v4713_v0, 16  ;;  %3976 = vmatpush.bf16.msra.mxu3 %v2291_v15  ;;  %v706_v19 = vsel %vm668_vm2, %v704_v6, %v705_v36  ;;  %v975_v17 = vrot.slane %v539_v14, 1  ;;  %2299 = vmatpush.bf16.msra.mxu1 %v2291_v15 }
  0xf8   : > { %v874_v28 = vmul.f32 0.25, %v493_v42  ;;  %v1728_v34 = vrot.slane %v1726_v27, 1  ;;  %v708_v56 = vsel %vm668_vm2, %v705_v36, %v707_v2  ;;  %v809_v29 = vadd.f32 %v706_v19, %v538_v49  ;;  %v3856_v27 = vld [vmem:[%s6172_s1 + $0x14] sm:$0xf]  ;;  %v519_v19 = vld [vmem:[#allocation2 + $0x188] sm:$0xff] }
  0xf9   : > { %v1723_v47 = vrot.slane %v1721_v55, 1  ;;  %v810_v11 = vadd.f32 %v708_v56, %v539_v14  ;;  %v976_v26 = vsel %vm668_vm2, %v974_v13, %v975_v17  ;;  %v1311_v12 = vsel %vm4692_vm6, 0, %v4286_v51 }
  0xfa   : > { %v977_v43 = vrot.slane %v874_v28, 1  ;;  %v845_v6 = vpack.c.bf16 %v809_v29, %v809_v29  ;;  %v1104_v5 = vadd.f32 %v976_v26, %v581_v50  ;;  %vm1930_vm8 = vcmask 130048   ;;  %v1597_v26 = vpop.permute.xlu0 %1596  ;;  %v518_v50 = vld [vmem:[#allocation2 + $0x180] sm:$0xff] }
  0xfb   : > { %v1724_v42 = vor.u32 %v1723_v47, %v1719_v63  ;;  %v846_v55 = vpack.c.bf16 %v810_v11, %v810_v11  ;;  %3977 = vmatpush.bf16.msra.mxu3 %v3971_v24  ;;  %v4735_v56 = vsel %vm1930_vm8, %v1908_v18, %v1867_v3  ;;  %2300 = vmatpush.bf16.msra.mxu1 %v3971_v24  ;;  %vm2153_vm9 = vcmask 195584   ;;  %v1579_v3 = vpop.permute.xlu2 %1578 }
  0xfc   : > { %v978_v49 = vsel %vm668_vm2, %v975_v17, %v977_v43  ;;  %v1106_v36 = vadd.f32 %v977_v43, %v583_v35  ;;  %v1370_v51 = vunpack.c.l.b16 %v845_v6  ;;  %v1158_v29 = vpack.c.bf16 %v1104_v5, %v1104_v5 }
  0xfd   : > { %v4738_v14 = vsel %vm1555_vm3, %v1724_v42, %v1728_v34  ;;  %v1105_v13 = vadd.f32 %v978_v49, %v582_v46  ;;  %v1371_v63 = vunpack.c.l.b16 %v846_v55  ;;  %v2149_v35 = vunpack.c.l.b16 %v3856_v27  ;;  %v520_v27 = vld [vmem:[#allocation2 + $0x190] sm:$0x3] }
  0xfe   : > { %1860 = vrot.lane.b32.xlu2 %v4738_v14, %s4068_s25  ;;  %v1160_v2 = vpack.c.bf16 %v1106_v36, %v1106_v36  ;;  %v1241_v17 = vunpack.c.l.b16 %v1158_v29  ;;  %3889 = vmatmul.msk.bf16.vlgmr.msra.gmra.mxu3 %vm2153_vm9, %v4735_v56  ;;  %v699_v5 = vrot.slane %v4631_v44, 1  ;;  %v700_v46 = vrot.slane %v4641_v57, 1 }
  0xff   : > { %2511 = vmatpush.bf16.msrb.mxu3 %v2291_v15  ;;  %v1159_v18 = vpack.c.bf16 %v1105_v13, %v1105_v13  ;;  %v4746_v34 = vpack.c.b16 %v1371_v63, %v1370_v51  ;;  %v2151_v28 = vpack.c.b16 %v2149_v35, %v2149_v35  ;;  %v4748_v47 = vmul.f32 0.25, %v518_v50 }
 0x100   : > { %v1633_v15 = vunpack.c.l.b16 %v1160_v2  ;;  %v701_v43 = vsel %vm668_vm2, %v699_v5, %v700_v46  ;;  %v6265_v42 = vrot.slane %v4633_v9, 1  ;;  %v4754_v55 = vmul.f32 0.25, %v519_v19 }
 0x101   : > { %v1242_v11 = vunpack.c.l.b16 %v1159_v18  ;;  %1592 = vrot.lane.b32.xlu0 %v4746_v34, %s4067_s16  ;;  %v2188_v57 = vsel %vm2186_vm7, %v2151_v28, 0  ;;  %v807_v49 = vadd.f32 %v701_v43, %v4622_v58  ;;  %v1911_v9 = vsel %vm399_vm0, %v1311_v12, %v1597_v26  ;;  %v1869_v18 = vpop.permute.xlu1 %1868 }
 0x102   : > { %v703_v6 = vsel %vm668_vm2, %v700_v46, %v6265_v42  ;;  %v1649_v44 = vpack.c.b16 %v1633_v15, %v1633_v15  ;;  %3974 = vmatpush.bf16.msra.mxu2 %v2188_v57  ;;  %v4764_v13 = vmul.f32 0.75, %v518_v50  ;;  %v4766_v29 = vmul.f32 0.75, %v519_v19  ;;  %2196 = vmatpush.bf16.msra.mxu0 %v2188_v57  ;;  %v1851_v43 = vpop.permute.xlu0 %1850 }
 0x103   : > { %2512 = vmatpush.bf16.msrb.mxu3 %v3971_v24  ;;  %v808_v36 = vadd.f32 %v703_v6, %v4629_v30  ;;  %v4761_v51 = vpack.c.b16 %v1242_v11, %v1241_v17  ;;  %v3972_v24 = vld [vmem:[%s6172_s1 + $0xc] sm:$0xff]  ;;  %v843_v2 = vpack.c.bf16 %v807_v49, %v807_v49  ;;  %v883_v58 = vmul.f32 0.25, %v520_v27 }
 0x104   : > { %v1750_v63 = vshll.u32 %v1649_v44, 16  ;;  %v4773_v12 = vmul.f32 0.75, %v520_v27  ;;  %v1019_v26 = vrot.slane %v4748_v47, 1  ;;  %v1020_v46 = vrot.slane %v4754_v55, 1 }
 0x105   : > { %v844_v35 = vpack.c.bf16 %v808_v36, %v808_v36  ;;  %v1743_v30 = vshrl.u32 %v4761_v51, 16  ;;  %v1745_v17 = vshll.u32 %v4761_v51, 16  ;;  %v1368_v19 = vunpack.c.l.b16 %v843_v2  ;;  %v1581_v36 = vpop.permute.xlu2 %1580 }
 0x106   : > { %v1752_v50 = vrot.slane %v1750_v63, 1  ;;  %v1022_v28 = vrot.slane %v883_v58, 1  ;;  %3975 = vmatpush.bf16.msra.mxu2 %v3972_v24  ;;  %v1302_v11 = vsel %vm4692_vm6, 0, %v4307_v22  ;;  %v4781_v42 = vsel %vm1930_vm8, %v1911_v9, %v1869_v18  ;;  %2197 = vmatpush.bf16.msra.mxu0 %v3972_v24 }
 0x107   : > { %v1369_v5 = vunpack.c.l.b16 %v844_v35  ;;  %v1747_v15 = vrot.slane %v1745_v17, 1  ;;  %v1021_v27 = vsel %vm668_vm2, %v1019_v26, %v1020_v46  ;;  %v1884_v44 = vsel %vm399_vm0, %v1302_v11, %v1579_v3 }
 0x108   : > { %v882_v49 = vmul.f32 0.25, %v4647_v37  ;;  %v1023_v2 = vsel %vm668_vm2, %v1020_v46, %v1022_v28  ;;  %v1131_v22 = vadd.f32 %v1021_v27, %v4764_v13  ;;  %v1133_v35 = vadd.f32 %v1022_v28, %v4773_v12 }
 0x109   : > { %v4783_v6 = vpack.c.b16 %v1369_v5, %v1368_v19  ;;  %v1748_v63 = vor.u32 %v1747_v15, %v1743_v30  ;;  %v1132_v9 = vadd.f32 %v1023_v2, %v4766_v29  ;;  %3869 = vmatmul.msk.bf16.vlgmr.msra.gmra.mxu2 %vm2153_vm9, %v4781_v42  ;;  %v1932_v3 = vsel %vm1930_vm8, %v1884_v44, %v1851_v43 }
 0x10a   : > { %2420 = vmatpush.bf16.msrb.mxu2 %v2188_v57  ;;  %v6266_v37 = vrot.slane %v4665_v20, 1  ;;  %v6267_v57 = vrot.slane %v4650_v1, 1  ;;  %v1017_v18 = vrot.slane %v882_v49, 1  ;;  %v1185_v17 = vpack.c.bf16 %v1131_v22, %v1131_v22  ;;  %3881 = vmatmul.msk.bf16.vlgmr.msra.gmra.mxu1 %vm2153_vm9, %v1932_v3  ;;  %v1853_v49 = vpop.permute.xlu1 %1852 }
 0x10b   : > { %1590 = vrot.lane.b32.xlu2 %v4783_v6, %s4067_s16  ;;  %v4803_v30 = vsel %vm1555_vm3, %v1748_v63, %v1752_v50  ;;  %v1187_v26 = vpack.c.bf16 %v1133_v35, %v1133_v35  ;;  %v1186_v5 = vpack.c.bf16 %v1132_v9, %v1132_v9  ;;  %v3931_v63 = vld [vmem:[%s6172_s1 + $0x20] sm:$0xf]  ;;  %vm1554_vm10 = vcmask 1047552  }
 0x10c   : > { %v1016_v58 = vsel %vm668_vm2, %v6267_v57, %v6266_v37  ;;  %1864 = vrot.lane.b32.xlu1 %v4803_v30, %s4068_s25  ;;  %v6268_v46 = vmov %v6266_v37  ;;  %v1130_v15 = vadd.f32 %v1017_v18, %v4662_v39  ;;  %v1259_v28 = vunpack.c.l.b16 %v1185_v17  ;;  %vm4857_vm11 = vmand %vm1554_vm10, %vm1555_vm3 }
 0x10d   : > { %v1128_v19 = vadd.f32 %v1016_v58, %v4652_v38  ;;  %v1018_v1 = vsel %vm668_vm2, %v6268_v46, %v1017_v18  ;;  %v2114_v50 = vunpack.c.l.b16 %v1187_v26  ;;  %v1260_v27 = vunpack.c.l.b16 %v1186_v5 }
 0x10e   : > { %2421 = vmatpush.bf16.msrb.mxu2 %v3972_v24  ;;  %v1129_v11 = vadd.f32 %v1018_v1, %v4656_v59  ;;  %v1184_v44 = vpack.c.bf16 %v1130_v15, %v1130_v15  ;;  %v1413_v38 = vshll.u32 %v4392_v60, 16  ;;  %v1303_v39 = vsel %vm4692_vm6, 0, %v4330_v62  ;;  %3890 = vmatmul.msk.bf16.gmra.mxu3 %vm2153_vm9, %v4781_v42 }
 0x10f   : > { %v1182_v43 = vpack.c.bf16 %v1128_v19, %v1128_v19  ;;  %v2115_v20 = vpack.c.b16 %v2114_v50, %v2114_v50  ;;  %v752_v59 = vrot.slane %v4773_v12, 1  ;;  %v4824_v24 = vpack.c.b16 %v1260_v27, %v1259_v28  ;;  %v1599_v12 = vpop.permute.xlu2 %1598 }
 0x110   : > { %v1183_v2 = vpack.c.bf16 %v1129_v11, %v1129_v11  ;;  %v1641_v35 = vunpack.c.l.b16 %v1184_v44  ;;  %v1887_v9 = vsel %vm399_vm0, %v1303_v39, %v1581_v36  ;;  %v2636_v58 = vunpack.c.l.b16 %v3931_v63  ;;  %v1871_v11 = vpop.permute.xlu0 %1870 }
 0x111   : > { %v1257_v22 = vunpack.c.l.b16 %v1182_v43  ;;  %v2124_v3 = vshll.u32 %v2115_v20, 16  ;;  %v1934_v57 = vsel %vm1930_vm8, %v1887_v9, %v1853_v49  ;;  %v2117_v18 = vshrl.u32 %v4824_v24, 16 }
 0x112   : > { %v1258_v37 = vunpack.c.l.b16 %v1183_v2  ;;  %v2119_v17 = vshll.u32 %v4824_v24, 16  ;;  %v1657_v62 = vpack.c.b16 %v1641_v35, %v1641_v35  ;;  %v1411_v26 = vshrl.u32 %v4392_v60, 16  ;;  %3861 = vmatmul.msk.bf16.vlgmr.msra.gmra.mxu0 %vm2153_vm9, %v1934_v57 }
 0x113   : > { %v2126_v19 = vrot.slane %v2124_v3, 1  ;;  %v1415_v46 = vrot.slane %v1413_v38, 1  ;;  %v2638_v36 = vpack.c.b16 %v2636_v58, %v2636_v58  ;;  %v1418_v28 = vshrl.u32 %v4418_v61, 16 }
 0x114   : > { %v4832_v5 = vpack.c.b16 %v1258_v37, %v1257_v22  ;;  %v2121_v1 = vrot.slane %v2119_v17, 1  ;;  %1963 = vrot.lane.b32.xlu1 %v4337_v4, %s4067_s16  ;;  %v1846_v15 = vshll.u32 %v1657_v62, 16  ;;  %v1420_v50 = vshll.u32 %v4418_v61, 16  ;;  %v1583_v17 = vpop.permute.xlu1 %1582 }
 0x115   : > { %v2643_v44 = vsel %vm2186_vm7, %v2638_v36, 0  ;;  %v1312_v38 = vsel %vm4692_vm6, 0, %v4368_v54  ;;  %v749_v9 = vrot.slane %v4764_v13, 1  ;;  %v750_v54 = vrot.slane %v4766_v29, 1 }
 0x116   : > { %v1839_v43 = vshrl.u32 %v4832_v5, 16  ;;  %v1841_v27 = vshll.u32 %v4832_v5, 16  ;;  %v2122_v49 = vor.u32 %v2121_v1, %v2117_v18  ;;  %2651 = vmatpush.bf16.msrb.mxu0 %v2643_v44  ;;  %2774 = vmatpush.bf16.msrb.mxu1 %v2643_v44  ;;  %v1422_v4 = vrot.slane %v1420_v50, 1 }
 0x117   : > { %v1914_v63 = vsel %vm399_vm0, %v1312_v38, %v1599_v12  ;;  %v1848_v2 = vrot.slane %v1846_v15, 1  ;;  %v1416_v37 = vor.u32 %v1415_v46, %v1411_v26  ;;  %v1304_v18 = vsel %vm4692_vm6, 0, %v4503_v52 }
 0x118   : > { %v1843_v20 = vrot.slane %v1841_v27, 1  ;;  %v4846_v22 = vsel %vm1930_vm8, %v1914_v63, %v1871_v11  ;;  %v4849_v39 = vsel %vm1555_vm3, %v2122_v49, %v2126_v19  ;;  %v1423_v35 = vor.u32 %v1422_v4, %v1418_v28  ;;  %v1601_v44 = vpop.permute.xlu0 %1600 }
 0x119   : > { %2128 = vrot.lane.b32.xlu0 %v4849_v39, %s4068_s25  ;;  %v1427_v29 = vshll.u32 %v4383_v45, 16  ;;  %3870 = vmatmul.msk.bf16.gmra.mxu2 %vm2153_vm9, %v4846_v22  ;;  %v751_v62 = vsel %vm668_vm2, %v749_v9, %v750_v54  ;;  %v753_v26 = vsel %vm668_vm2, %v750_v54, %v752_v59  ;;  %v1890_v46 = vsel %vm399_vm0, %v1304_v18, %v1583_v17 }
 0x11a   : > { %v1844_v3 = vor.u32 %v1843_v20, %v1839_v43  ;;  %v1558_v13 = vsel %vm4857_vm11, %v1423_v35, 0  ;;  %3882 = vmatmul.msk.bf16.gmra.mxu1 %vm2153_vm9, %v1934_v57  ;;  %v827_v52 = vadd.f32 %v751_v62, %v4748_v47  ;;  %v828_v19 = vadd.f32 %v753_v26, %v4754_v55  ;;  %v1855_v36 = vpop.permute.xlu2 %1854 }
 0x11b   : > { %v1557_v59 = vsel %vm4857_vm11, %v1416_v37, 0  ;;  %v1425_v28 = vshrl.u32 %v4383_v45, 16  ;;  %v1429_v57 = vrot.slane %v1427_v29, 1  ;;  %v1441_v47 = vshll.u32 %v4514_v33, 16 }
 0x11c   : > { %v4872_v12 = vsel %vm1555_vm3, %v1844_v3, %v1848_v2  ;;  %2013 = vrot.lane.b32.xlu1 %v1558_v13, %s4068_s25  ;;  %v863_v1 = vpack.c.bf16 %v827_v52, %v827_v52  ;;  %v864_v15 = vpack.c.bf16 %v828_v19, %v828_v19  ;;  %v4886_v11 = vsel %vm1930_vm8, %v1890_v46, %v1855_v36 }
 0x11d   : > { %1880 = vrot.lane.b32.xlu2 %v4872_v12, %s4068_s25  ;;  %v1313_v27 = vsel %vm4692_vm6, 0, %v4433_v21  ;;  %v1439_v38 = vshrl.u32 %v4514_v33, 16  ;;  %v1443_v49 = vrot.slane %v1441_v47, 1  ;;  %v1430_v4 = vor.u32 %v1429_v57, %v1425_v28 }
 0x11e   : > { %v1388_v50 = vunpack.c.l.b16 %v863_v1  ;;  %v1389_v55 = vunpack.c.l.b16 %v864_v15  ;;  %3891 = vmatmul.msk.bf16.gmra.mxu3 %vm2153_vm9, %v4846_v22  ;;  %v1917_v63 = vsel %vm399_vm0, %v1313_v27, %v1601_v44  ;;  %v1305_v9 = vsel %vm4692_vm6, 0, %v4483_v40 }
 0x11f   : > { %v1873_v20 = vpop.permute.xlu1 %1872  ;;  %v1444_v2 = vor.u32 %v1443_v49, %v1439_v38  ;;  %v1559_v21 = vsel %vm4857_vm11, %v1430_v4, 0  ;;  %v1448_v3 = vshll.u32 %v4592_v16, 16  ;;  %v1434_v40 = vshll.u32 %v4545_v41, 16 }
 0x120   : > { %v4891_v43 = vpack.c.b16 %v1389_v55, %v1388_v50  ;;  %v4907_v35 = vsel %vm1930_vm8, %v1917_v63, %v1873_v20  ;;  %v1446_v17 = vshrl.u32 %v4592_v16, 16  ;;  %v1314_v19 = vsel %vm4692_vm6, 0, %v4599_v32 }
 0x121   : > { %2011 = vrot.lane.b32.xlu0 %v1557_v59, %s4068_s25  ;;  %v1450_v13 = vrot.slane %v1448_v3, 1  ;;  %v1436_v62 = vrot.slane %v1434_v40, 1  ;;  %v1306_v15 = vsel %vm4692_vm6, 0, %v4535_v7  ;;  %v1315_v47 = vsel %vm4692_vm6, 0, %v4583_v8 }
 0x122   : > { %3862 = vmatmul.msk.bf16.gmra.mxu0 %vm2153_vm9, %v4886_v11  ;;  %v1585_v54 = vpop.permute.xlu2 %1584  ;;  %v1460_v38 = vshrl.u32 %v4746_v34, 16  ;;  %v1307_v4 = vsel %vm4692_vm6, 0, %v4713_v0  ;;  %v1455_v3 = vshll.u32 %v4783_v6, 16 }
 0x123   : > { %v1893_v37 = vsel %vm399_vm0, %v1305_v9, %v1585_v54  ;;  %v1451_v26 = vor.u32 %v1450_v13, %v1446_v17 }
 0x124   : > { %1969 = vrot.lane.b32.xlu1 %v4496_v31, %s4067_s16  ;;  %v1561_v31 = vsel %vm4857_vm11, %v1444_v2, 0  ;;  %v1457_v0 = vrot.slane %v1455_v3, 1 }
 0x125   : > { %2111 = vrot.lane.b32.xlu2 %v4891_v43, %s4067_s16 }
 0x129   : > { %2015 = vrot.lane.b32.xlu0 %v1559_v21, %s4068_s25  ;;  %3871 = vmatmul.msk.bf16.gmra.mxu2 %vm2153_vm9, %v4907_v35  ;;  %v1603_v52 = vpop.permute.xlu1 %1602  ;;  %v6271_v21 = vld [vmem:[#allocation15_spill] sm:$0xff] }
 0x12a   : > { %3883 = vmatmul.msk.bf16.gmra.mxu1 %vm2153_vm9, %v4886_v11  ;;  %v1857_v18 = vpop.permute.xlu0 %1856  ;;  %v1920_v36 = vsel %vm399_vm0, %v1314_v19, %v1603_v52  ;;  %v1316_v9 = vsel %vm4692_vm6, 0, %v6271_v21 }
 0x12b   : > { %v4927_v29 = vsel %vm1930_vm8, %v1893_v37, %v1857_v18  ;;  %v6272_v18 = vld [vmem:[#allocation6_spill] sm:$0xff] }
 0x12c   : > { %2019 = vrot.lane.b32.xlu1 %v1561_v31, %s4068_s25  ;;  %v1453_v31 = vshrl.u32 %v4783_v6, 16 }
 0x12d   : > { %1965 = vrot.lane.b32.xlu2 %v4366_v53, %s4067_s16  ;;  %v1432_v53 = vshrl.u32 %v4545_v41, 16 }
 0x12e   : > { %3892 = vmatmul.msk.bf16.gmra.mxu3 %vm2153_vm9, %v4907_v35  ;;  %v1458_v17 = vor.u32 %v1457_v0, %v1453_v31 }
 0x12f   : > { %v1437_v46 = vor.u32 %v1436_v62, %v1432_v53 }
 0x130   : > { %v1563_v62 = vsel %vm4857_vm11, %v1458_v17, 0 }
 0x131   : > { %1971 = vrot.lane.b32.xlu0 %v4569_v48, %s4067_s16  ;;  %v1562_v48 = vsel %vm4857_vm11, %v1451_v26, 0  ;;  %v6273_v26 = vld [vmem:[#allocation3_spill] sm:$0xff] }
 0x132   : > { %3863 = vmatmul.msk.bf16.gmra.mxu0 %vm2153_vm9, %v4927_v29  ;;  %v1467_v52 = vshrl.u32 %v6273_v26, 16  ;;  %v1469_v19 = vshll.u32 %v6273_v26, 16 }
 0x133   : > { %v1587_v59 = vpop.permute.xlu0 %1586 }
 0x134   : > { %1975 = vrot.lane.b32.xlu1 %v4711_v10, %s4067_s16  ;;  %v3973_v10 = vld [vmem:[%s6172_s1 + $0x18] sm:$0xff]  ;;  %v1896_v7 = vsel %vm399_vm0, %v1306_v15, %v1587_v59 }
 0x135   : > { %1967 = vrot.lane.b32.xlu2 %v4521_v23, %s4067_s16  ;;  %v1560_v23 = vsel %vm4857_vm11, %v1437_v46, 0  ;;  %2652 = vmatpush.bf16.msrb.mxu0 %v3973_v10  ;;  %v1471_v46 = vrot.slane %v1469_v19, 1 }
 0x136   : > { %2775 = vmatpush.bf16.msrb.mxu1 %v3973_v10 }
 0x137   : > { %v1472_v15 = vor.u32 %v1471_v46, %v1467_v52 }
 0x138   : > { %v1875_v1 = vpop.permute.xlu2 %1874 }
 0x139   : > { %2021 = vrot.lane.b32.xlu0 %v1562_v48, %s4068_s25  ;;  %v4953_v32 = vsel %vm1930_vm8, %v1920_v36, %v1875_v1  ;;  %v6274_v48 = vld [vmem:[#allocation18_spill] sm:$0xff] }
 0x13a   : > { %3872 = vmatmul.msk.bf16.gmra.mxu2 %vm2153_vm9, %v4953_v32  ;;  %3884 = vmatmul.msk.bf16.gmra.mxu1 %vm2153_vm9, %v4927_v29  ;;  %v1308_v36 = vsel %vm4692_vm6, 0, %v6274_v48 }
 0x13c   : > { %v1859_v28 = vpop.permute.xlu1 %1858 }
 0x13d   : > { %2017 = vrot.lane.b32.xlu2 %v1560_v23, %s4068_s25  ;;  %v4965_v57 = vsel %vm1930_vm8, %v1896_v7, %v1859_v28  ;;  %v1565_v23 = vsel %vm4857_vm11, %v1472_v15, 0  ;;  %v6275_v7 = vld [vmem:[#allocation5_spill] sm:$0xff] }
 0x13e   : > { %3893 = vmatmul.msk.bf16.gmra.mxu3 %vm2153_vm9, %v4953_v32 }
 0x140   : > { %v1605_v50 = vpop.permute.xlu2 %1604 }
 0x141   : > { %1977 = vrot.lane.b32.xlu0 %v4803_v30, %s4067_s16  ;;  %v1923_v55 = vsel %vm399_vm0, %v1315_v47, %v1605_v50  ;;  %v1462_v30 = vshll.u32 %v4746_v34, 16  ;;  %v6276_v47 = vld [vmem:[#allocation7_spill] sm:$0xff]  ;;  %v1317_v50 = vsel %vm4692_vm6, 0, %v4832_v5 }
 0x142   : > { %3864 = vmatmul.msk.bf16.gmra.mxu0 %vm2153_vm9, %v4965_v57 }
 0x143   : > { %v1464_v8 = vrot.slane %v1462_v30, 1 }
 0x145   : > { %1973 = vrot.lane.b32.xlu2 %v4738_v14, %s4067_s16  ;;  %v1465_v49 = vor.u32 %v1464_v8, %v1460_v38  ;;  %v1309_v8 = vsel %vm4692_vm6, 0, %v4761_v51 }
 0x147   : > { %v1564_v14 = vsel %vm4857_vm11, %v1465_v49, 0  ;;  %v1589_v63 = vpop.permute.xlu1 %1588 }
 0x148   : > { %2025 = vrot.lane.b32.xlu1 %v1564_v14, %s4068_s25  ;;  %v1899_v20 = vsel %vm399_vm0, %v1307_v4, %v1589_v63 }
 0x149   : > { %v1877_v27 = vpop.permute.xlu0 %1876  ;;  %2027 = vrot.lane.b32.xlu0 %v1565_v23, %s4068_s25 }
 0x14a   : > { %v4980_v44 = vsel %vm1930_vm8, %v1923_v55, %v1877_v27  ;;  %3885 = vmatmul.msk.bf16.gmra.mxu1 %vm2153_vm9, %v4965_v57 }
 0x14b   : > { %3873 = vmatmul.msk.bf16.gmra.mxu2 %vm2153_vm9, %v4980_v44 }
 0x14d   : > { %2023 = vrot.lane.b32.xlu2 %v1563_v62, %s4068_s25 }
 0x14e   : > { %3894 = vmatmul.msk.bf16.gmra.mxu3 %vm2153_vm9, %v4980_v44 }
 0x150   : > { %1981 = vrot.lane.b32.xlu1 %v6272_v18, %s4067_s16 }
 0x151   : > { %1983 = vrot.lane.b32.xlu0 %v6276_v47, %s4067_s16 }
 0x152   : > { %v1607_v54 = vpop.permute.xlu0 %1606 }
 0x153   : > { %v1926_v40 = vsel %vm399_vm0, %v1316_v9, %v1607_v54  ;;  %v1318_v54 = vsel %vm4692_vm6, 0, %v4824_v24 }
 0x155   : > { %1979 = vrot.lane.b32.xlu2 %v6275_v7, %s4067_s16 }
 0x158   : > { %v1861_v2 = vpop.permute.xlu2 %1860 }
 0x159   : > { %v5003_v37 = vsel %vm1930_vm8, %v1899_v20, %v1861_v2  ;;  %v6277_v2 = vld [vmem:[#allocation9_spill] sm:$0xff] }
 0x15a   : > { %3865 = vmatmul.msk.bf16.gmra.mxu0 %vm2153_vm9, %v5003_v37  ;;  %3886 = vmatmul.msk.bf16.gmra.mxu1 %vm2153_vm9, %v5003_v37  ;;  %v1483_v21 = vshll.u32 %v6277_v2, 16  ;;  %v1481_v9 = vshrl.u32 %v6277_v2, 16 }
 0x15c   : > { %v1879_v13 = vpop.permute.xlu1 %1878  ;;  %v1485_v51 = vrot.slane %v1483_v21, 1 }
 0x15d   : > { %v5013_v53 = vsel %vm1930_vm8, %v1926_v40, %v1879_v13  ;;  %v6279_v13 = vld [vmem:[#allocation4_spill] sm:$0xff] }
 0x15e   : > { %3874 = vmatmul.msk.bf16.gmra.mxu2 %vm2153_vm9, %v5013_v53  ;;  %3895 = vmatmul.msk.bf16.gmra.mxu3 %vm2153_vm9, %v5013_v53  ;;  %v1486_v31 = vor.u32 %v1485_v51, %v1481_v9  ;;  %v1476_v62 = vshll.u32 %v6279_v13, 16  ;;  %v1474_v48 = vshrl.u32 %v6279_v13, 16 }
 0x160   : > { %v1567_v0 = vsel %vm4857_vm11, %v1486_v31, 0 }
 0x161   : > { %2031 = vrot.lane.b32.xlu1 %v1567_v0, %s4068_s25 }
 0x165   : > { %v1591_v1 = vpop.permute.xlu2 %1590  ;;  %v1609_v55 = vpop.permute.xlu1 %1608 }
 0x166   : > { %v1902_v59 = vsel %vm399_vm0, %v1308_v36, %v1591_v1  ;;  %v1929_v27 = vsel %vm399_vm0, %v1317_v50, %v1609_v55  ;;  %v1478_v36 = vrot.slane %v1476_v62, 1  ;;  %v6280_v55 = vld [vmem:[#allocation13_spill] sm:$0xff] }
 0x167   : > { %v1863_v10 = vpop.permute.xlu0 %1862 }
 0x168   : > { %v5034_v28 = vsel %vm1930_vm8, %v1902_v59, %v1863_v10  ;;  %v1479_v59 = vor.u32 %v1478_v36, %v1474_v48 }
 0x169   : > { %1987 = vrot.lane.b32.xlu1 %v6280_v55, %s4067_s16 }
 0x16a   : > { %3866 = vmatmul.msk.bf16.gmra.mxu0 %vm2153_vm9, %v5034_v28  ;;  %3887 = vmatmul.msk.bf16.gmra.mxu1 %vm2153_vm9, %v5034_v28  ;;  %v1566_v47 = vsel %vm4857_vm11, %v1479_v59, 0 }
 0x16b   : > { %2029 = vrot.lane.b32.xlu2 %v1566_v47, %s4068_s25 }
 0x173   : > { %v1593_v49 = vpop.permute.xlu0 %1592 }
 0x174   : > { %v1905_v5 = vsel %vm399_vm0, %v1309_v8, %v1593_v49 }
 0x177   : > { %v1881_v38 = vpop.permute.xlu2 %1880 }
 0x178   : > { %v5047_v30 = vsel %vm1930_vm8, %v1929_v27, %v1881_v38  ;;  %v6281_v38 = vld [vmem:[#allocation8_spill] sm:$0xff] }
 0x179   : > { %3875 = vmatmul.msk.bf16.gmra.mxu2 %vm2153_vm9, %v5047_v30  ;;  %3896 = vmatmul.msk.bf16.gmra.mxu3 %vm2153_vm9, %v5047_v30  ;;  %v1490_v8 = vshll.u32 %v6281_v38, 16 }
 0x17e   : > { %v1865_v14 = vpop.permute.xlu1 %1864 }
 0x17f   : > { %v5058_v4 = vsel %vm1930_vm8, %v1905_v5, %v1865_v14  ;;  %v2112_v63 = vpop.permute.xlu2 %2111  ;;  %v1492_v14 = vrot.slane %v1490_v8, 1 }
 0x180   : > { %3867 = vmatmul.msk.bf16.gmra.mxu0 %vm2153_vm9, %v5058_v4  ;;  %3888 = vmatmul.msk.bf16.gmra.mxu1 %vm2153_vm9, %v5058_v4  ;;  %v2132_v18 = vsel %vm399_vm0, %v1318_v54, %v2112_v63 }
 0x181   : > { %v2342_v20 = vpop.f32.mrf.mxu3 }
 0x186   : > { %v1964_v24 = vpop.permute.xlu1 %1963 }
 0x187   : > { %v2302_v3 = vpop.f32.mrf.mxu1  ;;  %v1966_v19 = vpop.permute.xlu2 %1965  ;;  %v2044_v7 = vsel %vm399_vm0, %v4392_v60, %v1964_v24  ;;  %v1488_v60 = vshrl.u32 %v6281_v38, 16 }
 0x189   : > { %v5072_v40 = vpop.f32.mrf.mxu3  ;;  %v1493_v51 = vor.u32 %v1492_v14, %v1488_v60 }
 0x18a   : > { %6278 = vst [vmem:[#allocation15_spill] sm:$0xff] %v5072_v40 }
 0x18b   : > { %v2129_v17 = vpop.permute.xlu0 %2128 }
 0x18c   : > { %v5077_v52 = vsel %vm1930_vm8, %v2132_v18, %v2129_v17  ;;  %v2239_v46 = vpop.f32.mrf.mxu2  ;;  %v6283_v17 = vld [vmem:[#allocation10_spill] sm:$0xff] }
 0x18d   : > { %3876 = vmatmul.msk.bf16.gmra.mxu2 %vm2153_vm9, %v5077_v52  ;;  %v5082_v1 = vadd.f32 %v2342_v20, %v2239_v46  ;;  %v2046_v20 = vsel %vm399_vm0, %v4418_v61, %v1966_v19  ;;  %1985 = vrot.lane.b32.xlu2 %v6283_v17, %s4067_s16 }
 0x18e   : > { %v2014_v21 = vpop.permute.xlu1 %2013 }
 0x18f   : > { %v2199_v15 = vpop.f32.mrf.mxu0  ;;  %v5088_v10 = vpop.f32.mrf.mxu1  ;;  %v2078_v18 = vsel %vm1930_vm8, %v2046_v20, %v2014_v21  ;;  %v6289_v20 = vld [vmem:[#allocation16_spill] sm:$0xff] }
 0x190   : > { %3868 = vmatmul.msk.bf16.gmra.mxu0 %vm2153_vm9, %v4735_v56  ;;  %v5086_v23 = vadd.f32 %v2302_v3, %v2199_v15  ;;  %v1968_v63 = vpop.permute.xlu2 %1967  ;;  %v1568_v3 = vsel %vm4857_vm11, %v1493_v51, 0  ;;  %v6285_v15 = vld [vmem:[#allocation12_spill] sm:$0xff]  ;;  %v1504_v21 = vshll.u32 %v6289_v20, 16 }
 0x191   : > { %v2347_v50 = vpop.f32.mrf.mxu3  ;;  %v2048_v31 = vsel %vm399_vm0, %v4383_v45, %v1968_v63  ;;  %2033 = vrot.lane.b32.xlu0 %v1568_v3, %s4068_s25  ;;  %v1502_v3 = vshrl.u32 %v6289_v20, 16 }
 0x193   : > { %v2012_v27 = vpop.permute.xlu0 %2011 }
 0x194   : > { %v2076_v49 = vsel %vm1930_vm8, %v2044_v7, %v2012_v27  ;;  %v5100_v5 = vpop.f32.mrf.mxu2 }
 0x195   : > { %3913 = vmatmul.msk.bf16.vlgmr.msrb.gmra.mxu3 %vm2153_vm9, %v2076_v49 }
 0x196   : > { %v1970_v59 = vpop.permute.xlu1 %1969 }
 0x197   : > { %v5105_v9 = vpop.f32.mrf.mxu0  ;;  %v2307_v54 = vpop.f32.mrf.mxu1  ;;  %v2050_v47 = vsel %vm399_vm0, %v4545_v41, %v1970_v59 }
 0x199   : > { %v5112_v0 = vpop.f32.mrf.mxu3  ;;  %1989 = vrot.lane.b32.xlu0 %v6285_v15, %s4067_s16 }
 0x19a   : > { %6282 = vst [vmem:[#allocation6_spill] sm:$0xff] %v5112_v0 }
 0x19b   : > { %v2016_v61 = vpop.permute.xlu0 %2015 }
 0x19c   : > { %v2080_v62 = vsel %vm1930_vm8, %v2048_v31, %v2016_v61  ;;  %v2244_v45 = vpop.f32.mrf.mxu2 }
 0x19d   : > { %3897 = vmatmul.msk.bf16.vlgmr.msrb.gmra.mxu2 %vm2153_vm9, %v2078_v18  ;;  %3952 = vmatmul.msk.bf16.vlgmr.msrb.gmra.mxu1 %vm2153_vm9, %v2080_v62  ;;  %v5120_v19 = vadd.f32 %v2347_v50, %v2244_v45  ;;  %v2018_v50 = vpop.permute.xlu2 %2017 }
 0x19e   : > { %v2082_v27 = vsel %vm1930_vm8, %v2050_v47, %v2018_v50  ;;  %v2020_v61 = vpop.permute.xlu1 %2019 }
 0x19f   : > { %6284 = vst [vmem:[#allocation3_spill] sm:$0xff] %v5120_v19  ;;  %v2204_v24 = vpop.f32.mrf.mxu0  ;;  %v5126_v48 = vpop.f32.mrf.mxu1 }
 0x1a0   : > { %3936 = vmatmul.msk.bf16.vlgmr.msrb.gmra.mxu0 %vm2153_vm9, %v4886_v11  ;;  %v5124_v46 = vadd.f32 %v2307_v54, %v2204_v24 }
 0x1a1   : > { %v2352_v36 = vpop.f32.mrf.mxu3 }
 0x1a3   : > { %v1972_v51 = vpop.permute.xlu0 %1971 }
 0x1a4   : > { %v5131_v7 = vpop.f32.mrf.mxu2  ;;  %v2052_v17 = vsel %vm399_vm0, %v4514_v33, %v1972_v51 }
 0x1a5   : > { %3914 = vmatmul.msk.bf16.gmra.mxu3 %vm2153_vm9, %v2078_v18  ;;  %6286 = vst [vmem:[#allocation18_spill] sm:$0xff] %v5131_v7  ;;  %v1506_v18 = vrot.slane %v1504_v21, 1  ;;  %v2084_v15 = vsel %vm1930_vm8, %v2052_v17, %v2020_v61  ;;  %v6294_v17 = vld [vmem:[#allocation14_spill] sm:$0xff]  ;;  %v1974_v61 = vpop.permute.xlu2 %1973 }
 0x1a7   : > { %v5135_v55 = vpop.f32.mrf.mxu0  ;;  %v2312_v11 = vpop.f32.mrf.mxu1  ;;  %v1507_v45 = vor.u32 %v1506_v18, %v1502_v3 }
 0x1a9   : > { %v5138_v8 = vpop.f32.mrf.mxu3 }
 0x1aa   : > { %6287 = vst [vmem:[#allocation5_spill] sm:$0xff] %v5138_v8 }
 0x1ac   : > { %v2249_v49 = vpop.f32.mrf.mxu2 }
 0x1ad   : > { %3898 = vmatmul.msk.bf16.gmra.mxu2 %vm2153_vm9, %v2080_v62  ;;  %3953 = vmatmul.msk.bf16.gmra.mxu1 %vm2153_vm9, %v2082_v27  ;;  %v5142_v60 = vadd.f32 %v2352_v36, %v2249_v49  ;;  %v1570_v36 = vsel %vm4857_vm11, %v1507_v45, 0  ;;  %v1509_v45 = vshrl.u32 %v6294_v17, 16 }
 0x1ae   : > { %2037 = vrot.lane.b32.xlu1 %v1570_v36, %s4068_s25  ;;  %v2054_v36 = vsel %vm399_vm0, %v4592_v16, %v1974_v61  ;;  %v1976_v61 = vpop.permute.xlu1 %1975 }
 0x1af   : > { %6288 = vst [vmem:[#allocation7_spill] sm:$0xff] %v5142_v60  ;;  %v2209_v14 = vpop.f32.mrf.mxu0  ;;  %v5148_v63 = vpop.f32.mrf.mxu1 }
 0x1b0   : > { %3937 = vmatmul.msk.bf16.gmra.mxu0 %vm2153_vm9, %v4927_v29  ;;  %v5146_v41 = vadd.f32 %v2312_v11, %v2209_v14 }
 0x1b1   : > { %v2357_v54 = vpop.f32.mrf.mxu3 }
 0x1b4   : > { %v5152_v31 = vpop.f32.mrf.mxu2 }
 0x1b5   : > { %3915 = vmatmul.msk.bf16.gmra.mxu3 %vm2153_vm9, %v2080_v62  ;;  %6290 = vst [vmem:[#allocation9_spill] sm:$0xff] %v5152_v31  ;;  %v6291_v62 = vld [vmem:[#allocation11_spill] sm:$0xff] }
 0x1b6   : > { %v1497_v59 = vshll.u32 %v6291_v62, 16  ;;  %v1495_v33 = vshrl.u32 %v6291_v62, 16  ;;  %1993 = vrot.lane.b32.xlu1 %v4872_v12, %s4067_s16 }
 0x1b7   : > { %v5157_v29 = vpop.f32.mrf.mxu0  ;;  %v2317_v24 = vpop.f32.mrf.mxu1 }
 0x1b8   : > { %v1499_v47 = vrot.slane %v1497_v59, 1  ;;  %v2022_v59 = vpop.permute.xlu0 %2021 }
 0x1b9   : > { %v5167_v11 = vpop.f32.mrf.mxu3  ;;  %v2086_v12 = vsel %vm1930_vm8, %v2054_v36, %v2022_v59  ;;  %v2024_v36 = vpop.permute.xlu2 %2023 }
 0x1ba   : > { %6292 = vst [vmem:[#allocation4_spill] sm:$0xff] %v5167_v11  ;;  %v1500_v21 = vor.u32 %v1499_v47, %v1495_v33 }
 0x1bc   : > { %v1569_v18 = vsel %vm4857_vm11, %v1500_v21, 0 }
 0x1bd   : > { %3899 = vmatmul.msk.bf16.gmra.mxu2 %vm2153_vm9, %v2082_v27  ;;  %3954 = vmatmul.msk.bf16.gmra.mxu1 %vm2153_vm9, %v2084_v15  ;;  %v2254_v50 = vpop.f32.mrf.mxu2 }
 0x1be   : > { %v5169_v49 = vadd.f32 %v2357_v54, %v2254_v50  ;;  %2035 = vrot.lane.b32.xlu2 %v1569_v18, %s4068_s25  ;;  %v1511_v54 = vshll.u32 %v6294_v17, 16 }
 0x1bf   : > { %v2214_v14 = vpop.f32.mrf.mxu0  ;;  %v5175_v3 = vpop.f32.mrf.mxu1 }
 0x1c0   : > { %6293 = vst [vmem:[#allocation13_spill] sm:$0xff] %v5169_v49  ;;  %3938 = vmatmul.msk.bf16.gmra.mxu0 %vm2153_vm9, %v4965_v57  ;;  %v5173_v51 = vadd.f32 %v2317_v24, %v2214_v14  ;;  %v1513_v57 = vrot.slane %v1511_v54, 1 }
 0x1c1   : > { %v2362_v47 = vpop.f32.mrf.mxu3 }
 0x1c2   : > { %v1514_v33 = vor.u32 %v1513_v57, %v1509_v45  ;;  %v2056_v57 = vsel %vm399_vm0, %v4783_v6, %v1976_v61  ;;  %v521_v61 = vld [vmem:[#allocation2 + $0x198] sm:$0xff] }
 0x1c3   : > { %v611_v31 = vmul.f32 0.75, %v521_v61 }
 0x1c4   : > { %v1571_v50 = vsel %vm4857_vm11, %v1514_v33, 0 }
 0x1c5   : > { %3916 = vmatmul.msk.bf16.gmra.mxu3 %vm2153_vm9, %v2082_v27  ;;  %v5185_v24 = vpop.f32.mrf.mxu2  ;;  %2039 = vrot.lane.b32.xlu0 %v1571_v50, %s4068_s25  ;;  %v6296_v27 = vld [vmem:[#allocation17_spill] sm:$0xff] }
 0x1c6   : > { %6295 = vst [vmem:[#allocation8_spill] sm:$0xff] %v5185_v24  ;;  %1991 = vrot.lane.b32.xlu2 %v6296_v27, %s4067_s16  ;;  %v1525_v27 = vshll.u32 %v4891_v43, 16 }
 0x1c7   : > { %v2322_v14 = vpop.f32.mrf.mxu1  ;;  %v5197_v21 = vpop.f32.mrf.mxu0 }
 0x1c9   : > { %v5203_v54 = vpop.f32.mrf.mxu3 }
 0x1ca   : > { %6298 = vst [vmem:[#allocation12_spill] sm:$0xff] %v5203_v54  ;;  %v1527_v54 = vrot.slane %v1525_v27, 1 }
 0x1cd   : > { %3900 = vmatmul.msk.bf16.gmra.mxu2 %vm2153_vm9, %v2084_v15  ;;  %3955 = vmatmul.msk.bf16.gmra.mxu1 %vm2153_vm9, %v2086_v12 }
 0x1ce   : > { %v2259_v16 = vpop.f32.mrf.mxu2  ;;  %2135 = vrot.lane.b32.xlu0 %v4849_v39, %s4067_s16 }
 0x1cf   : > { %v5199_v18 = vadd.f32 %v2362_v47, %v2259_v16  ;;  %v5207_v45 = vpop.f32.mrf.mxu1  ;;  %v1978_v16 = vpop.permute.xlu0 %1977 }
 0x1d0   : > { %3939 = vmatmul.msk.bf16.gmra.mxu0 %vm2153_vm9, %v5003_v37  ;;  %v5217_v37 = vsel %vm1930_vm8, %v2056_v57, %v2024_v36  ;;  %v522_v57 = vld [vmem:[#allocation2 + $0x1a0] sm:$0xff]  ;;  %v523_v36 = vld [vmem:[#allocation2 + $0x1a8] sm:$0x3] }
 0x1d1   : > { %6297 = vst [vmem:[#allocation10_spill] sm:$0xff] %v5199_v18  ;;  %v2367_v50 = vpop.f32.mrf.mxu3  ;;  %v5233_v18 = vmul.f32 0.25, %v522_v57  ;;  %v612_v60 = vmul.f32 0.75, %v522_v57 }
 0x1d5   : > { %3917 = vmatmul.msk.bf16.gmra.mxu3 %vm2153_vm9, %v2084_v15 }
 0x1d6   : > { %v5214_v47 = vpop.f32.mrf.mxu2 }
 0x1d7   : > { %v2219_v59 = vpop.f32.mrf.mxu0  ;;  %6299 = vst [vmem:[#allocation16_spill] sm:$0xff] %v5214_v47  ;;  %v2327_v39 = vpop.f32.mrf.mxu1  ;;  %v5231_v47 = vmul.f32 0.25, %v521_v61 }
 0x1d8   : > { %v5212_v33 = vadd.f32 %v2322_v14, %v2219_v59  ;;  %v1523_v59 = vshrl.u32 %v4891_v43, 16 }
 0x1d9   : > { %v5235_v11 = vpop.f32.mrf.mxu3  ;;  %v1024_v49 = vrot.slane %v5231_v47, 1 }
 0x1da   : > { %6301 = vst [vmem:[#allocation14_spill] sm:$0xff] %v5235_v11  ;;  %v1528_v24 = vor.u32 %v1527_v54, %v1523_v59  ;;  %v613_v54 = vmul.f32 0.75, %v523_v36 }
 0x1dc   : > { %v1573_v11 = vsel %vm4857_vm11, %v1528_v24, 0 }
 0x1dd   : > { %3901 = vmatmul.msk.bf16.gmra.mxu2 %vm2153_vm9, %v2086_v12  ;;  %3956 = vmatmul.msk.bf16.gmra.mxu1 %vm2153_vm9, %v5217_v37 }
 0x1de   : > { %2138 = vrot.lane.b32.xlu1 %v1573_v11, %s4068_s25 }
 0x1df   : > { %v5222_v15 = vpop.f32.mrf.mxu0  ;;  %v5243_v27 = vpop.f32.mrf.mxu1 }
 0x1e0   : > { %3940 = vmatmul.msk.bf16.gmra.mxu0 %vm2153_vm9, %v5034_v28  ;;  %v884_v28 = vmul.f32 0.25, %v523_v36 }
 0x1e1   : > { %v2264_v6 = vpop.f32.mrf.mxu2 }
 0x1e2   : > { %v5226_v14 = vadd.f32 %v2367_v50, %v2264_v6  ;;  %v2058_v50 = vsel %vm399_vm0, %v4746_v34, %v1978_v16  ;;  %v2026_v6 = vpop.permute.xlu1 %2025  ;;  %v1027_v0 = vrot.slane %v884_v28, 1 }
 0x1e3   : > { %v5249_v34 = vsel %vm1930_vm8, %v2058_v50, %v2026_v6 }
 0x1e4   : > { %6300 = vst [vmem:[#allocation11_spill] sm:$0xff] %v5226_v14  ;;  %v1136_v61 = vadd.f32 %v1027_v0, %v613_v54 }
 0x1e5   : > { %3918 = vmatmul.msk.bf16.gmra.mxu3 %vm2153_vm9, %v2086_v12  ;;  %v1025_v12 = vrot.slane %v5233_v18, 1 }
 0x1e6   : > { %v1190_v11 = vpack.c.bf16 %v1136_v61, %v1136_v61 }
 0x1e7   : > { %v2224_v14 = vpop.f32.mrf.mxu0  ;;  %v1026_v7 = vsel %vm668_vm2, %v1024_v49, %v1025_v12  ;;  %v1028_v16 = vsel %vm668_vm2, %v1025_v12, %v1027_v0  ;;  %v2332_v40 = vpop.f32.mrf.mxu1 }
 0x1e8   : > { %v5241_v8 = vadd.f32 %v2327_v39, %v2224_v14  ;;  %v1134_v39 = vadd.f32 %v1026_v7, %v611_v31  ;;  %v6302_v14 = vld [vmem:[#allocation19_spill] sm:$0xff]  ;;  %v1135_v19 = vadd.f32 %v1028_v16, %v612_v60  ;;  %v2372_v7 = vpop.f32.mrf.mxu3  ;;  %v2601_v0 = vunpack.c.l.b16 %v1190_v11 }
 0x1e9   : > { %v1518_v59 = vshll.u32 %v6302_v14, 16  ;;  %v1516_v49 = vshrl.u32 %v6302_v14, 16  ;;  %v5261_v12 = vpop.f32.mrf.mxu2 }
 0x1ea   : > { %v1188_v57 = vpack.c.bf16 %v1134_v39, %v1134_v39  ;;  %v1189_v28 = vpack.c.bf16 %v1135_v19, %v1135_v19  ;;  %6303 = vst [vmem:[#allocation17_spill] sm:$0xff] %v5261_v12  ;;  %v2602_v19 = vpack.c.b16 %v2601_v0, %v2601_v0 }
 0x1eb   : > { %v1520_v24 = vrot.slane %v1518_v59, 1 }
 0x1ec   : > { %v1261_v36 = vunpack.c.l.b16 %v1188_v57  ;;  %v1262_v6 = vunpack.c.l.b16 %v1189_v28  ;;  %v1980_v57 = vpop.permute.xlu2 %1979 }
 0x1ed   : > { %3902 = vmatmul.msk.bf16.gmra.mxu2 %vm2153_vm9, %v5217_v37  ;;  %3957 = vmatmul.msk.bf16.gmra.mxu1 %vm2153_vm9, %v5249_v34  ;;  %v1521_v50 = vor.u32 %v1520_v24, %v1516_v49  ;;  %v2611_v49 = vshll.u32 %v2602_v19, 16  ;;  %v2060_v11 = vsel %vm399_vm0, %v6273_v26, %v1980_v57 }
 0x1ee   : > { %v5265_v39 = vpack.c.b16 %v1262_v6, %v1261_v36  ;;  %v2028_v36 = vpop.permute.xlu0 %2027 }
 0x1ef   : > { %v1572_v16 = vsel %vm4857_vm11, %v1521_v50, 0  ;;  %v5268_v59 = vpop.f32.mrf.mxu0  ;;  %v2613_v28 = vrot.slane %v2611_v49, 1  ;;  %v2092_v0 = vsel %vm1930_vm8, %v2060_v11, %v2028_v36  ;;  %v755_v49 = vrot.slane %v612_v60, 1 }
 0x1f0   : > { %3941 = vmatmul.msk.bf16.gmra.mxu0 %vm2153_vm9, %v5058_v4  ;;  %2041 = vrot.lane.b32.xlu2 %v1572_v16, %s4068_s25  ;;  %v2606_v61 = vshll.u32 %v5265_v39, 16  ;;  %v2604_v4 = vshrl.u32 %v5265_v39, 16  ;;  %v2374_v16 = vpop.f32.mrf.mxu3 }
 0x1f2   : > { %v2608_v24 = vrot.slane %v2606_v61, 1  ;;  %v757_v61 = vrot.slane %v613_v54, 1  ;;  %v1982_v54 = vpop.permute.xlu1 %1981 }
 0x1f4   : > { %v2609_v50 = vor.u32 %v2608_v24, %v2604_v4  ;;  %v754_v4 = vrot.slane %v611_v31, 1 }
 0x1f5   : > { %3919 = vmatmul.msk.bf16.gmra.mxu3 %vm2153_vm9, %v5217_v37  ;;  %v2334_v37 = vpop.f32.mrf.mxu1 }
 0x1f6   : > { %v2614_v6 = vsel %vm1555_vm3, %v2609_v50, %v2613_v28  ;;  %v756_v24 = vsel %vm668_vm2, %v754_v4, %v755_v49 }
 0x1f7   : > { %2622 = vrot.lane.b32.xlu0 %v2614_v6, %s4067_s16  ;;  %2615 = vrot.lane.b32.xlu1 %v2614_v6, %s4068_s25  ;;  %v829_v28 = vadd.f32 %v756_v24, %v5231_v47  ;;  %v2062_v47 = vsel %vm399_vm0, %v6279_v13, %v1982_v54 }
 0x1fc   : > { %v2269_v19 = vpop.f32.mrf.mxu2  ;;  %v2377_v6 = vpop.f32.mrf.mxu3 }
 0x1fd   : > { %v5280_v12 = vadd.f32 %v2372_v7, %v2269_v19  ;;  %3903 = vmatmul.msk.bf16.gmra.mxu2 %vm2153_vm9, %v5249_v34  ;;  %3958 = vmatmul.msk.bf16.gmra.mxu1 %vm2153_vm9, %v2092_v0  ;;  %v2229_v26 = vpop.f32.mrf.mxu0  ;;  %v758_v7 = vsel %vm668_vm2, %v755_v49, %v757_v61  ;;  %v2337_v31 = vpop.f32.mrf.mxu1 }
 0x1fe   : > { %v5285_v57 = vadd.f32 %v2332_v40, %v2229_v26  ;;  %v830_v11 = vadd.f32 %v758_v7, %v5233_v18  ;;  %v865_v40 = vpack.c.bf16 %v829_v28, %v829_v28  ;;  %v2030_v18 = vpop.permute.xlu2 %2029 }
 0x200   : > { %3942 = vmatmul.msk.bf16.gmra.mxu0 %vm2153_vm9, %v4735_v56  ;;  %v866_v19 = vpack.c.bf16 %v830_v11, %v830_v11  ;;  %v1390_v26 = vunpack.c.l.b16 %v865_v40 }
 0x202   : > { %v1391_v61 = vunpack.c.l.b16 %v866_v19  ;;  %v1984_v19 = vpop.permute.xlu0 %1983 }
 0x204   : > { %v2271_v36 = vpop.f32.mrf.mxu2  ;;  %v5301_v4 = vpack.c.b16 %v1391_v61, %v1390_v26  ;;  %v2379_v7 = vpop.f32.mrf.mxu3 }
 0x205   : > { %v5293_v50 = vadd.f32 %v2374_v16, %v2271_v36  ;;  %3920 = vmatmul.msk.bf16.gmra.mxu3 %vm2153_vm9, %v5249_v34  ;;  %v2231_v60 = vpop.f32.mrf.mxu0  ;;  %v2094_v16 = vsel %vm1930_vm8, %v2062_v47, %v2030_v18  ;;  %v2339_v36 = vpop.f32.mrf.mxu1 }
 0x206   : > { %v5297_v56 = vadd.f32 %v2334_v37, %v2231_v60  ;;  %2598 = vrot.lane.b32.xlu2 %v5301_v4, %s4067_s16  ;;  %v1532_v49 = vshll.u32 %v5301_v4, 16  ;;  %v1530_v37 = vshrl.u32 %v5301_v4, 16  ;;  %v2032_v61 = vpop.permute.xlu1 %2031 }
 0x208   : > { %v1534_v24 = vrot.slane %v1532_v49, 1 }
 0x20a   : > { %v1535_v28 = vor.u32 %v1534_v24, %v1530_v37 }
 0x20c   : > { %v1574_v40 = vsel %vm4857_vm11, %v1535_v28, 0  ;;  %v2305_v28 = vadd.f32 %v5088_v10, %v5105_v9 }
 0x20d   : > { %3904 = vmatmul.msk.bf16.gmra.mxu2 %vm2153_vm9, %v2092_v0  ;;  %3959 = vmatmul.msk.bf16.gmra.mxu1 %vm2153_vm9, %v2094_v16  ;;  %v2234_v34 = vpop.f32.mrf.mxu0 }
 0x20e   : > { %v5310_v13 = vadd.f32 %v2337_v31, %v2234_v34  ;;  %2625 = vrot.lane.b32.xlu2 %v1574_v40, %s4068_s25  ;;  %v2064_v31 = vsel %vm399_vm0, %v6277_v2, %v1984_v19  ;;  %v2034_v19 = vpop.permute.xlu0 %2033 }
 0x20f   : > { %v2096_v58 = vsel %vm1930_vm8, %v2064_v31, %v2032_v61 }
 0x210   : > { %v2274_v11 = vpop.f32.mrf.mxu2  ;;  %3943 = vmatmul.msk.bf16.gmra.mxu0 %vm2153_vm9, %v4781_v42 }
 0x211   : > { %v5314_v54 = vadd.f32 %v2377_v6, %v2274_v11  ;;  %v1986_v11 = vpop.permute.xlu2 %1985 }
 0x215   : > { %3921 = vmatmul.msk.bf16.gmra.mxu3 %vm2153_vm9, %v2092_v0  ;;  %v2236_v60 = vpop.f32.mrf.mxu0 }
 0x216   : > { %v5320_v26 = vadd.f32 %v2339_v36, %v2236_v60 }
 0x218   : > { %v2276_v47 = vpop.f32.mrf.mxu2  ;;  %v2514_v18 = vpop.f32.mrf.mxu3 }
 0x219   : > { %v5324_v42 = vadd.f32 %v2379_v7, %v2276_v47 }
 0x21a   : > { %v2777_v6 = vpop.f32.mrf.mxu1 }
 0x21d   : > { %3905 = vmatmul.msk.bf16.gmra.mxu2 %vm2153_vm9, %v2094_v16  ;;  %3960 = vmatmul.msk.bf16.gmra.mxu1 %vm2153_vm9, %v2096_v58  ;;  %v2654_v49 = vpop.f32.mrf.mxu0 }
 0x21e   : > { %v5330_v0 = vadd.f32 %v2654_v49, %v5086_v23  ;;  %v2066_v23 = vsel %vm399_vm0, %v6281_v38, %v1986_v11  ;;  %v2036_v11 = vpop.permute.xlu2 %2035 }
 0x21f   : > { %v2098_v47 = vsel %vm1930_vm8, %v2066_v23, %v2034_v19 }
 0x220   : > { %v2423_v34 = vpop.f32.mrf.mxu2  ;;  %v2516_v37 = vpop.f32.mrf.mxu3  ;;  %3944 = vmatmul.msk.bf16.gmra.mxu0 %vm2153_vm9, %v4846_v22 }
 0x221   : > { %v2515_v2 = vadd.f32 %v2514_v18, %v2423_v34 }
 0x222   : > { %v2779_v24 = vpop.f32.mrf.mxu1 }
 0x223   : > { %v5334_v7 = vadd.f32 %v2777_v6, %v2515_v2  ;;  %v1988_v2 = vpop.permute.xlu1 %1987 }
 0x225   : > { %3922 = vmatmul.msk.bf16.gmra.mxu3 %vm2153_vm9, %v2094_v16  ;;  %v2656_v36 = vpop.f32.mrf.mxu0 }
 0x226   : > { %v5339_v40 = vadd.f32 %v2656_v36, %v2305_v28 }
 0x228   : > { %v2425_v60 = vpop.f32.mrf.mxu2  ;;  %v2519_v31 = vpop.f32.mrf.mxu3 }
 0x229   : > { %v2517_v22 = vadd.f32 %v2516_v37, %v2425_v60  ;;  %v2310_v37 = vadd.f32 %v5126_v48, %v5135_v55 }
 0x22a   : > { %v2782_v61 = vpop.f32.mrf.mxu1 }
 0x22b   : > { %v5344_v18 = vadd.f32 %v2779_v24, %v2517_v22 }
 0x22d   : > { %3906 = vmatmul.msk.bf16.gmra.mxu2 %vm2153_vm9, %v2096_v58  ;;  %3961 = vmatmul.msk.bf16.gmra.mxu1 %vm2153_vm9, %v2098_v47  ;;  %v2659_v10 = vpop.f32.mrf.mxu0 }
 0x22e   : > { %v5349_v9 = vadd.f32 %v2659_v10, %v5124_v46  ;;  %v2068_v46 = vsel %vm399_vm0, %v6291_v62, %v1988_v2 }
 0x22f   : > { %v2100_v60 = vsel %vm1930_vm8, %v2068_v46, %v2036_v11 }
 0x230   : > { %v2428_v16 = vpop.f32.mrf.mxu2  ;;  %v2521_v6 = vpop.f32.mrf.mxu3  ;;  %3945 = vmatmul.msk.bf16.gmra.mxu0 %vm2153_vm9, %v4907_v35 }
 0x231   : > { %v2520_v38 = vadd.f32 %v2519_v31, %v2428_v16  ;;  %v2315_v16 = vadd.f32 %v5148_v63, %v5157_v29 }
 0x232   : > { %v2784_v49 = vpop.f32.mrf.mxu1 }
 0x233   : > { %v5353_v34 = vadd.f32 %v2782_v61, %v2520_v38 }
 0x235   : > { %3923 = vmatmul.msk.bf16.gmra.mxu3 %vm2153_vm9, %v2096_v58  ;;  %v2661_v24 = vpop.f32.mrf.mxu0 }
 0x236   : > { %v5358_v28 = vadd.f32 %v2661_v24, %v2310_v37  ;;  %v2038_v37 = vpop.permute.xlu1 %2037 }
 0x238   : > { %v2430_v36 = vpop.f32.mrf.mxu2  ;;  %v2524_v23 = vpop.f32.mrf.mxu3 }
 0x239   : > { %v2522_v35 = vadd.f32 %v2521_v6, %v2430_v36  ;;  %v1990_v6 = vpop.permute.xlu0 %1989 }
 0x23a   : > { %v2787_v19 = vpop.f32.mrf.mxu1 }
 0x23b   : > { %v5363_v31 = vadd.f32 %v2784_v49, %v2522_v35 }
 0x23d   : > { %3907 = vmatmul.msk.bf16.gmra.mxu2 %vm2153_vm9, %v2098_v47  ;;  %3962 = vmatmul.msk.bf16.gmra.mxu1 %vm2153_vm9, %v2100_v60  ;;  %v2664_v48 = vpop.f32.mrf.mxu0 }
 0x23e   : > { %v5368_v55 = vadd.f32 %v2664_v48, %v5146_v41  ;;  %v2070_v41 = vsel %vm399_vm0, %v6289_v20, %v1990_v6  ;;  %v2320_v48 = vadd.f32 %v5175_v3, %v5197_v21 }
 0x23f   : > { %v2102_v11 = vsel %vm1930_vm8, %v2070_v41, %v2038_v37 }
 0x240   : > { %v2433_v58 = vpop.f32.mrf.mxu2  ;;  %v2526_v22 = vpop.f32.mrf.mxu3  ;;  %3946 = vmatmul.msk.bf16.gmra.mxu0 %vm2153_vm9, %v4953_v32 }
 0x241   : > { %v2525_v62 = vadd.f32 %v2524_v23, %v2433_v58  ;;  %v1992_v58 = vpop.permute.xlu2 %1991 }
 0x242   : > { %v2789_v61 = vpop.f32.mrf.mxu1 }
 0x243   : > { %v5372_v10 = vadd.f32 %v2787_v19, %v2525_v62 }
 0x245   : > { %3924 = vmatmul.msk.bf16.gmra.mxu3 %vm2153_vm9, %v2098_v47  ;;  %v2666_v38 = vpop.f32.mrf.mxu0 }
 0x246   : > { %v5377_v49 = vadd.f32 %v2666_v38, %v2315_v16 }
 0x248   : > { %v2435_v2 = vpop.f32.mrf.mxu2  ;;  %v2529_v24 = vpop.f32.mrf.mxu3 }
 0x249   : > { %v2527_v32 = vadd.f32 %v2526_v22, %v2435_v2 }
 0x24a   : > { %v2792_v46 = vpop.f32.mrf.mxu1 }
 0x24b   : > { %v5382_v36 = vadd.f32 %v2789_v61, %v2527_v32  ;;  %v2040_v61 = vpop.permute.xlu0 %2039 }
 0x24d   : > { %3908 = vmatmul.msk.bf16.gmra.mxu2 %vm2153_vm9, %v2100_v60  ;;  %3963 = vmatmul.msk.bf16.gmra.mxu1 %vm2153_vm9, %v2102_v11  ;;  %v2669_v63 = vpop.f32.mrf.mxu0 }
 0x24e   : > { %v5387_v29 = vadd.f32 %v2669_v63, %v5173_v51  ;;  %v2072_v51 = vsel %vm399_vm0, %v6294_v17, %v1992_v58  ;;  %v1994_v63 = vpop.permute.xlu1 %1993 }
 0x24f   : > { %v2104_v41 = vsel %vm1930_vm8, %v2072_v51, %v2040_v61 }
 0x250   : > { %v2438_v47 = vpop.f32.mrf.mxu2  ;;  %v2531_v23 = vpop.f32.mrf.mxu3  ;;  %3947 = vmatmul.msk.bf16.gmra.mxu0 %vm2153_vm9, %v4980_v44 }
 0x251   : > { %v2530_v20 = vadd.f32 %v2529_v24, %v2438_v47 }
 0x252   : > { %v2794_v35 = vpop.f32.mrf.mxu1 }
 0x253   : > { %v5391_v19 = vadd.f32 %v2792_v46, %v2530_v20  ;;  %v2325_v46 = vadd.f32 %v5207_v45, %v5222_v15  ;;  %v2042_v20 = vpop.permute.xlu2 %2041 }
 0x255   : > { %6304 = vst [vmem:[#allocation19_spill] sm:$0xff] %v5391_v19  ;;  %3925 = vmatmul.msk.bf16.gmra.mxu3 %vm2153_vm9, %v2100_v60  ;;  %v2671_v22 = vpop.f32.mrf.mxu0 }
 0x256   : > { %v5396_v62 = vadd.f32 %v2671_v22, %v2320_v48 }
 0x258   : > { %v2440_v16 = vpop.f32.mrf.mxu2  ;;  %v2534_v6 = vpop.f32.mrf.mxu3 }
 0x259   : > { %v2532_v44 = vadd.f32 %v2531_v23, %v2440_v16 }
 0x25a   : > { %v2797_v38 = vpop.f32.mrf.mxu1 }
 0x25b   : > { %v5401_v37 = vadd.f32 %v2794_v35, %v2532_v44  ;;  %v2330_v44 = vadd.f32 %v5243_v27, %v5268_v59 }
 0x25d   : > { %6305 = vst [vmem:[#allocation20_spill] sm:$0xff] %v5401_v37  ;;  %3909 = vmatmul.msk.bf16.gmra.mxu2 %vm2153_vm9, %v2102_v11  ;;  %3964 = vmatmul.msk.bf16.gmra.mxu1 %vm2153_vm9, %v2104_v41  ;;  %v2674_v3 = vpop.f32.mrf.mxu0 }
 0x25e   : > { %v5406_v21 = vadd.f32 %v2674_v3, %v5212_v33  ;;  %v2074_v33 = vsel %vm399_vm0, %v6302_v14, %v1994_v63 }
 0x25f   : > { %v2106_v22 = vsel %vm1930_vm8, %v2074_v33, %v2042_v20 }
 0x260   : > { %v2443_v60 = vpop.f32.mrf.mxu2  ;;  %v2536_v2 = vpop.f32.mrf.mxu3  ;;  %3948 = vmatmul.msk.bf16.gmra.mxu0 %vm2153_vm9, %v5013_v53 }
 0x261   : > { %v2535_v17 = vadd.f32 %v2534_v6, %v2443_v60  ;;  %v2599_v59 = vpop.permute.xlu2 %2598 }
 0x262   : > { %v2799_v24 = vpop.f32.mrf.mxu1 }
 0x263   : > { %v5410_v32 = vadd.f32 %v2797_v38, %v2535_v17  ;;  %v2136_v38 = vpop.permute.xlu0 %2135 }
 0x265   : > { %6306 = vst [vmem:[#allocation21_spill] sm:$0xff] %v5410_v32  ;;  %3926 = vmatmul.msk.bf16.gmra.mxu3 %vm2153_vm9, %v2102_v11  ;;  %v2676_v47 = vpop.f32.mrf.mxu0 }
 0x266   : > { %v5415_v23 = vadd.f32 %v2676_v47, %v2325_v46 }
 0x268   : > { %v2445_v35 = vpop.f32.mrf.mxu2  ;;  %v2539_v48 = vpop.f32.mrf.mxu3 }
 0x269   : > { %v2537_v53 = vadd.f32 %v2536_v2, %v2445_v35  ;;  %v2139_v2 = vpop.permute.xlu1 %2138 }
 0x26a   : > { %v2802_v58 = vpop.f32.mrf.mxu1 }
 0x26b   : > { %v5420_v51 = vadd.f32 %v2799_v24, %v2537_v53  ;;  %v2623_v53 = vpop.permute.xlu0 %2622 }
 0x26d   : > { %6307 = vst [vmem:[#allocation22_spill] sm:$0xff] %v5420_v51  ;;  %3910 = vmatmul.msk.bf16.gmra.mxu2 %vm2153_vm9, %v2104_v41  ;;  %3965 = vmatmul.msk.bf16.gmra.mxu1 %vm2153_vm9, %v2106_v22  ;;  %v2679_v45 = vpop.f32.mrf.mxu0 }
 0x26e   : > { %v5425_v15 = vadd.f32 %v2679_v45, %v5241_v8  ;;  %v2141_v8 = vsel %vm399_vm0, %v4891_v43, %v2136_v38 }
 0x26f   : > { %v2143_v63 = vsel %vm1930_vm8, %v2141_v8, %v2139_v2 }
 0x270   : > { %v2448_v11 = vpop.f32.mrf.mxu2  ;;  %v2541_v61 = vpop.f32.mrf.mxu3  ;;  %3949 = vmatmul.msk.bf16.gmra.mxu0 %vm2153_vm9, %v5047_v30 }
 0x271   : > { %v2540_v14 = vadd.f32 %v2539_v48, %v2448_v11  ;;  %v2626_v11 = vpop.permute.xlu2 %2625 }
 0x272   : > { %v2804_v16 = vpop.f32.mrf.mxu1 }
 0x273   : > { %v5429_v6 = vadd.f32 %v2802_v58, %v2540_v14 }
 0x275   : > { %6308 = vst [vmem:[#allocation23_spill] sm:$0xff] %v5429_v6  ;;  %3927 = vmatmul.msk.bf16.gmra.mxu3 %vm2153_vm9, %v2104_v41  ;;  %v2681_v3 = vpop.f32.mrf.mxu0 }
 0x276   : > { %v5434_v60 = vadd.f32 %v2681_v3, %v2330_v44 }
 0x278   : > { %v2450_v17 = vpop.f32.mrf.mxu2  ;;  %v2544_v24 = vpop.f32.mrf.mxu3 }
 0x279   : > { %v2542_v30 = vadd.f32 %v2541_v61, %v2450_v17 }
 0x27a   : > { %v2807_v46 = vpop.f32.mrf.mxu1 }
 0x27b   : > { %v5439_v47 = vadd.f32 %v2804_v16, %v2542_v30 }
 0x27d   : > { %6309 = vst [vmem:[#allocation24_spill] sm:$0xff] %v5439_v47  ;;  %3911 = vmatmul.msk.bf16.gmra.mxu2 %vm2153_vm9, %v2106_v22  ;;  %3966 = vmatmul.msk.bf16.gmra.mxu1 %vm2153_vm9, %v2143_v63  ;;  %v2684_v27 = vpop.f32.mrf.mxu0 }
 0x27e   : > { %v5444_v41 = vadd.f32 %v2684_v27, %v5285_v57  ;;  %v2628_v57 = vsel %vm399_vm0, %v5301_v4, %v2623_v53 }
 0x27f   : > { %v2630_v38 = vsel %vm1930_vm8, %v2628_v57, %v2626_v11 }
 0x280   : > { %6310 = vst [vmem:[#allocation25_spill] sm:$0xff] %v5444_v41  ;;  %v2453_v33 = vpop.f32.mrf.mxu2  ;;  %v2546_v43 = vpop.f32.mrf.mxu3  ;;  %3950 = vmatmul.msk.bf16.gmra.mxu0 %vm2153_vm9, %v5077_v52  ;;  %v1319_v52 = vsel %vm4692_vm6, 0, %v5265_v39 }
 0x281   : > { %v2545_v20 = vadd.f32 %v2544_v24, %v2453_v33 }
 0x282   : > { %v2809_v35 = vpop.f32.mrf.mxu1 }
 0x283   : > { %v5448_v48 = vadd.f32 %v2807_v46, %v2545_v20 }
 0x285   : > { %6311 = vst [vmem:[#allocation26_spill] sm:$0xff] %v5448_v48  ;;  %3928 = vmatmul.msk.bf16.gmra.mxu3 %vm2153_vm9, %v2106_v22  ;;  %v2686_v58 = vpop.f32.mrf.mxu0  ;;  %v2619_v22 = vsel %vm399_vm0, %v1319_v52, %v2599_v59 }
 0x286   : > { %v5452_v45 = vadd.f32 %v2686_v58, %v5297_v56  ;;  %v2616_v56 = vpop.permute.xlu1 %2615 }
 0x287   : > { %v2621_v25 = vsel %vm1930_vm8, %v2619_v22, %v2616_v56 }
 0x288   : > { %6312 = vst [vmem:[#allocation27_spill] sm:$0xff] %v5452_v45  ;;  %v2455_v61 = vpop.f32.mrf.mxu2  ;;  %v2549_v14 = vpop.f32.mrf.mxu3 }
 0x289   : > { %v2547_v16 = vadd.f32 %v2546_v43, %v2455_v61 }
 0x28a   : > { %v2812_v44 = vpop.f32.mrf.mxu1 }
 0x28b   : > { %v5460_v3 = vadd.f32 %v2809_v35, %v2547_v16 }
 0x28d   : > { %6313 = vst [vmem:[#allocation28_spill] sm:$0xff] %v5460_v3  ;;  %3912 = vmatmul.msk.bf16.gmra.mxu2 %vm2153_vm9, %v2143_v63  ;;  %3967 = vmatmul.msk.bf16.gmra.mxu1 %vm2153_vm9, %v2630_v38  ;;  %v2689_v4 = vpop.f32.mrf.mxu0 }
 0x28e   : > { %v5466_v8 = vadd.f32 %v2689_v4, %v5310_v13 }
 0x290   : > { %6314 = vst [vmem:[#allocation29_spill] sm:$0xff] %v5466_v8  ;;  %v2458_v39 = vpop.f32.mrf.mxu2  ;;  %v2551_v2 = vpop.f32.mrf.mxu3  ;;  %3951 = vmatmul.msk.bf16.gmra.mxu0 %vm2153_vm9, %v2621_v25  ;;  %v6323_v25 = vld [vmem:[#allocation3_spill] sm:$0xff] }
 0x291   : > { %v2550_v17 = vadd.f32 %v2549_v14, %v2458_v39  ;;  %v6320_v14 = vld [vmem:[#allocation15_spill] sm:$0xff] }
 0x292   : > { %v2814_v24 = vpop.f32.mrf.mxu1 }
 0x293   : > { %v5470_v30 = vadd.f32 %v2812_v44, %v2550_v17 }
 0x295   : > { %6315 = vst [vmem:[#allocation30_spill] sm:$0xff] %v5470_v30  ;;  %v2691_v46 = vpop.f32.mrf.mxu0 }
 0x296   : > { %v5473_v27 = vadd.f32 %v2691_v46, %v5320_v26  ;;  %v2345_v26 = vadd.f32 %v6320_v14, %v5100_v5  ;;  %v6326_v5 = vld [vmem:[#allocation18_spill] sm:$0xff] }
 0x298   : > { %6316 = vst [vmem:[#allocation31_spill] sm:$0xff] %v5473_v27  ;;  %v2460_v63 = vpop.f32.mrf.mxu2  ;;  %v2554_v59 = vpop.f32.mrf.mxu3 }
 0x299   : > { %v2552_v33 = vadd.f32 %v2551_v2, %v2460_v63 }
 0x29a   : > { %v2817_v43 = vpop.f32.mrf.mxu1 }
 0x29b   : > { %v5475_v13 = vadd.f32 %v2814_v24, %v2552_v33 }
 0x29d   : > { %6317 = vst [vmem:[#allocation32_spill] sm:$0xff] %v5475_v13  ;;  %v2694_v20 = vpop.f32.mrf.mxu0 }
 0x29e   : > { %v5478_v35 = vadd.f32 %v2694_v20, %v5082_v1 }
 0x2a0   : > { %6318 = vst [vmem:[#allocation33_spill] sm:$0xff] %v5478_v35  ;;  %v2463_v53 = vpop.f32.mrf.mxu2  ;;  %v2556_v58 = vpop.f32.mrf.mxu3 }
 0x2a1   : > { %v2555_v57 = vadd.f32 %v2554_v59, %v2463_v53  ;;  %v6327_v59 = vld [vmem:[#allocation6_spill] sm:$0xff] }
 0x2a2   : > { %v2819_v11 = vpop.f32.mrf.mxu1  ;;  %v2350_v33 = vadd.f32 %v6327_v59, %v6326_v5 }
 0x2a3   : > { %v5480_v61 = vadd.f32 %v2817_v43, %v2555_v57 }
 0x2a5   : > { %6319 = vst [vmem:[#allocation34_spill] sm:$0xff] %v5480_v61  ;;  %v2696_v52 = vpop.f32.mrf.mxu0 }
 0x2a6   : > { %v5484_v16 = vadd.f32 %v2696_v52, %v2345_v26  ;;  %v6330_v52 = vld [vmem:[#allocation7_spill] sm:$0xff] }
 0x2a8   : > { %6321 = vst [vmem:[#allocation15_spill] sm:$0xff] %v5484_v16  ;;  %v2465_v44 = vpop.f32.mrf.mxu2  ;;  %v2559_v38 = vpop.f32.mrf.mxu3 }
 0x2a9   : > { %v2557_v22 = vadd.f32 %v2556_v58, %v2465_v44 }
 0x2aa   : > { %v2822_v56 = vpop.f32.mrf.mxu1 }
 0x2ab   : > { %v5486_v4 = vadd.f32 %v2819_v11, %v2557_v22 }
 0x2ad   : > { %6322 = vst [vmem:[#allocation35_spill] sm:$0xff] %v5486_v4  ;;  %v2699_v1 = vpop.f32.mrf.mxu0 }
 0x2ae   : > { %v5489_v39 = vadd.f32 %v2699_v1, %v6323_v25 }
 0x2b0   : > { %6324 = vst [vmem:[#allocation3_spill] sm:$0xff] %v5489_v39  ;;  %v2468_v2 = vpop.f32.mrf.mxu2  ;;  %v2561_v17 = vpop.f32.mrf.mxu3 }
 0x2b1   : > { %v2560_v24 = vadd.f32 %v2559_v38, %v2468_v2  ;;  %v6333_v2 = vld [vmem:[#allocation9_spill] sm:$0xff] }
 0x2b2   : > { %v2824_v46 = vpop.f32.mrf.mxu1 }
 0x2b3   : > { %v5491_v63 = vadd.f32 %v2822_v56, %v2560_v24  ;;  %v6334_v24 = vld [vmem:[#allocation5_spill] sm:$0xff] }
 0x2b4   : > { %v2355_v5 = vadd.f32 %v6334_v24, %v6333_v2  ;;  %v6340_v2 = vld [vmem:[#allocation8_spill] sm:$0xff] }
 0x2b5   : > { %6325 = vst [vmem:[#allocation36_spill] sm:$0xff] %v5491_v63  ;;  %v2701_v43 = vpop.f32.mrf.mxu0  ;;  %v6341_v24 = vld [vmem:[#allocation4_spill] sm:$0xff] }
 0x2b6   : > { %v5495_v20 = vadd.f32 %v2701_v43, %v2350_v33 }
 0x2b8   : > { %6328 = vst [vmem:[#allocation18_spill] sm:$0xff] %v5495_v20  ;;  %v2470_v53 = vpop.f32.mrf.mxu2  ;;  %v2564_v58 = vpop.f32.mrf.mxu3 }
 0x2b9   : > { %v2562_v57 = vadd.f32 %v2561_v17, %v2470_v53 }
 0x2ba   : > { %v2827_v11 = vpop.f32.mrf.mxu1 }
 0x2bb   : > { %v5497_v14 = vadd.f32 %v2824_v46, %v2562_v57 }
 0x2bd   : > { %6329 = vst [vmem:[#allocation6_spill] sm:$0xff] %v5497_v14  ;;  %v2704_v26 = vpop.f32.mrf.mxu0 }
 0x2be   : > { %v5500_v44 = vadd.f32 %v2704_v26, %v6330_v52  ;;  %v6337_v52 = vld [vmem:[#allocation13_spill] sm:$0xff] }
 0x2c0   : > { %6331 = vst [vmem:[#allocation7_spill] sm:$0xff] %v5500_v44  ;;  %v2473_v38 = vpop.f32.mrf.mxu2  ;;  %v2566_v22 = vpop.f32.mrf.mxu3 }
 0x2c1   : > { %v2565_v56 = vadd.f32 %v2564_v58, %v2473_v38 }
 0x2c2   : > { %v2829_v1 = vpop.f32.mrf.mxu1 }
 0x2c3   : > { %v5502_v25 = vadd.f32 %v2827_v11, %v2565_v56 }
 0x2c5   : > { %6332 = vst [vmem:[#allocation37_spill] sm:$0xff] %v5502_v25  ;;  %v2706_v59 = vpop.f32.mrf.mxu0 }
 0x2c6   : > { %v5506_v33 = vadd.f32 %v2706_v59, %v2355_v5  ;;  %v2360_v5 = vadd.f32 %v6341_v24, %v6340_v2  ;;  %v6347_v2 = vld [vmem:[#allocation16_spill] sm:$0xff] }
 0x2c7   : > { %v6348_v24 = vld [vmem:[#allocation12_spill] sm:$0xff] }
 0x2c8   : > { %6335 = vst [vmem:[#allocation9_spill] sm:$0xff] %v5506_v33  ;;  %v2475_v17 = vpop.f32.mrf.mxu2  ;;  %v2569_v43 = vpop.f32.mrf.mxu3 }
 0x2c9   : > { %v2567_v46 = vadd.f32 %v2566_v22, %v2475_v17 }
 0x2ca   : > { %v2832_v53 = vpop.f32.mrf.mxu1 }
 0x2cb   : > { %v5508_v57 = vadd.f32 %v2829_v1, %v2567_v46 }
 0x2cd   : > { %6336 = vst [vmem:[#allocation5_spill] sm:$0xff] %v5508_v57  ;;  %v2709_v26 = vpop.f32.mrf.mxu0 }
 0x2ce   : > { %v5511_v44 = vadd.f32 %v2709_v26, %v6337_v52  ;;  %v6344_v52 = vld [vmem:[#allocation10_spill] sm:$0xff] }
 0x2d0   : > { %6338 = vst [vmem:[#allocation13_spill] sm:$0xff] %v5511_v44  ;;  %v2478_v58 = vpop.f32.mrf.mxu2  ;;  %v2571_v38 = vpop.f32.mrf.mxu3 }
 0x2d1   : > { %v2570_v11 = vadd.f32 %v2569_v43, %v2478_v58 }
 0x2d2   : > { %v2834_v56 = vpop.f32.mrf.mxu1 }
 0x2d3   : > { %v5513_v20 = vadd.f32 %v2832_v53, %v2570_v11 }
 0x2d5   : > { %6339 = vst [vmem:[#allocation38_spill] sm:$0xff] %v5513_v20  ;;  %v2711_v59 = vpop.f32.mrf.mxu0 }
 0x2d6   : > { %v5517_v33 = vadd.f32 %v2711_v59, %v2360_v5  ;;  %v2365_v5 = vadd.f32 %v6348_v24, %v6347_v2  ;;  %v6353_v2 = vld [vmem:[#allocation17_spill] sm:$0xff]  ;;  %v6354_v24 = vld [vmem:[#allocation14_spill] sm:$0xff] }
 0x2d8   : > { %6342 = vst [vmem:[#allocation8_spill] sm:$0xff] %v5517_v33  ;;  %v2480_v22 = vpop.f32.mrf.mxu2  ;;  %v2574_v17 = vpop.f32.mrf.mxu3 }
 0x2d9   : > { %v2572_v1 = vadd.f32 %v2571_v38, %v2480_v22 }
 0x2da   : > { %v2837_v46 = vpop.f32.mrf.mxu1 }
 0x2db   : > { %v5519_v39 = vadd.f32 %v2834_v56, %v2572_v1 }
 0x2dd   : > { %6343 = vst [vmem:[#allocation4_spill] sm:$0xff] %v5519_v39  ;;  %v2714_v26 = vpop.f32.mrf.mxu0 }
 0x2de   : > { %v5522_v44 = vadd.f32 %v2714_v26, %v6344_v52  ;;  %v6350_v52 = vld [vmem:[#allocation11_spill] sm:$0xff] }
 0x2e0   : > { %6345 = vst [vmem:[#allocation10_spill] sm:$0xff] %v5522_v44  ;;  %v2483_v43 = vpop.f32.mrf.mxu2  ;;  %v2576_v58 = vpop.f32.mrf.mxu3 }
 0x2e1   : > { %v2575_v53 = vadd.f32 %v2574_v17, %v2483_v43 }
 0x2e2   : > { %v2839_v11 = vpop.f32.mrf.mxu1 }
 0x2e3   : > { %v5524_v16 = vadd.f32 %v2837_v46, %v2575_v53 }
 0x2e5   : > { %6346 = vst [vmem:[#allocation39_spill] sm:$0xff] %v5524_v16  ;;  %v2716_v59 = vpop.f32.mrf.mxu0 }
 0x2e6   : > { %v5528_v33 = vadd.f32 %v2716_v59, %v2365_v5  ;;  %v2370_v5 = vadd.f32 %v6354_v24, %v6353_v2 }
 0x2e8   : > { %6349 = vst [vmem:[#allocation16_spill] sm:$0xff] %v5528_v33  ;;  %v2485_v38 = vpop.f32.mrf.mxu2  ;;  %v2579_v22 = vpop.f32.mrf.mxu3 }
 0x2e9   : > { %v2577_v56 = vadd.f32 %v2576_v58, %v2485_v38 }
 0x2ea   : > { %v2842_v1 = vpop.f32.mrf.mxu1 }
 0x2eb   : > { %v5530_v35 = vadd.f32 %v2839_v11, %v2577_v56 }
 0x2ed   : > { %v2719_v26 = vpop.f32.mrf.mxu0 }
 0x2ee   : > { %v5533_v44 = vadd.f32 %v2719_v26, %v6350_v52 }
 0x2f0   : > { %6351 = vst [vmem:[#allocation12_spill] sm:$0xff] %v5533_v44  ;;  %v2488_v17 = vpop.f32.mrf.mxu2  ;;  %v2581_v43 = vpop.f32.mrf.mxu3 }
 0x2f1   : > { %v2580_v46 = vadd.f32 %v2579_v22, %v2488_v17 }
 0x2f2   : > { %v2844_v53 = vpop.f32.mrf.mxu1 }
 0x2f3   : > { %v5535_v27 = vadd.f32 %v2842_v1, %v2580_v46 }
 0x2f5   : > { %6352 = vst [vmem:[#allocation11_spill] sm:$0xff] %v5535_v27  ;;  %v2721_v59 = vpop.f32.mrf.mxu0 }
 0x2f6   : > { %v5539_v33 = vadd.f32 %v2721_v59, %v2370_v5 }
 0x2f8   : > { %6355 = vst [vmem:[#allocation17_spill] sm:$0xff] %v5539_v33  ;;  %v2490_v58 = vpop.f32.mrf.mxu2  ;;  %v2584_v11 = vpop.f32.mrf.mxu3 }
 0x2f9   : > { %v2582_v38 = vadd.f32 %v2581_v43, %v2490_v58 }
 0x2fa   : > { %v2847_v8 = vpop.f32.mrf.mxu1 }
 0x2fb   : > { %v5541_v56 = vadd.f32 %v2844_v53, %v2582_v38 }
 0x2fd   : > { %v2724_v26 = vpop.f32.mrf.mxu0 }
 0x2fe   : > { %v5544_v52 = vadd.f32 %v2724_v26, %v5280_v12 }
 0x300   : > { %6356 = vst [vmem:[#allocation14_spill] sm:$0xff] %v5544_v52  ;;  %v2493_v22 = vpop.f32.mrf.mxu2  ;;  %v2586_v46 = vpop.f32.mrf.mxu3 }
 0x301   : > { %v2585_v17 = vadd.f32 %v2584_v11, %v2493_v22 }
 0x302   : > { %v2849_v2 = vpop.f32.mrf.mxu1 }
 0x303   : > { %v5546_v1 = vadd.f32 %v2847_v8, %v2585_v17 }
 0x305   : > { %v2726_v44 = vpop.f32.mrf.mxu0 }
 0x306   : > { %v5549_v24 = vadd.f32 %v2726_v44, %v5293_v50 }
 0x308   : > { %6357 = vst [vmem:[#allocation40_spill] sm:$0xff] %v5549_v24  ;;  %v2495_v5 = vpop.f32.mrf.mxu2  ;;  %v2589_v58 = vpop.f32.mrf.mxu3 }
 0x309   : > { %v2587_v43 = vadd.f32 %v2586_v46, %v2495_v5 }
 0x30a   : > { %v2852_v12 = vpop.f32.mrf.mxu1 }
 0x30b   : > { %v5551_v59 = vadd.f32 %v2849_v2, %v2587_v43 }
 0x30d   : > { %v2729_v53 = vpop.f32.mrf.mxu0 }
 0x30e   : > { %v5554_v38 = vadd.f32 %v2729_v53, %v5314_v54 }
 0x310   : > { %6358 = vst [vmem:[#allocation41_spill] sm:$0xff] %v5554_v38  ;;  %v2498_v26 = vpop.f32.mrf.mxu2  ;;  %v2591_v50 = vpop.f32.mrf.mxu3 }
 0x311   : > { %v2590_v11 = vadd.f32 %v2589_v58, %v2498_v26 }
 0x312   : > { %v2854_v46 = vpop.f32.mrf.mxu1 }
 0x313   : > { %v5556_v8 = vadd.f32 %v2852_v12, %v2590_v11 }
 0x315   : > { %v2731_v22 = vpop.f32.mrf.mxu0 }
 0x316   : > { %v5559_v17 = vadd.f32 %v2731_v22, %v5324_v42 }
 0x317   : > { %2891 = sbr.rel (%p3852_p8) target bundleno = 799 (0x31f), region = 40 }
 0x318   : > { %6359 = vst [vmem:[#allocation42_spill] sm:$0xff] %v5559_v17  ;;  %v2500_v44 = vpop.f32.mrf.mxu2 }
 0x319   : > { %v2592_v24 = vadd.f32 %v2591_v50, %v2500_v44 }
 0x31b   : > { %v5561_v2 = vadd.f32 %v2854_v46, %v2592_v24 }
 0x31c   : > { %vm2892_vm12 = vcmask 57344   ;;  %v4069_v54 = vmov 0.0  }
 0x31d   : > { %2893 = vst.msk [vmem:[%s4133_s30] sm:$0x1] %vm2892_vm12, %v4069_v54 }
 0x31e   : > { %2894 = vst.msk [vmem:[%s4143_s14] sm:$0x1] %vm2892_vm12, %v4069_v54 }
 0x31f PF: > { %v3276_v42 = vpack.c.bf16 %v5334_v7, %v5334_v7  ;;  %v3277_v5 = vpack.c.bf16 %v5344_v18, %v5344_v18  ;;  %v3280_v24 = vpack.c.bf16 %v5372_v10, %v5372_v10  ;;  %v3281_v43 = vpack.c.bf16 %v5382_v36, %v5382_v36 }
 0x320   : > { %v3278_v53 = vpack.c.bf16 %v5353_v34, %v5353_v34  ;;  %v3279_v58 = vpack.c.bf16 %v5363_v31, %v5363_v31  ;;  %v3282_v12 = vpack.c.bf16 %v5391_v19, %v5391_v19  ;;  %v3283_v26 = vpack.c.bf16 %v5401_v37, %v5401_v37 }
 0x321   : > { %v3420_v11 = vunpack.c.l.b16 %v3276_v42  ;;  %v3421_v22 = vunpack.c.l.b16 %v3277_v5  ;;  %v3424_v50 = vunpack.c.l.b16 %v3280_v24  ;;  %v3425_v44 = vunpack.c.l.b16 %v3281_v43 }
 0x322   : > { %v3422_v17 = vunpack.c.l.b16 %v3278_v53  ;;  %v3423_v38 = vunpack.c.l.b16 %v3279_v58  ;;  %v3426_v52 = vunpack.c.l.b16 %v3282_v12  ;;  %v3427_v33 = vunpack.c.l.b16 %v3283_v26 }
 0x323   : > { %v3452_v46 = vpack.c.b16 %v3421_v22, %v3420_v11  ;;  %v3454_v54 = vpack.c.b16 %v3425_v44, %v3424_v50  ;;  %v3284_v45 = vpack.c.bf16 %v5410_v32, %v5410_v32  ;;  %v3285_v41 = vpack.c.bf16 %v5420_v51, %v5420_v51 }
 0x324   : > { %v3288_v42 = vpack.c.bf16 %v5448_v48, %v5448_v48  ;;  %v3289_v5 = vpack.c.bf16 %v5460_v3, %v5460_v3  ;;  %v3453_v11 = vpack.c.b16 %v3423_v38, %v3422_v17  ;;  %v3455_v22 = vpack.c.b16 %v3427_v33, %v3426_v52 }
 0x325   : > { %3468 = vrot.lane.b32.xlu0 %v3452_v46, %s4067_s16  ;;  %3472 = vrot.lane.b32.xlu1 %v3454_v54, %s4067_s16  ;;  %v3428_v24 = vunpack.c.l.b16 %v3284_v45  ;;  %v3429_v43 = vunpack.c.l.b16 %v3285_v41  ;;  %v3290_v53 = vpack.c.bf16 %v5470_v30, %v5470_v30  ;;  %v3291_v58 = vpack.c.bf16 %v5475_v13, %v5475_v13 }
 0x326   : > { %v3286_v26 = vpack.c.bf16 %v5429_v6, %v5429_v6  ;;  %v3287_v50 = vpack.c.bf16 %v5439_v47, %v5439_v47  ;;  %v3432_v41 = vunpack.c.l.b16 %v3288_v42  ;;  %v3433_v33 = vunpack.c.l.b16 %v3289_v5 }
 0x327   : > { %v3456_v12 = vpack.c.b16 %v3429_v43, %v3428_v24  ;;  %v3434_v52 = vunpack.c.l.b16 %v3290_v53  ;;  %v3435_v38 = vunpack.c.l.b16 %v3291_v58  ;;  %v3294_v17 = vpack.c.bf16 %v5491_v63, %v5491_v63 }
 0x328   : > { %v3430_v44 = vunpack.c.l.b16 %v3286_v26  ;;  %v3431_v45 = vunpack.c.l.b16 %v3287_v50  ;;  %v3295_v46 = vpack.c.bf16 %v5497_v14, %v5497_v14  ;;  %v3292_v24 = vpack.c.bf16 %v5480_v61, %v5480_v61 }
 0x329   : > { %3476 = vrot.lane.b32.xlu2 %v3456_v12, %s4067_s16  ;;  %v3293_v43 = vpack.c.bf16 %v5486_v4, %v5486_v4  ;;  %v3459_v12 = vpack.c.b16 %v3435_v38, %v3434_v52  ;;  %v3296_v42 = vpack.c.bf16 %v5502_v25, %v5502_v25  ;;  %v3297_v5 = vpack.c.bf16 %v5508_v57, %v5508_v57 }
 0x32a   : > { %v3457_v54 = vpack.c.b16 %v3431_v45, %v3430_v44  ;;  %v3439_v53 = vunpack.c.l.b16 %v3295_v46  ;;  %v3436_v58 = vunpack.c.l.b16 %v3292_v24  ;;  %v3298_v52 = vpack.c.bf16 %v5513_v20, %v5513_v20 }
 0x32b   : > { %v3437_v26 = vunpack.c.l.b16 %v3293_v43  ;;  %v3440_v50 = vunpack.c.l.b16 %v3296_v42  ;;  %v3441_v44 = vunpack.c.l.b16 %v3297_v5  ;;  %v3299_v38 = vpack.c.bf16 %v5519_v39, %v5519_v39 }
 0x32c   : > { %v3301_v46 = vpack.c.bf16 %v5530_v35, %v5530_v35  ;;  %v3303_v24 = vpack.c.bf16 %v5541_v56, %v5541_v56  ;;  %v3442_v43 = vunpack.c.l.b16 %v3298_v52  ;;  %vm3660_vm13 = vcmask 125952  }
 0x32d   : > { %3470 = vrot.lane.b32.xlu0 %v3453_v11, %s4067_s16  ;;  %3474 = vrot.lane.b32.xlu1 %v3455_v22, %s4067_s16  ;;  %v3458_v11 = vpack.c.b16 %v3433_v33, %v3432_v41  ;;  %v3438_v22 = vunpack.c.l.b16 %v3294_v17  ;;  %v3300_v41 = vpack.c.bf16 %v5524_v16, %v5524_v16  ;;  %v3460_v33 = vpack.c.b16 %v3437_v26, %v3436_v58 }
 0x32e   : > { %v3462_v17 = vpack.c.b16 %v3441_v44, %v3440_v50  ;;  %v3445_v42 = vunpack.c.l.b16 %v3301_v46  ;;  %v3304_v58 = vpack.c.bf16 %v5546_v1, %v5546_v1  ;;  %v3305_v26 = vpack.c.bf16 %v5551_v59, %v5551_v59 }
 0x32f   : > { %v3461_v45 = vpack.c.b16 %v3439_v53, %v3438_v22  ;;  %v3447_v22 = vunpack.c.l.b16 %v3303_v24  ;;  %v3039_v24 = vmul.f32 %v5330_v0, %v5330_v0  ;;  %vm3036_vm14 = vcmask 57344  }
 0x330   : > { %v3449_v52 = vunpack.c.l.b16 %v3305_v26  ;;  %v2899_v26 = vsel %vm399_vm0, %v5349_v9, 0.0 }
 0x331   : > { %3478 = vrot.lane.b32.xlu2 %v3457_v54, %s4067_s16  ;;  %v3302_v54 = vpack.c.bf16 %v5535_v27, %v5535_v27 }
 0x333   : > { %v3446_v5 = vunpack.c.l.b16 %v3302_v54 }
 0x335   : > { %3480 = vrot.lane.b32.xlu0 %v3458_v11, %s4067_s16  ;;  %3482 = vrot.lane.b32.xlu1 %v3459_v12, %s4067_s16  ;;  %v3443_v11 = vunpack.c.l.b16 %v3299_v38  ;;  %v3444_v12 = vunpack.c.l.b16 %v3300_v41  ;;  %v3465_v44 = vpack.c.b16 %v3447_v22, %v3446_v5  ;;  %v3448_v41 = vunpack.c.l.b16 %v3304_v58 }
 0x336   : > { %v2966_v5 = vsel %vm399_vm0, %v5344_v18, 0.0  ;;  %v3041_v58 = vmul.f32 %v5349_v9, %v5349_v9 }
 0x337   : > { %v3463_v53 = vpack.c.b16 %v3443_v11, %v3442_v43  ;;  %v3464_v50 = vpack.c.b16 %v3445_v42, %v3444_v12  ;;  %v3466_v46 = vpack.c.b16 %v3449_v52, %v3448_v41  ;;  %v3040_v43 = vmul.f32 %v5339_v40, %v5339_v40 }
 0x338   : > { %v2896_v11 = vsel %vm399_vm0, %v5330_v0, 0.0  ;;  %v2897_v12 = vsel %vm399_vm0, %v5339_v40, 0.0  ;;  %v2965_v42 = vsel %vm399_vm0, %v5334_v7, 0.0  ;;  %v3042_v41 = vmul.f32 %v5358_v28, %v5358_v28 }
 0x339   : > { %3484 = vrot.lane.b32.xlu2 %v3460_v33, %s4067_s16  ;;  %v3306_v33 = vpack.c.bf16 %v5556_v8, %v5556_v8  ;;  %v2898_v22 = vadd.f32 %v2897_v12, %v2896_v11  ;;  %v3072_v52 = vsel %vm399_vm0, %v3040_v43, 0.0  ;;  %v3043_v12 = vmul.f32 %v5368_v55, %v5368_v55 }
 0x33a   : > { %v2972_v43 = vsel %vm399_vm0, %v5372_v10, 0.0 }
 0x33b   : > { %v3450_v38 = vunpack.c.l.b16 %v3306_v33  ;;  %v2900_v33 = vadd.f32 %v2899_v26, %v2898_v22  ;;  %v3076_v26 = vsel %vm399_vm0, %v3042_v41, 0.0  ;;  %v2976_v41 = vsel %vm399_vm0, %v5391_v19, 0.0 }
 0x33c   : > { %v3249_v19 = vpack.c.bf16 %v5377_v49, %v5377_v49 }
 0x33d   : > { %3486 = vrot.lane.b32.xlu0 %v3461_v45, %s4067_s16  ;;  %3488 = vrot.lane.b32.xlu1 %v3462_v17, %s4067_s16  ;;  %v3307_v45 = vpack.c.bf16 %v5561_v2, %v5561_v2 }
 0x33f   : > { %v3451_v17 = vunpack.c.l.b16 %v3307_v45 }
 0x341   : > { %3490 = vrot.lane.b32.xlu2 %v3463_v53, %s4067_s16  ;;  %v3467_v54 = vpack.c.b16 %v3451_v17, %v3450_v38  ;;  %v2967_v53 = vadd.f32 %v2966_v5, %v2965_v42  ;;  %v2901_v38 = vsel %vm399_vm0, %v5358_v28, 0.0  ;;  %v2970_v17 = vsel %vm399_vm0, %v5363_v31, 0.0 }
 0x342   : > { %v2903_v42 = vsel %vm399_vm0, %v5368_v55, 0.0 }
 0x345   : > { %3492 = vrot.lane.b32.xlu0 %v3464_v50, %s4067_s16  ;;  %3494 = vrot.lane.b32.xlu1 %v3465_v44, %s4067_s16  ;;  %v2968_v50 = vsel %vm399_vm0, %v5353_v34, 0.0  ;;  %v3071_v44 = vsel %vm399_vm0, %v3039_v24, 0.0  ;;  %v3074_v24 = vsel %vm399_vm0, %v3041_v58, 0.0  ;;  %v3044_v58 = vmul.f32 %v5377_v49, %v5377_v49 }
 0x346   : > { %v2969_v45 = vadd.f32 %v2968_v50, %v2967_v53  ;;  %v2905_v50 = vsel %vm399_vm0, %v5377_v49, 0.0 }
 0x348   : > { %v2971_v11 = vadd.f32 %v2970_v17, %v2969_v45  ;;  %v2907_v17 = vsel %vm399_vm0, %v5387_v29, 0.0 }
 0x349   : > { %3496 = vrot.lane.b32.xlu2 %v3466_v46, %s4067_s16  ;;  %v3073_v46 = vadd.f32 %v3072_v52, %v3071_v44  ;;  %v2974_v44 = vsel %vm399_vm0, %v5382_v36, 0.0 }
 0x34a   : > { %v2973_v53 = vadd.f32 %v2972_v43, %v2971_v11  ;;  %v3045_v43 = vmul.f32 %v5387_v29, %v5387_v29 }
 0x34b   : > { %v3075_v5 = vadd.f32 %v3074_v24, %v3073_v46  ;;  %v2909_v24 = vsel %vm399_vm0, %v5396_v62, 0.0 }
 0x34c   : > { %v2975_v52 = vadd.f32 %v2974_v44, %v2973_v53  ;;  %v2911_v53 = vsel %vm399_vm0, %v5406_v21, 0.0 }
 0x34d   : > { %3498 = vrot.lane.b32.xlu0 %v3467_v54, %s4067_s16  ;;  %v2902_v54 = vadd.f32 %v2901_v38, %v2900_v33  ;;  %v3077_v33 = vadd.f32 %v3076_v26, %v3075_v5  ;;  %v3078_v38 = vsel %vm399_vm0, %v3043_v12, 0.0  ;;  %v3080_v12 = vsel %vm399_vm0, %v3044_v58, 0.0 }
 0x34e   : > { %v2980_v26 = vsel %vm399_vm0, %v5410_v32, 0.0  ;;  %v3046_v58 = vmul.f32 %v5396_v62, %v5396_v62 }
 0x34f   : > { %v2904_v22 = vadd.f32 %v2903_v42, %v2902_v54  ;;  %v2977_v54 = vadd.f32 %v2976_v41, %v2975_v52  ;;  %v3079_v11 = vadd.f32 %v3078_v38, %v3077_v33  ;;  %v2978_v42 = vsel %vm399_vm0, %v5401_v37, 0.0 }
 0x350   : > { %v2982_v52 = vsel %vm399_vm0, %v5420_v51, 0.0  ;;  %v3082_v38 = vsel %vm399_vm0, %v3045_v43, 0.0  ;;  %v3047_v43 = vmul.f32 %v5406_v21, %v5406_v21 }
 0x351   : > { %v2906_v45 = vadd.f32 %v2905_v50, %v2904_v22  ;;  %v2979_v22 = vadd.f32 %v2978_v42, %v2977_v54  ;;  %v3081_v33 = vadd.f32 %v3080_v12, %v3079_v11  ;;  %v2984_v54 = vsel %vm399_vm0, %v5429_v6, 0.0 }
 0x352   : > { %v2917_v12 = vsel %vm399_vm0, %v5434_v60, 0.0 }
 0x353   : > { %v2908_v46 = vadd.f32 %v2907_v17, %v2906_v45  ;;  %v2981_v44 = vadd.f32 %v2980_v26, %v2979_v22  ;;  %v2913_v45 = vsel %vm399_vm0, %v5415_v23, 0.0  ;;  %v3083_v42 = vadd.f32 %v3082_v38, %v3081_v33 }
 0x354   : > { %v3084_v22 = vsel %vm399_vm0, %v3046_v58, 0.0  ;;  %v3048_v58 = vmul.f32 %v5415_v23, %v5415_v23 }
 0x355   : > { %v2910_v5 = vadd.f32 %v2909_v24, %v2908_v46  ;;  %v2983_v41 = vadd.f32 %v2982_v52, %v2981_v44  ;;  %v2915_v46 = vsel %vm399_vm0, %v5425_v15, 0.0  ;;  %v3085_v38 = vadd.f32 %v3084_v22, %v3083_v42 }
 0x356   : > { %v2992_v42 = vsel %vm399_vm0, %v5470_v30, 0.0 }
 0x357   : > { %v2912_v50 = vadd.f32 %v2911_v53, %v2910_v5  ;;  %v2985_v24 = vadd.f32 %v2984_v54, %v2983_v41  ;;  %v2986_v5 = vsel %vm399_vm0, %v5439_v47, 0.0  ;;  %v3086_v54 = vsel %vm399_vm0, %v3047_v43, 0.0  ;;  %v6364_v43 = vld [vmem:[#allocation33_spill] sm:$0xff] }
 0x358   : > { %v3087_v22 = vadd.f32 %v3086_v54, %v3085_v38  ;;  %v3050_v54 = vmul.f32 %v5434_v60, %v5434_v60 }
 0x359   : > { %v2914_v17 = vadd.f32 %v2913_v45, %v2912_v50  ;;  %v2987_v26 = vadd.f32 %v2986_v5, %v2985_v24  ;;  %v6360_v50 = vld [vmem:[#allocation25_spill] sm:$0xff]  ;;  %v2988_v45 = vsel %vm399_vm0, %v5448_v48, 0.0 }
 0x35a   : > { %v2919_v44 = vsel %vm399_vm0, %v6360_v50, 0.0  ;;  %v6362_v24 = vld [vmem:[#allocation29_spill] sm:$0xff] }
 0x35b   : > { %v2916_v11 = vadd.f32 %v2915_v46, %v2914_v17  ;;  %v2989_v52 = vadd.f32 %v2988_v45, %v2987_v26  ;;  %v6361_v17 = vld [vmem:[#allocation27_spill] sm:$0xff]  ;;  %v2990_v46 = vsel %vm399_vm0, %v5460_v3, 0.0  ;;  %v3088_v45 = vsel %vm399_vm0, %v3048_v58, 0.0 }
 0x35c   : > { %v2921_v41 = vsel %vm399_vm0, %v6361_v17, 0.0  ;;  %v6366_v58 = vld [vmem:[#allocation3_spill] sm:$0xff] }
 0x35d   : > { %v2918_v53 = vadd.f32 %v2917_v12, %v2916_v11  ;;  %v2923_v12 = vsel %vm399_vm0, %v6362_v24, 0.0  ;;  %v2991_v5 = vadd.f32 %v2990_v46, %v2989_v52  ;;  %v2994_v52 = vsel %vm399_vm0, %v5475_v13, 0.0 }
 0x35e   : > { %v3089_v46 = vadd.f32 %v3088_v45, %v3087_v22  ;;  %v3253_v22 = vpack.c.bf16 %v5415_v23, %v5415_v23  ;;  %v3051_v45 = vmul.f32 %v6360_v50, %v6360_v50 }
 0x35f   : > { %v2920_v33 = vadd.f32 %v2919_v44, %v2918_v53  ;;  %v6363_v53 = vld [vmem:[#allocation31_spill] sm:$0xff]  ;;  %v3049_v44 = vmul.f32 %v5425_v15, %v5425_v15 }
 0x360   : > { %v2925_v26 = vsel %vm399_vm0, %v6363_v53, 0.0  ;;  %v3094_v13 = vsel %vm399_vm0, %v3051_v45, 0.0  ;;  %v3254_v45 = vpack.c.bf16 %v5425_v15, %v5425_v15 }
 0x361   : > { %v2922_v11 = vadd.f32 %v2921_v41, %v2920_v33  ;;  %v2927_v33 = vsel %vm399_vm0, %v6364_v43, 0.0  ;;  %v2993_v41 = vadd.f32 %v2992_v42, %v2991_v5  ;;  %v3252_v42 = vpack.c.bf16 %v5406_v21, %v5406_v21 }
 0x362   : > { %v2998_v21 = vsel %vm399_vm0, %v5486_v4, 0.0 }
 0x363   : > { %v2924_v48 = vadd.f32 %v2923_v12, %v2922_v11  ;;  %v6365_v11 = vld [vmem:[#allocation15_spill] sm:$0xff]  ;;  %v3090_v12 = vsel %vm399_vm0, %v3049_v44, 0.0  ;;  %v6367_v44 = vld [vmem:[#allocation18_spill] sm:$0xff] }
 0x364   : > { %v2929_v38 = vsel %vm399_vm0, %v6365_v11, 0.0  ;;  %v3091_v5 = vadd.f32 %v3090_v12, %v3089_v46  ;;  %v6368_v46 = vld [vmem:[#allocation7_spill] sm:$0xff]  ;;  %v3348_v12 = vunpack.c.l.b16 %v3252_v42  ;;  %v3261_v49 = vpack.c.bf16 %v6365_v11, %v6365_v11 }
 0x365   : > { %v2926_v3 = vadd.f32 %v2925_v26, %v2924_v48  ;;  %v2931_v48 = vsel %vm399_vm0, %v6366_v58, 0.0  ;;  %v2995_v26 = vadd.f32 %v2994_v52, %v2993_v41 }
 0x367   : > { %v2928_v47 = vadd.f32 %v2927_v33, %v2926_v3  ;;  %v2996_v3 = vsel %vm399_vm0, %v5480_v61, 0.0  ;;  %v2933_v33 = vsel %vm399_vm0, %v6367_v44, 0.0  ;;  %v6369_v61 = vld [vmem:[#allocation9_spill] sm:$0xff] }
 0x368   : > { %v2997_v41 = vadd.f32 %v2996_v3, %v2995_v26  ;;  %v3244_v26 = vpack.c.bf16 %v5330_v0, %v5330_v0  ;;  %v6370_v3 = vld [vmem:[#allocation13_spill] sm:$0xff]  ;;  %v3255_v0 = vpack.c.bf16 %v5434_v60, %v5434_v60  ;;  %v5799_v60 = vmul.f32 %v6364_v43, %v6364_v43 }
 0x369   : > { %v2930_v30 = vadd.f32 %v2929_v38, %v2928_v47  ;;  %v3092_v47 = vsel %vm399_vm0, %v3050_v54, 0.0  ;;  %v2935_v38 = vsel %vm399_vm0, %v6368_v46, 0.0  ;;  %v2937_v54 = vsel %vm399_vm0, %v6369_v61, 0.0 }
 0x36a   : > { %v3093_v23 = vadd.f32 %v3092_v47, %v3091_v5  ;;  %v2999_v32 = vadd.f32 %v2998_v21, %v2997_v41  ;;  %v3000_v5 = vsel %vm399_vm0, %v5491_v63, 0.0  ;;  %v5793_v41 = vunpack.c.l.b16 %v3244_v26 }
 0x36b   : > { %v2932_v6 = vadd.f32 %v2931_v48, %v2930_v30  ;;  %v3052_v30 = vmul.f32 %v6361_v17, %v6361_v17  ;;  %v3349_v48 = vunpack.c.l.b16 %v3253_v22  ;;  %v3350_v26 = vunpack.c.l.b16 %v3254_v45 }
 0x36c   : > { %v3095_v42 = vadd.f32 %v3094_v13, %v3093_v23  ;;  %v5791_v13 = vmul.f32 %v6363_v53, %v6363_v53  ;;  %v3001_v15 = vadd.f32 %v3000_v5, %v2999_v32  ;;  %v6372_v23 = vld [vmem:[#allocation10_spill] sm:$0xff]  ;;  %v3351_v63 = vunpack.c.l.b16 %v3255_v0 }
 0x36d   : > { %v2934_v52 = vadd.f32 %v2933_v33, %v2932_v6  ;;  %v3245_v6 = vpack.c.bf16 %v5339_v40, %v5339_v40  ;;  %v2939_v33 = vsel %vm399_vm0, %v6370_v3, 0.0  ;;  %v3376_v22 = vpack.c.b16 %v3349_v48, %v3348_v12 }
 0x36e   : > { %v3096_v47 = vsel %vm399_vm0, %v3052_v30, 0.0  ;;  %v2943_v12 = vsel %vm399_vm0, %v6372_v23, 0.0  ;;  %v3002_v48 = vsel %vm399_vm0, %v5497_v14, 0.0  ;;  %v3377_v14 = vpack.c.b16 %v3351_v63, %v3350_v26 }
 0x36f   : > { %v2936_v51 = vadd.f32 %v2935_v38, %v2934_v52  ;;  %v6371_v52 = vld [vmem:[#allocation8_spill] sm:$0xff]  ;;  %v5795_v21 = vunpack.c.l.b16 %v3245_v6  ;;  %v3003_v45 = vadd.f32 %v3002_v48, %v3001_v15  ;;  %v3251_v15 = vpack.c.bf16 %v5396_v62, %v5396_v62 }
 0x370   : > { %v2941_v38 = vsel %vm399_vm0, %v6371_v52, 0.0  ;;  %v6373_v6 = vld [vmem:[#allocation16_spill] sm:$0xff]  ;;  %v3006_v26 = vsel %vm399_vm0, %v5508_v57, 0.0 }
 0x371   : > { %v2938_v4 = vadd.f32 %v2937_v54, %v2936_v51  ;;  %v3053_v51 = vmul.f32 %v6362_v24, %v6362_v24  ;;  %v3097_v54 = vadd.f32 %v3096_v47, %v3095_v42  ;;  %v2945_v32 = vsel %vm399_vm0, %v6373_v6, 0.0 }
 0x372   : > { %v3246_v42 = vpack.c.bf16 %v5349_v9, %v5349_v9 }
 0x373   : > { %v2940_v40 = vadd.f32 %v2939_v33, %v2938_v4  ;;  %v3098_v63 = vsel %vm399_vm0, %v3053_v51, 0.0 }
 0x375   : > { %v2942_v30 = vadd.f32 %v2941_v38, %v2940_v40  ;;  %v3248_v40 = vpack.c.bf16 %v5368_v55, %v5368_v55  ;;  %v3260_v55 = vpack.c.bf16 %v6364_v43, %v6364_v43  ;;  %v3345_v43 = vunpack.c.l.b16 %v3249_v19 }
 0x376   : > { %v3357_v19 = vunpack.c.l.b16 %v3261_v49 }
 0x377   : > { %v2944_v38 = vadd.f32 %v2943_v12, %v2942_v30  ;;  %v6374_v30 = vld [vmem:[#allocation12_spill] sm:$0xff]  ;;  %v5833_v12 = vunpack.c.l.b16 %v3246_v42  ;;  %v6375_v42 = vld [vmem:[#allocation17_spill] sm:$0xff] }
 0x378   : > { %v2947_v9 = vsel %vm399_vm0, %v6374_v30, 0.0 }
 0x383   : > { %v3477_v4 = vpop.permute.xlu2 %3476 }
 0x384   : > { %v3514_v33 = vsel %vm399_vm0, %v3376_v22, %v3477_v4  ;;  %v3247_v22 = vpack.c.bf16 %v5358_v28, %v5358_v28  ;;  %v2946_v4 = vadd.f32 %v2945_v32, %v2944_v38  ;;  %v3344_v28 = vunpack.c.l.b16 %v3248_v40 }
 0x385   : > { %v3572_v5 = vunpack.c.l.b16 %v3514_v33  ;;  %v3573_v37 = vunpack.c.h.b16 %v3514_v33  ;;  %v3004_v33 = vsel %vm399_vm0, %v5502_v25, 0.0  ;;  %v3356_v38 = vunpack.c.l.b16 %v3260_v55 }
 0x386   : > { %v5835_v48 = vunpack.c.l.b16 %v3247_v22  ;;  %v2948_v62 = vadd.f32 %v2947_v9, %v2946_v4  ;;  %v3005_v40 = vadd.f32 %v3004_v33, %v3003_v45  ;;  %v2949_v22 = vsel %vm399_vm0, %v6375_v42, 0.0 }
 0x387   : > { %v3604_v0 = vpack.c.b16 %v3572_v5, %v3572_v5  ;;  %v3605_v47 = vpack.c.b16 %v3573_v37, %v3573_v37  ;;  %v3250_v37 = vpack.c.bf16 %v5387_v29, %v5387_v29  ;;  %v3256_v5 = vpack.c.bf16 %v6360_v50, %v6360_v50 }
 0x388   : > { %v3257_v29 = vpack.c.bf16 %v6361_v17, %v6361_v17  ;;  %v5848_v25 = vunpack.c.l.b16 %v3251_v15  ;;  %v3372_v50 = vpack.c.b16 %v5795_v21, %v5793_v41  ;;  %v3374_v17 = vpack.c.b16 %v3345_v43, %v3344_v28 }
 0x389   : > { %3669 = vst.msk [vmem:[%s4151_s24 + $0x20] sm:$0xf] %vm3660_vm13, %v3604_v0  ;;  %v5846_v57 = vunpack.c.l.b16 %v3250_v37  ;;  %v5854_v45 = vadd.f32 %v3098_v63, %v3097_v54  ;;  %v2950_v55 = vadd.f32 %v2949_v22, %v2948_v62  ;;  %v3007_v49 = vadd.f32 %v3006_v26, %v3005_v40 }
 0x38a   : > { %3670 = vst.msk [vmem:[%s4151_s24 + $0x24] sm:$0xf] %vm3660_vm13, %v3605_v47  ;;  %v3380_v9 = vpack.c.b16 %v3357_v19, %v3356_v38  ;;  %v3266_v37 = vpack.c.bf16 %v6370_v3, %v6370_v3  ;;  %v3267_v15 = vpack.c.bf16 %v6371_v52, %v6371_v52  ;;  %v3373_v21 = vpack.c.b16 %v5835_v48, %v5833_v12  ;;  %v6377_v19 = vld [vmem:[#allocation40_spill] sm:$0xff] }
 0x38b   : > { %v3479_v32 = vpop.permute.xlu2 %3478  ;;  %v3375_v54 = vpack.c.b16 %v5848_v25, %v5846_v57  ;;  %v5868_v28 = vunpack.c.l.b16 %v3256_v5  ;;  %v5870_v63 = vunpack.c.l.b16 %v3257_v29  ;;  %v3258_v43 = vpack.c.bf16 %v6362_v24, %v6362_v24 }
 0x38c   : > { %v3517_v51 = vsel %vm399_vm0, %v3377_v14, %v3479_v32  ;;  %v3008_v14 = vsel %vm399_vm0, %v5513_v20, 0.0  ;;  %v6376_v32 = vld [vmem:[#allocation14_spill] sm:$0xff]  ;;  %v3259_v26 = vpack.c.bf16 %v6363_v53, %v6363_v53  ;;  %v3010_v12 = vsel %vm399_vm0, %v5519_v39, 0.0 }
 0x38d   : > { %v3574_v0 = vunpack.c.l.b16 %v3517_v51  ;;  %v3575_v47 = vunpack.c.h.b16 %v3517_v51  ;;  %v2951_v41 = vsel %vm399_vm0, %v6376_v32, 0.0  ;;  %v3012_v48 = vsel %vm399_vm0, %v5524_v16, 0.0 }
 0x38e   : > { %v3262_v25 = vpack.c.bf16 %v6366_v58, %v6366_v58  ;;  %v3263_v57 = vpack.c.bf16 %v6367_v44, %v6367_v44  ;;  %v2952_v5 = vadd.f32 %v2951_v41, %v2950_v55  ;;  %v3009_v29 = vadd.f32 %v3008_v14, %v3007_v49 }
 0x38f   : > { %v3606_v4 = vpack.c.b16 %v3574_v0, %v3574_v0  ;;  %v3607_v33 = vpack.c.b16 %v3575_v47, %v3575_v47  ;;  %v3362_v53 = vunpack.c.l.b16 %v3266_v37  ;;  %v3363_v38 = vunpack.c.l.b16 %v3267_v15 }
 0x390   : > { %v2953_v22 = vsel %vm399_vm0, %v6377_v19, 0.0  ;;  %v3011_v15 = vadd.f32 %v3010_v12, %v3009_v29  ;;  %v5903_v29 = vunpack.c.l.b16 %v3262_v25 }
 0x391   : > { %3671 = vst.msk [vmem:[%s4151_s24 + $0x28] sm:$0xf] %vm3660_vm13, %v3606_v4  ;;  %v2954_v41 = vadd.f32 %v2953_v22, %v2952_v5  ;;  %v3014_v5 = vsel %vm399_vm0, %v5530_v35, 0.0 }
 0x392   : > { %3672 = vst.msk [vmem:[%s4151_s24 + $0x2c] sm:$0xf] %vm3660_vm13, %v3607_v33 }
 0x393   : > { %v3485_v62 = vpop.permute.xlu2 %3484 }
 0x394   : > { %v3526_v51 = vsel %vm399_vm0, %v3380_v9, %v3485_v62  ;;  %v6378_v9 = vld [vmem:[#allocation41_spill] sm:$0xff] }
 0x395   : > { %v3580_v4 = vunpack.c.l.b16 %v3526_v51  ;;  %v3581_v33 = vunpack.c.h.b16 %v3526_v51  ;;  %v2955_v37 = vsel %vm399_vm0, %v6378_v9, 0.0  ;;  %v3273_v51 = vpack.c.bf16 %v6377_v19, %v6377_v19 }
 0x396   : > { %v2956_v22 = vadd.f32 %v2955_v37, %v2954_v41 }
 0x397   : > { %v3469_v40 = vpop.permute.xlu0 %3468  ;;  %v3473_v24 = vpop.permute.xlu1 %3472  ;;  %v3612_v49 = vpack.c.b16 %v3580_v4, %v3580_v4  ;;  %v3613_v12 = vpack.c.b16 %v3581_v33, %v3581_v33  ;;  %v3016_v4 = vsel %vm399_vm0, %v5535_v27, 0.0 }
 0x398   : > { %v3502_v0 = vsel %vm399_vm0, %v3372_v50, %v3469_v40  ;;  %v3508_v47 = vsel %vm399_vm0, %v3374_v17, %v3473_v24  ;;  %v3383_v40 = vpack.c.b16 %v3363_v38, %v3362_v53  ;;  %v3272_v24 = vpack.c.bf16 %v6376_v32, %v6376_v32 }
 0x399   : > { %v3564_v16 = vunpack.c.l.b16 %v3502_v0  ;;  %v3565_v39 = vunpack.c.h.b16 %v3502_v0  ;;  %v3568_v14 = vunpack.c.l.b16 %v3508_v47  ;;  %v3569_v55 = vunpack.c.h.b16 %v3508_v47  ;;  %3677 = vst.msk [vmem:[%s4151_s24 + $0x40] sm:$0xf] %vm3660_vm13, %v3612_v49  ;;  %v6379_v0 = vld [vmem:[#allocation42_spill] sm:$0xff] }
 0x39a   : > { %v5907_v53 = vunpack.c.l.b16 %v3263_v57  ;;  %v2957_v47 = vsel %vm399_vm0, %v6379_v0, 0.0  ;;  %v3368_v25 = vunpack.c.l.b16 %v3272_v24  ;;  %3678 = vst.msk [vmem:[%s4151_s24 + $0x44] sm:$0xf] %vm3660_vm13, %v3613_v12 }
 0x39b   : > { %v3596_v62 = vpack.c.b16 %v3564_v16, %v3564_v16  ;;  %v3597_v20 = vpack.c.b16 %v3565_v39, %v3565_v39  ;;  %v3600_v50 = vpack.c.b16 %v3568_v14, %v3568_v14  ;;  %v3601_v17 = vpack.c.b16 %v3569_v55, %v3569_v55  ;;  %v3491_v38 = vpop.permute.xlu2 %3490 }
 0x39c   : > { %v3354_v16 = vunpack.c.l.b16 %v3258_v43  ;;  %v3355_v39 = vunpack.c.l.b16 %v3259_v26  ;;  %v3535_v26 = vsel %vm399_vm0, %v3383_v40, %v3491_v38  ;;  %v3369_v14 = vunpack.c.l.b16 %v3273_v51 }
 0x39d   : > { %3661 = vst.msk [vmem:[%s4151_s24] sm:$0xf] %vm3660_vm13, %v3596_v62  ;;  %v3586_v49 = vunpack.c.l.b16 %v3535_v26  ;;  %v3587_v41 = vunpack.c.h.b16 %v3535_v26  ;;  %v3381_v26 = vpack.c.b16 %v5907_v53, %v5903_v29 }
 0x39e   : > { %3662 = vst.msk [vmem:[%s4151_s24 + $0x4] sm:$0xf] %vm3660_vm13, %v3597_v20  ;;  %v3013_v20 = vadd.f32 %v3012_v48, %v3011_v15  ;;  %v3264_v48 = vpack.c.bf16 %v6368_v46, %v6368_v46  ;;  %v3265_v15 = vpack.c.bf16 %v6369_v61, %v6369_v61  ;;  %v3386_v51 = vpack.c.b16 %v3369_v14, %v3368_v25 }
 0x39f   : > { %3665 = vst.msk [vmem:[%s4151_s24 + $0x10] sm:$0xf] %vm3660_vm13, %v3600_v50  ;;  %v3471_v43 = vpop.permute.xlu0 %3470  ;;  %v3475_v33 = vpop.permute.xlu1 %3474  ;;  %v3618_v40 = vpack.c.b16 %v3586_v49, %v3586_v49 }
 0x3a0   : > { %3666 = vst.msk [vmem:[%s4151_s24 + $0x14] sm:$0xf] %vm3660_vm13, %v3601_v17  ;;  %v3505_v57 = vsel %vm399_vm0, %v3373_v21, %v3471_v43  ;;  %v3511_v55 = vsel %vm399_vm0, %v3375_v54, %v3475_v33  ;;  %v2958_v21 = vadd.f32 %v2957_v47, %v2956_v22  ;;  %v3378_v43 = vpack.c.b16 %v5870_v63, %v5868_v28 }
 0x3a1   : > { %v3566_v37 = vunpack.c.l.b16 %v3505_v57  ;;  %v3567_v62 = vunpack.c.h.b16 %v3505_v57  ;;  %v3570_v50 = vunpack.c.l.b16 %v3511_v55  ;;  %v3571_v27 = vunpack.c.h.b16 %v3511_v55  ;;  %3683 = vst.msk [vmem:[%s4151_s24 + $0x58] sm:$0xf] %vm3660_vm13, %v3618_v40 }
 0x3a2   : > { %v3379_v33 = vpack.c.b16 %v3355_v39, %v3354_v16  ;;  %v3015_v12 = vadd.f32 %v3014_v5, %v3013_v20  ;;  %v3619_v57 = vpack.c.b16 %v3587_v41, %v3587_v41  ;;  %v3018_v22 = vsel %vm399_vm0, %v5541_v56, 0.0 }
 0x3a3   : > { %v3598_v54 = vpack.c.b16 %v3566_v37, %v3566_v37  ;;  %v3599_v17 = vpack.c.b16 %v3567_v62, %v3567_v62  ;;  %v3602_v24 = vpack.c.b16 %v3570_v50, %v3570_v50  ;;  %v3603_v38 = vpack.c.b16 %v3571_v27, %v3571_v27  ;;  %v3497_v5 = vpop.permute.xlu2 %3496 }
 0x3a4   : > { %v3100_v27 = vsel %vm399_vm0, %v5791_v13, 0.0  ;;  %v3268_v28 = vpack.c.bf16 %v6372_v23, %v6372_v23  ;;  %v3269_v63 = vpack.c.bf16 %v6373_v6, %v6373_v6  ;;  %v3017_v16 = vadd.f32 %v3016_v4, %v3015_v12  ;;  %3684 = vst.msk [vmem:[%s4151_s24 + $0x5c] sm:$0xf] %vm3660_vm13, %v3619_v57 }
 0x3a5   : > { %3663 = vst.msk [vmem:[%s4151_s24 + $0x8] sm:$0xf] %vm3660_vm13, %v3598_v54  ;;  %v3020_v39 = vsel %vm399_vm0, %v5546_v1, 0.0  ;;  %v3360_v47 = vunpack.c.l.b16 %v3264_v48  ;;  %v3361_v13 = vunpack.c.l.b16 %v3265_v15  ;;  %v3544_v25 = vsel %vm399_vm0, %v3386_v51, %v3497_v5 }
 0x3a6   : > { %3664 = vst.msk [vmem:[%s4151_s24 + $0xc] sm:$0xf] %vm3660_vm13, %v3599_v17  ;;  %v2959_v14 = vrot.slane %v2958_v21, 4  ;;  %v3592_v4 = vunpack.c.l.b16 %v3544_v25  ;;  %v3593_v49 = vunpack.c.h.b16 %v3544_v25  ;;  %v3270_v48 = vpack.c.bf16 %v6374_v30, %v6374_v30 }
 0x3a7   : > { %3667 = vst.msk [vmem:[%s4151_s24 + $0x18] sm:$0xf] %vm3660_vm13, %v3602_v24  ;;  %v3481_v29 = vpop.permute.xlu0 %3480  ;;  %v3483_v53 = vpop.permute.xlu1 %3482  ;;  %v3019_v15 = vadd.f32 %v3018_v22, %v3017_v16  ;;  %v3022_v54 = vsel %vm399_vm0, %v5551_v59, 0.0  ;;  %v3271_v12 = vpack.c.bf16 %v6375_v42, %v6375_v42  ;;  %v3024_v5 = vsel %vm399_vm0, %v5556_v8, 0.0 }
 0x3a8   : > { %3668 = vst.msk [vmem:[%s4151_s24 + $0x1c] sm:$0xf] %vm3660_vm13, %v3603_v38  ;;  %v3520_v20 = vsel %vm399_vm0, %v3378_v43, %v3481_v29  ;;  %v3523_v55 = vsel %vm399_vm0, %v3379_v33, %v3483_v53  ;;  %v3624_v40 = vpack.c.b16 %v3592_v4, %v3592_v4  ;;  %v2960_v38 = vadd.f32 %v2959_v14, %v2958_v21 }
 0x3a9   : > { %v3576_v41 = vunpack.c.l.b16 %v3520_v20  ;;  %v3577_v37 = vunpack.c.h.b16 %v3520_v20  ;;  %v3578_v62 = vunpack.c.l.b16 %v3523_v55  ;;  %v3579_v50 = vunpack.c.h.b16 %v3523_v55 }
 0x3aa   : > { %v3382_v33 = vpack.c.b16 %v3361_v13, %v3360_v47  ;;  %3689 = vst.msk [vmem:[%s4151_s24 + $0x70] sm:$0xf] %vm3660_vm13, %v3624_v40  ;;  %v3021_v57 = vadd.f32 %v3020_v39, %v3019_v15  ;;  %v3625_v22 = vpack.c.b16 %v3593_v49, %v3593_v49  ;;  %v3056_v16 = vmul.f32 %v6365_v11, %v6365_v11 }
 0x3ab   : > { %v3608_v17 = vpack.c.b16 %v3576_v41, %v3576_v41  ;;  %v3609_v24 = vpack.c.b16 %v3577_v37, %v3577_v37  ;;  %v3610_v51 = vpack.c.b16 %v3578_v62, %v3578_v62  ;;  %v3611_v43 = vpack.c.b16 %v3579_v50, %v3579_v50 }
 0x3ac   : > { %v3364_v21 = vunpack.c.l.b16 %v3268_v28  ;;  %v3365_v29 = vunpack.c.l.b16 %v3269_v63  ;;  %v3023_v53 = vadd.f32 %v3022_v54, %v3021_v57  ;;  %v3102_v47 = vsel %vm399_vm0, %v5799_v60, 0.0  ;;  %3690 = vst.msk [vmem:[%s4151_s24 + $0x74] sm:$0xf] %vm3660_vm13, %v3625_v22 }
 0x3ad   : > { %3673 = vst.msk [vmem:[%s4151_s24 + $0x30] sm:$0xf] %vm3660_vm13, %v3608_v17  ;;  %v3366_v25 = vunpack.c.l.b16 %v3270_v48  ;;  %v2961_v14 = vrot.slane %v2960_v38, 2  ;;  %v3026_v20 = vsel %vm399_vm0, %v5561_v2, 0.0  ;;  %v3101_v11 = vadd.f32 %v3100_v27, %v5854_v45 }
 0x3ae   : > { %3674 = vst.msk [vmem:[%s4151_s24 + $0x34] sm:$0xf] %vm3660_vm13, %v3609_v24  ;;  %v3367_v55 = vunpack.c.l.b16 %v3271_v12  ;;  %v3025_v60 = vadd.f32 %v3024_v5, %v3023_v53  ;;  %v3384_v62 = vpack.c.b16 %v3365_v29, %v3364_v21  ;;  %v3274_v45 = vpack.c.bf16 %v6378_v9, %v6378_v9 }
 0x3af   : > { %3675 = vst.msk [vmem:[%s4151_s24 + $0x38] sm:$0xf] %vm3660_vm13, %v3610_v51  ;;  %v3487_v39 = vpop.permute.xlu0 %3486  ;;  %v3489_v13 = vpop.permute.xlu1 %3488  ;;  %v2962_v15 = vadd.f32 %v2961_v14, %v2960_v38  ;;  %v3103_v51 = vadd.f32 %v3102_v47, %v3101_v11  ;;  %v3057_v12 = vmul.f32 %v6366_v58, %v6366_v58 }
 0x3b0   : > { %3676 = vst.msk [vmem:[%s4151_s24 + $0x3c] sm:$0xf] %vm3660_vm13, %v3611_v43  ;;  %v3529_v28 = vsel %vm399_vm0, %v3381_v26, %v3487_v39  ;;  %v3532_v63 = vsel %vm399_vm0, %v3382_v33, %v3489_v13  ;;  %v3275_v26 = vpack.c.bf16 %v6379_v0, %v6379_v0  ;;  %v3027_v27 = vadd.f32 %v3026_v20, %v3025_v60 }
 0x3b1   : > { %v3582_v4 = vunpack.c.l.b16 %v3529_v28  ;;  %v3583_v49 = vunpack.c.h.b16 %v3529_v28  ;;  %v3584_v41 = vunpack.c.l.b16 %v3532_v63  ;;  %v3585_v37 = vunpack.c.h.b16 %v3532_v63 }
 0x3b2   : > { %v3385_v17 = vpack.c.b16 %v3367_v55, %v3366_v25  ;;  %v3028_v24 = vrot.slane %v3027_v27, 4  ;;  %v3104_v43 = vsel %vm399_vm0, %v3056_v16, 0.0  ;;  %v3370_v38 = vunpack.c.l.b16 %v3274_v45 }
 0x3b3   : > { %v3614_v50 = vpack.c.b16 %v3582_v4, %v3582_v4  ;;  %v3615_v40 = vpack.c.b16 %v3583_v49, %v3583_v49  ;;  %v3616_v48 = vpack.c.b16 %v3584_v41, %v3584_v41  ;;  %v3617_v54 = vpack.c.b16 %v3585_v37, %v3585_v37 }
 0x3b4   : > { %v3029_v33 = vadd.f32 %v3028_v24, %v3027_v27  ;;  %v3371_v5 = vunpack.c.l.b16 %v3275_v26  ;;  %v2963_v21 = vrot.slane %v2962_v15, 1  ;;  %v3105_v47 = vadd.f32 %v3104_v43, %v3103_v51 }
 0x3b5   : > { %3679 = vst.msk [vmem:[%s4151_s24 + $0x48] sm:$0xf] %vm3660_vm13, %v3614_v50  ;;  %v3058_v20 = vmul.f32 %v6367_v44, %v6367_v44  ;;  %v3106_v11 = vsel %vm399_vm0, %v3057_v12, 0.0  ;;  %v3059_v45 = vmul.f32 %v6368_v46, %v6368_v46  ;;  %v3141_v27 = vmul.f32 %v5344_v18, %v5344_v18 }
 0x3b6   : > { %3680 = vst.msk [vmem:[%s4151_s24 + $0x4c] sm:$0xf] %vm3660_vm13, %v3615_v40  ;;  %v3030_v16 = vrot.slane %v3029_v33, 2  ;;  %v3387_v4 = vpack.c.b16 %v3371_v5, %v3370_v38  ;;  %v2964_v49 = vadd.f32 %v2963_v21, %v2962_v15  ;;  %v3107_v37 = vadd.f32 %v3106_v11, %v3105_v47  ;;  %v2895_v40 = vld [vmem:[%s4133_s30] sm:$0x1] }
 0x3b7   : > { %3681 = vst.msk [vmem:[%s4151_s24 + $0x50] sm:$0xf] %vm3660_vm13, %v3616_v48  ;;  %v3493_v57 = vpop.permute.xlu0 %3492  ;;  %v3495_v22 = vpop.permute.xlu1 %3494  ;;  %v3108_v26 = vsel %vm399_vm0, %v3058_v20, 0.0  ;;  %v3142_v48 = vmul.f32 %v5353_v34, %v5353_v34  ;;  %v3144_v18 = vmul.f32 %v5372_v10, %v5372_v10  ;;  %v3145_v10 = vmul.f32 %v5382_v36, %v5382_v36  ;;  %v6381_v36 = vld [vmem:[#allocation20_spill] sm:$0xff] }
 0x3b8   : > { %3682 = vst.msk [vmem:[%s4151_s24 + $0x54] sm:$0xf] %vm3660_vm13, %v3617_v54  ;;  %v3538_v29 = vsel %vm399_vm0, %v3384_v62, %v3493_v57  ;;  %v3541_v53 = vsel %vm399_vm0, %v3385_v17, %v3495_v22  ;;  %v3031_v14 = vadd.f32 %v3030_v16, %v3029_v33  ;;  %v3140_v62 = vmul.f32 %v5334_v7, %v5334_v7  ;;  %v6380_v16 = vld [vmem:[#allocation19_spill] sm:$0xff] }
 0x3b9   : > { %v3588_v39 = vunpack.c.l.b16 %v3538_v29  ;;  %v3589_v13 = vunpack.c.h.b16 %v3538_v29  ;;  %v3590_v58 = vunpack.c.l.b16 %v3541_v53  ;;  %v3591_v25 = vunpack.c.h.b16 %v3541_v53 }
 0x3ba   : > { %v3032_v41 = vrot.slane %v3031_v14, 1  ;;  %v3143_v7 = vmul.f32 %v5363_v31, %v5363_v31  ;;  %v3060_v54 = vmul.f32 %v6369_v61, %v6369_v61  ;;  %v3109_v34 = vadd.f32 %v3108_v26, %v3107_v37 }
 0x3bb   : > { %v3620_v28 = vpack.c.b16 %v3588_v39, %v3588_v39  ;;  %v3621_v63 = vpack.c.b16 %v3589_v13, %v3589_v13  ;;  %v3622_v55 = vpack.c.b16 %v3590_v58, %v3590_v58  ;;  %v3623_v60 = vpack.c.b16 %v3591_v25, %v3591_v25 }
 0x3bc   : > { %v3033_v44 = vadd.f32 %v3032_v41, %v3031_v14  ;;  %v3110_v31 = vsel %vm399_vm0, %v3059_v45, 0.0  ;;  %v3172_v43 = vsel %vm399_vm0, %v3140_v62, 0.0  ;;  %v3173_v33 = vsel %vm399_vm0, %v3141_v27, 0.0  ;;  %v6384_v45 = vld [vmem:[#allocation23_spill] sm:$0xff] }
 0x3bd   : > { %3685 = vst.msk [vmem:[%s4151_s24 + $0x60] sm:$0xf] %vm3660_vm13, %v3620_v28  ;;  %v3174_v22 = vadd.f32 %v3173_v33, %v3172_v43  ;;  %v3175_v61 = vsel %vm399_vm0, %v3142_v48, 0.0  ;;  %v3177_v38 = vsel %vm399_vm0, %v3143_v7, 0.0  ;;  %v3111_v5 = vadd.f32 %v3110_v31, %v3109_v34  ;;  %v6382_v28 = vld [vmem:[#allocation21_spill] sm:$0xff] }
 0x3be   : > { %3686 = vst.msk [vmem:[%s4151_s24 + $0x64] sm:$0xf] %vm3660_vm13, %v3621_v63  ;;  %v3034_v46 = vadd.f32 %v3033_v44, %v2964_v49  ;;  %v3061_v29 = vmul.f32 %v6370_v3, %v6370_v3  ;;  %v3112_v53 = vsel %vm399_vm0, %v3060_v54, 0.0  ;;  %v3146_v47 = vmul.f32 %v6380_v16, %v6380_v16 }
 0x3bf   : > { %3687 = vst.msk [vmem:[%s4151_s24 + $0x68] sm:$0xf] %vm3660_vm13, %v3622_v55  ;;  %v3499_v50 = vpop.permute.xlu0 %3498  ;;  %v3176_v21 = vadd.f32 %v3175_v61, %v3174_v22  ;;  %v3179_v39 = vsel %vm399_vm0, %v3144_v18, 0.0  ;;  %v3147_v58 = vmul.f32 %v6381_v36, %v6381_v36  ;;  %v3181_v25 = vsel %vm399_vm0, %v3145_v10, 0.0  ;;  %v6386_v18 = vld [vmem:[#allocation26_spill] sm:$0xff] }
 0x3c0   : > { %3688 = vst.msk [vmem:[%s4151_s24 + $0x6c] sm:$0xf] %vm3660_vm13, %v3623_v60  ;;  %v3547_v15 = vsel %vm399_vm0, %v3387_v4, %v3499_v50  ;;  %v3035_v51 = vadd.f32 %v3034_v46, %v2895_v40  ;;  %v3113_v14 = vadd.f32 %v3112_v53, %v3111_v5  ;;  %v3062_v11 = vmul.f32 %v6371_v52, %v6371_v52  ;;  %v6383_v4 = vld [vmem:[#allocation22_spill] sm:$0xff]  ;;  %v6385_v40 = vld [vmem:[#allocation24_spill] sm:$0xff] }
 0x3c1   : > { %v3594_v17 = vunpack.c.l.b16 %v3547_v15  ;;  %v3595_v24 = vunpack.c.h.b16 %v3547_v15  ;;  %v3178_v13 = vadd.f32 %v3177_v38, %v3176_v21  ;;  %v3114_v3 = vsel %vm399_vm0, %v3061_v29, 0.0  ;;  %v6388_v22 = vld [vmem:[#allocation30_spill] sm:$0xff]  ;;  %v6389_v5 = vld [vmem:[#allocation32_spill] sm:$0xff] }
 0x3c2   : > { %3037 = vst.msk [vmem:[%s4133_s30] sm:$0x1] %vm3036_vm14, %v3035_v51  ;;  %v3148_v63 = vmul.f32 %v6382_v28, %v6382_v28  ;;  %v3183_v55 = vsel %vm399_vm0, %v3146_v47, 0.0  ;;  %v3149_v49 = vmul.f32 %v6383_v4, %v6383_v4  ;;  %v3185_v41 = vsel %vm399_vm0, %v3147_v58, 0.0  ;;  %v6387_v51 = vld [vmem:[#allocation28_spill] sm:$0xff] }
 0x3c3   : > { %v3626_v12 = vpack.c.b16 %v3594_v17, %v3594_v17  ;;  %v3627_v57 = vpack.c.b16 %v3595_v24, %v3595_v24  ;;  %v3180_v20 = vadd.f32 %v3179_v39, %v3178_v13  ;;  %v3115_v37 = vadd.f32 %v3114_v3, %v3113_v14  ;;  %v6390_v39 = vld [vmem:[#allocation34_spill] sm:$0xff] }
 0x3c4   : > { %v3063_v44 = vmul.f32 %v6372_v23, %v6372_v23  ;;  %v3116_v52 = vsel %vm399_vm0, %v3062_v11, 0.0  ;;  %v3150_v26 = vmul.f32 %v6384_v45, %v6384_v45  ;;  %v3187_v27 = vsel %vm399_vm0, %v3148_v63, 0.0  ;;  %v6392_v63 = vld [vmem:[#allocation36_spill] sm:$0xff]  ;;  %v6394_v45 = vld [vmem:[#allocation37_spill] sm:$0xff] }
 0x3c5   : > { %3691 = vst.msk [vmem:[%s4151_s24 + $0x78] sm:$0xf] %vm3660_vm13, %v3626_v12  ;;  %v3182_v60 = vadd.f32 %v3181_v25, %v3180_v20  ;;  %v3151_v48 = vmul.f32 %v6385_v40, %v6385_v40  ;;  %v3189_v7 = vsel %vm399_vm0, %v3149_v49, 0.0  ;;  %v3117_v15 = vadd.f32 %v3116_v52, %v3115_v37  ;;  %v6391_v25 = vld [vmem:[#allocation35_spill] sm:$0xff]  ;;  %v6393_v49 = vld [vmem:[#allocation6_spill] sm:$0xff]  ;;  %v6395_v40 = vld [vmem:[#allocation5_spill] sm:$0xff] }
 0x3c6   : > { %3692 = vst.msk [vmem:[%s4151_s24 + $0x7c] sm:$0xf] %vm3660_vm13, %v3627_v57  ;;  %v3064_v54 = vmul.f32 %v6373_v6, %v6373_v6  ;;  %v3118_v23 = vsel %vm399_vm0, %v3063_v44, 0.0  ;;  %v3152_v17 = vmul.f32 %v6386_v18, %v6386_v18  ;;  %v3191_v24 = vsel %vm399_vm0, %v3150_v26, 0.0 }
 0x3c7   : > { %v3184_v62 = vadd.f32 %v3183_v55, %v3182_v60  ;;  %v3153_v31 = vmul.f32 %v6387_v51, %v6387_v51  ;;  %v3193_v43 = vsel %vm399_vm0, %v3151_v48, 0.0  ;;  %v3119_v33 = vadd.f32 %v3118_v23, %v3117_v15  ;;  %v6396_v23 = vld [vmem:[#allocation38_spill] sm:$0xff] }
 0x3c8   : > { %v3065_v57 = vmul.f32 %v6374_v30, %v6374_v30  ;;  %v3120_v6 = vsel %vm399_vm0, %v3064_v54, 0.0  ;;  %v3154_v61 = vmul.f32 %v6388_v22, %v6388_v22  ;;  %v3195_v10 = vsel %vm399_vm0, %v3152_v17, 0.0 }
 0x3c9   : > { %v3186_v50 = vadd.f32 %v3185_v41, %v3184_v62  ;;  %v3155_v21 = vmul.f32 %v6389_v5, %v6389_v5  ;;  %v3197_v29 = vsel %vm399_vm0, %v3153_v31, 0.0  ;;  %v3121_v53 = vadd.f32 %v3120_v6, %v3119_v33 }
 0x3ca   : > { %v3066_v47 = vmul.f32 %v6375_v42, %v6375_v42  ;;  %v3122_v30 = vsel %vm399_vm0, %v3065_v57, 0.0  ;;  %v3156_v13 = vmul.f32 %v6390_v39, %v6390_v39  ;;  %v3199_v36 = vsel %vm399_vm0, %v3154_v61, 0.0  ;;  %v6398_v57 = vld [vmem:[#allocation39_spill] sm:$0xff] }
 0x3cb   : > { %v3188_v46 = vadd.f32 %v3187_v27, %v3186_v50  ;;  %v3157_v14 = vmul.f32 %v6391_v25, %v6391_v25  ;;  %v3201_v20 = vsel %vm399_vm0, %v3155_v21, 0.0  ;;  %v3123_v11 = vadd.f32 %v3122_v30, %v3121_v53  ;;  %v6399_v53 = vld [vmem:[#allocation11_spill] sm:$0xff] }
 0x3cc   : > { %v3067_v28 = vmul.f32 %v6376_v32, %v6376_v32  ;;  %v3124_v42 = vsel %vm399_vm0, %v3066_v47, 0.0  ;;  %v3158_v55 = vmul.f32 %v6392_v63, %v6392_v63  ;;  %v3203_v60 = vsel %vm399_vm0, %v3156_v13, 0.0 }
 0x3cd   : > { %v3190_v34 = vadd.f32 %v3189_v7, %v3188_v46  ;;  %v3159_v41 = vmul.f32 %v6393_v49, %v6393_v49  ;;  %v3205_v37 = vsel %vm399_vm0, %v3157_v14, 0.0  ;;  %v3125_v62 = vadd.f32 %v3124_v42, %v3123_v11 }
 0x3ce   : > { %v3068_v52 = vmul.f32 %v6377_v19, %v6377_v19  ;;  %v3126_v32 = vsel %vm399_vm0, %v3067_v28, 0.0  ;;  %v3160_v26 = vmul.f32 %v6394_v45, %v6394_v45  ;;  %v3207_v27 = vsel %vm399_vm0, %v3158_v55, 0.0 }
 0x3cf   : > { %v3192_v12 = vadd.f32 %v3191_v24, %v3190_v34  ;;  %v3161_v48 = vmul.f32 %v6395_v40, %v6395_v40  ;;  %v3209_v7 = vsel %vm399_vm0, %v3159_v41, 0.0  ;;  %v3127_v15 = vadd.f32 %v3126_v32, %v3125_v62  ;;  %v6397_v34 = vld [vmem:[#allocation4_spill] sm:$0xff]  ;;  %v3038_v40 = vld [vmem:[%s4143_s14] sm:$0x1] }
 0x3d0   : > { %v3069_v54 = vmul.f32 %v6378_v9, %v6378_v9  ;;  %v3128_v19 = vsel %vm399_vm0, %v3068_v52, 0.0  ;;  %v3162_v18 = vmul.f32 %v6396_v23, %v6396_v23  ;;  %v3211_v17 = vsel %vm399_vm0, %v3160_v26, 0.0 }
 0x3d1   : > { %v3194_v38 = vadd.f32 %v3193_v43, %v3192_v12  ;;  %v3163_v51 = vmul.f32 %v6397_v34, %v6397_v34  ;;  %v3213_v31 = vsel %vm399_vm0, %v3161_v48, 0.0  ;;  %v3129_v43 = vadd.f32 %v3128_v19, %v3127_v15 }
 0x3d2   : > { %v3070_v12 = vmul.f32 %v6379_v0, %v6379_v0  ;;  %v3130_v9 = vsel %vm399_vm0, %v3069_v54, 0.0  ;;  %v3164_v6 = vmul.f32 %v6398_v57, %v6398_v57  ;;  %v3215_v22 = vsel %vm399_vm0, %v3162_v18, 0.0 }
 0x3d3   : > { %v3196_v16 = vadd.f32 %v3195_v10, %v3194_v38  ;;  %v3165_v10 = vmul.f32 %v5530_v35, %v5530_v35  ;;  %v3217_v38 = vsel %vm399_vm0, %v3163_v51, 0.0  ;;  %v3131_v5 = vadd.f32 %v3130_v9, %v3129_v43 }
 0x3d4   : > { %v3166_v0 = vmul.f32 %v6399_v53, %v6399_v53  ;;  %v3167_v30 = vmul.f32 %v5541_v56, %v5541_v56  ;;  %v3168_v35 = vmul.f32 %v5546_v1, %v5546_v1  ;;  %v3169_v14 = vmul.f32 %v5551_v59, %v5551_v59 }
 0x3d5   : > { %v3198_v58 = vadd.f32 %v3197_v29, %v3196_v16  ;;  %v3132_v29 = vsel %vm399_vm0, %v3070_v12, 0.0  ;;  %v3219_v16 = vsel %vm399_vm0, %v3164_v6, 0.0  ;;  %v3221_v39 = vsel %vm399_vm0, %v3165_v10, 0.0 }
 0x3d6   : > { %v3133_v13 = vadd.f32 %v3132_v29, %v3131_v5  ;;  %v3170_v56 = vmul.f32 %v5556_v8, %v5556_v8  ;;  %v3227_v28 = vsel %vm399_vm0, %v3168_v35, 0.0  ;;  %v3171_v63 = vmul.f32 %v5561_v2, %v5561_v2 }
 0x3d7   : > { %v3200_v3 = vadd.f32 %v3199_v36, %v3198_v58  ;;  %v3223_v58 = vsel %vm399_vm0, %v3166_v0, 0.0  ;;  %v3229_v1 = vsel %vm399_vm0, %v3169_v14, 0.0 }
 0x3d8   : > { %v3134_v11 = vrot.slane %v3133_v13, 4  ;;  %v3231_v59 = vsel %vm399_vm0, %v3170_v56, 0.0  ;;  %v3233_v49 = vsel %vm399_vm0, %v3171_v63, 0.0 }
 0x3d9   : > { %v3202_v4 = vadd.f32 %v3201_v20, %v3200_v3  ;;  %v3225_v20 = vsel %vm399_vm0, %v3167_v30, 0.0 }
 0x3da   : > { %v3135_v55 = vadd.f32 %v3134_v11, %v3133_v13 }
 0x3db   : > { %v3204_v44 = vadd.f32 %v3203_v60, %v3202_v4 }
 0x3dc   : > { %v3136_v41 = vrot.slane %v3135_v55, 2 }
 0x3dd   : > { %v3206_v50 = vadd.f32 %v3205_v37, %v3204_v44 }
 0x3de   : > { %v3137_v62 = vadd.f32 %v3136_v41, %v3135_v55 }
 0x3df   : > { %v3208_v46 = vadd.f32 %v3207_v27, %v3206_v50 }
 0x3e0   : > { %v3138_v32 = vrot.slane %v3137_v62, 1 }
 0x3e1   : > { %v3210_v24 = vadd.f32 %v3209_v7, %v3208_v46 }
 0x3e2   : > { %v3139_v26 = vadd.f32 %v3138_v32, %v3137_v62 }
 0x3e3   : > { %v3212_v33 = vadd.f32 %v3211_v17, %v3210_v24 }
 0x3e5   : > { %v3214_v61 = vadd.f32 %v3213_v31, %v3212_v33 }
 0x3e7   : > { %v3216_v21 = vadd.f32 %v3215_v22, %v3214_v61 }
 0x3e9   : > { %v3218_v47 = vadd.f32 %v3217_v38, %v3216_v21 }
 0x3eb   : > { %v3220_v36 = vadd.f32 %v3219_v16, %v3218_v47 }
 0x3ed   : > { %v3222_v25 = vadd.f32 %v3221_v39, %v3220_v36 }
 0x3ef   : > { %v3224_v3 = vadd.f32 %v3223_v58, %v3222_v25 }
 0x3f1   : > { %v3226_v42 = vadd.f32 %v3225_v20, %v3224_v3 }
 0x3f3   : > { %v3228_v60 = vadd.f32 %v3227_v28, %v3226_v42 }
 0x3f5   : > { %v3230_v4 = vadd.f32 %v3229_v1, %v3228_v60 }
 0x3f7   : > { %v3232_v37 = vadd.f32 %v3231_v59, %v3230_v4 }
 0x3f9   : > { %v3234_v8 = vadd.f32 %v3233_v49, %v3232_v37 }
 0x3fb   : > { %v3235_v44 = vrot.slane %v3234_v8, 4 }
 0x3fd   : > { %v3236_v52 = vadd.f32 %v3235_v44, %v3234_v8 }
 0x3ff   : > { %v3237_v45 = vrot.slane %v3236_v52, 2 }
 0x401   : > { %v3238_v2 = vadd.f32 %v3237_v45, %v3236_v52 }
 0x403   : > { %v3239_v27 = vrot.slane %v3238_v2, 1 }
 0x405   : > { %v3240_v50 = vadd.f32 %v3239_v27, %v3238_v2 }
 0x407   : > { %v3241_v48 = vadd.f32 %v3240_v50, %v3139_v26 }
 0x409   : > { %v3242_v7 = vadd.f32 %v3241_v48, %v3038_v40 }
 0x40b   : > { %3243 = vst.msk [vmem:[%s4143_s14] sm:$0x1] %vm3036_vm14, %v3242_v7 }
 0x40c PF: > { %s15_s19 = sadd.s32 1, %s4063_s19   ;;  %s6400_s15 = smov %s4055_s17 }
 0x40d   : > { %p12_p10 = scmp.ge.s32.totalorder %s15_s19, 6   ;;  %s6401_s16 = smov %s4059_s18 }
 0x40e   : > { %s6402_s17 = smov %s6405_s20  ;;  %s6403_s18 = smov %s6409_s21 }
 0x40f   :  { %14 = sbr.rel (!%p12_p10) target bundleno = 3 (0x3), region = 97 }

</bundles_post_ra>
